<compile_context>
chip_gen: v7x
topology: tpu7x:2x2x1
jax: 0.10.0
libtpu: 0.0.40
codegen_flags: <defaults>
</compile_context>

<pallas_src>
import numpy as np
import jax
import jax.numpy as jnp
from jax import lax
from jax.experimental import pallas as pl
from jax.experimental.pallas import tpu as pltpu


_VMEM = pl.BlockSpec(memory_space=pltpu.MemorySpace.VMEM)


# ---------------- one-time parameter preparation (not on the hot path) --------

def bn_fold(gamma, beta, mean, var, eps=1e-5):
    scale = gamma / jnp.sqrt(var + eps)
    shift = beta - mean * scale
    return scale, shift


def _banded_weights(w_oihw, w_in, w_out, pad=2):
    """(Cout, Cin, 3, 3) -> (3*w_in*Cin, w_out*Cout): one banded matrix per dy.

    For a fixed dy, the three dx taps occupy disjoint diagonals of a
    (w_in*Cin, w_out*Cout) band, so they are summed exactly into one weight
    and each conv row needs ONE matmul over the full activation row band.
    Horizontal zero-padding columns of the conv input are dropped (their
    weight rows would only ever multiply zeros).
    """
    w = np.asarray(w_oihw, dtype=np.float32)
    cout, cin = w.shape[0], w.shape[1]
    out = np.zeros((3, w_in * cin, w_out * cout), dtype=np.float32)
    for dy in range(3):
        for wi in range(w_in):
            for wo_ in range(w_out):
                dx = wi + pad - wo_
                if 0 <= dx < 3:
                    out[dy, wi * cin:(wi + 1) * cin,
                        wo_ * cout:(wo_ + 1) * cout] = w[:, :, dy, dx].T
    return jnp.asarray(out.reshape(3 * w_in * cin, w_out * cout))


def _expand_fc1_weight(w1, c2, hop, wop, pw):
    """Fold pool even-(h, w) position selection + NCHW flatten order into fc1.

    The in-kernel fc1 input is fcin[n, i*pw + 2*j*c2 + c] = pooled[n, c, i, j];
    every other column multiplies a zero row.
    """
    src = np.zeros((hop * pw,), dtype=np.int32)
    valid = np.zeros((hop * pw,), dtype=bool)
    for i in range(hop):
        for j in range(wop):
            for c in range(c2):
                t = i * pw + 2 * j * c2 + c
                src[t] = c * hop * wop + i * wop + j
                valid[t] = True
    gathered = jnp.take(w1, jnp.asarray(src), axis=0)
    return jnp.where(jnp.asarray(valid)[:, None], gathered, jnp.float32(0.0))


def prepare_params(params, H=16, W=16):
    (w1c, b1c, g1, be1, m1, v1) = params["conv1"]
    (w2c, b2c, g2, be2, m2, v2) = params["conv2"]
    (wf1, bf1, gf1, bef1, mf1, vf1,
     wf2, bf2, gf2, bef2, mf2, vf2, wc, bc) = params["fc"]

    c2 = w2c.shape[0]
    wo1, wo2 = W + 2, W + 4          # conv k=3, pad=2 -> +2 per spatial dim
    ho2 = H + 4
    hop, wop = ho2 // 2, wo2 // 2
    pw = (wo2 - 1) * c2              # pooled row-block width in the fc1 input

    sc1, sh1 = bn_fold(g1, be1, m1, v1)
    sc2, sh2 = bn_fold(g2, be2, m2, v2)
    s1, t1 = bn_fold(gf1, bef1, mf1, vf1)
    s2, t2 = bn_fold(gf2, bef2, mf2, vf2)

    bf16 = jnp.bfloat16
    return dict(
        wbd1=_banded_weights(w1c, W, wo1).astype(bf16),     # (3*W*Cin, wo1*c1)
        sc1=jnp.tile(sc1, wo1)[None, :],
        sh1=jnp.tile(sc1 * b1c + sh1, wo1)[None, :],
        wbd2=_banded_weights(w2c, wo1, wo2).astype(bf16),   # (3*wo1*c1, wo2*c2)
        sc2=jnp.tile(sc2, wo2)[None, :],
        sh2=jnp.tile(sc2 * b2c + sh2, wo2)[None, :],
        w1e=_expand_fc1_weight(wf1, c2, hop, wop, pw).astype(bf16),
        sfc1=s1[None, :], shfc1=(s1 * bf1 + t1)[None, :],
        wfc2=wf2,
        sfc2=s2[None, :], shfc2=(s2 * bf2 + t2)[None, :],
        wcls=wc, bcls=bc[None, :],
    )


# ---------------- fused forward --------------------------------------------

def vgg_forward(x_nchw, prep):
    N, cin, H, W = x_nchw.shape
    hp1 = H + 4                      # vertically padded conv1-input rows/sample
    ho1, wo1 = H + 2, W + 2          # conv1 output spatial
    ho2, wo2 = H + 4, W + 4          # conv2 output spatial
    c1 = prep["sc1"].shape[1] // wo1
    c2 = prep["sc2"].shape[1] // wo2
    hop = ho2 // 2
    pw = (wo2 - 1) * c2
    hp2p = -(-(ho1 + 4) // 8) * 8    # conv2-input rows/sample, sublane aligned (24)
    kw1 = W * cin                    # conv1 banded K (no horizontal pad stored)
    kw2 = wo1 * c1                   # conv2 banded K
    m1 = N * hp1 - 2                 # batch-folded conv1 matmul M
    m2 = N * hp2p - 2                # batch-folded conv2 matmul M
    ncls = prep["bcls"].shape[1]

    # Input prep (tiny, once per forward): NCHW -> NHWC, pad ROWS only (column
    # padding is folded into the banded conv1 weight), flatten to the 2-D
    # lane-dense (N*hp1, W*Cin) slab the kernel expects, cast to bf16.
    xp = jnp.transpose(x_nchw, (0, 2, 3, 1))
    xp = jnp.pad(xp, ((0, 0), (2, 2), (0, 0), (0, 0)))
    xp = xp.reshape(N * hp1, W * cin).astype(jnp.bfloat16)

    def kernel(xp_ref, wbd1_ref, sc1_ref, sh1_ref,
               wbd2_ref, sc2_ref, sh2_ref,
               w1e_ref, sfc1_ref, shfc1_ref,
               wfc2_ref, sfc2_ref, shfc2_ref,
               wcls_ref, bcls_ref,
               o_ref, xp2_ref, fcin_ref):
        # Zero the conv2-input scratch once; untouched rows stay 0 = conv padding.
        xp2_ref[...] = jnp.zeros_like(xp2_ref)

        # ---- conv1 + BN + ReLU: 3 banded per-dy matmuls, batch folded into M ----
        acc1 = jnp.zeros((m1, wo1 * c1), jnp.float32)
        for dy in range(3):
            acc1 = acc1 + jnp.dot(xp_ref[dy:dy + m1, :],
                                  wbd1_ref[dy * kw1:(dy + 1) * kw1, :],
                                  preferred_element_type=jnp.float32)
        a1 = jnp.maximum(acc1 * sc1_ref[...] + sh1_ref[...], 0.0)
        # rows straddling sample boundaries only saw zero pad rows; skip them here
        for n in range(N):
            xp2_ref[n * hp2p + 2: n * hp2p + 2 + ho1, :] = (
                a1[n * hp1: n * hp1 + ho1, :].astype(xp2_ref.dtype))

        # ---- conv2 + BN + ReLU ----
        acc2 = jnp.zeros((m2, wo2 * c2), jnp.float32)
        for dy in range(3):
            acc2 = acc2 + jnp.dot(xp2_ref[dy:dy + m2, :],
                                  wbd2_ref[dy * kw2:(dy + 1) * kw2, :],
                                  preferred_element_type=jnp.float32)
        a2 = jnp.maximum(acc2 * sc2_ref[...] + sh2_ref[...], 0.0)   # (m2, wo2*c2)

        # ---- fused 2x2 max-pool: two slab-level maxes + per-row gather --------
        hmax = jnp.maximum(a2[:-1, :], a2[1:, :])      # adjacent-row pairs
        b = jnp.maximum(hmax[:, :pw], hmax[:, c2:])    # adjacent-column pairs
        # even-(h, w) selection + NCHW flatten order are folded into w1e
        for n in range(N):
            for i in range(hop):
                r = n * hp2p + 2 * i
                fcin_ref[n:n + 1, i * pw:(i + 1) * pw] = (
                    b[r:r + 1, :].astype(fcin_ref.dtype))

        # ---- FC head (dropout = identity in eval mode) ----
        h = jnp.dot(fcin_ref[...], w1e_ref[...], preferred_element_type=jnp.float32)
        h = jnp.maximum(h * sfc1_ref[...] + shfc1_ref[...], 0.0)    # BN1d + ReLU
        h = jnp.dot(h, wfc2_ref[...], preferred_element_type=jnp.float32)
        h = jnp.maximum(h * sfc2_ref[...] + shfc2_ref[...], 0.0)    # BN1d + ReLU
        o_ref[...] = (jnp.dot(h, wcls_ref[...], preferred_element_type=jnp.float32)
                      + bcls_ref[...])

    return pl.pallas_call(
        kernel,
        out_shape=jax.ShapeDtypeStruct((N, ncls), jnp.float32),
        in_specs=[_VMEM] * 15,
        out_specs=_VMEM,
        scratch_shapes=[
            pltpu.VMEM((N * hp2p, kw2), jnp.bfloat16),   # padded conv2 input
            pltpu.VMEM((N, hop * pw), jnp.bfloat16),     # fc1 input rows
        ],
    )(xp,
      prep["wbd1"], prep["sc1"], prep["sh1"],
      prep["wbd2"], prep["sc2"], prep["sh2"],
      prep["w1e"], prep["sfc1"], prep["shfc1"],
      prep["wfc2"], prep["sfc2"], prep["shfc2"],
      prep["wcls"], prep["bcls"])


# ---------------- pure-JAX reference (for correctness check only) ------------

def reference_forward(x_nchw, params, eps=1e-5):
    def conv_bn_relu(x, w, b, g, be, m, v):
        y = lax.conv_general_dilated(
            x, w, window_strides=(1, 1), padding=((2, 2), (2, 2)),
            dimension_numbers=("NCHW", "OIHW", "NCHW"))
        y = y + b[None, :, None, None]
        y = (y - m[None, :, None, None]) / jnp.sqrt(v[None, :, None, None] + eps)
        y = y * g[None, :, None, None] + be[None, :, None, None]
        return jnp.maximum(y, 0.0)

    x = conv_bn_relu(x_nchw, *params["conv1"])
    x = conv_bn_relu(x, *params["conv2"])
    x = lax.reduce_window(x, -jnp.inf, lax.max, (1, 1, 2, 2), (1, 1, 2, 2), "VALID")
    x = x.reshape(x.shape[0], -1)
    (w1, b1, g1, be1, m1, v1, w2, b2, g2, be2, m2, v2, wc, bc) = params["fc"]
    h = x @ w1 + b1
    h = jnp.maximum((h - m1) / jnp.sqrt(v1 + eps) * g1 + be1, 0.0)
    h = h @ w2 + b2
    h = jnp.maximum((h - m2) / jnp.sqrt(v2 + eps) * g2 + be2, 0.0)
    return h @ wc + bc


# ---------------- deterministic parameter init -------------------------------

def init_params(key, cin=4, convs=(8, 16), fcs=(32, 32), nofclasses=10, H=16, W=16):
    keys = iter(jax.random.split(key, 40))

    def nrm(shape, s=0.1):
        return jax.random.normal(next(keys), shape, jnp.float32) * s

    def bn(c):
        gamma = jax.random.uniform(next(keys), (c,), jnp.float32, 0.5, 1.5)
        beta = nrm((c,), 0.1)
        mean = nrm((c,), 0.1)
        var = jax.random.uniform(next(keys), (c,), jnp.float32, 0.5, 1.5)
        return gamma, beta, mean, var

    params = {}
    c_prev = cin
    conv_params = []
    for cout in convs:
        w = nrm((cout, c_prev, 3, 3))          # PyTorch (Cout, Cin, 3, 3)
        b = nrm((cout,))
        conv_params.append((w, b) + bn(cout))
        c_prev = cout
    params["conv1"], params["conv2"] = conv_params

    # flattened dim: each conv (k=3, pad=2) adds +2 per spatial dim, one 2x2 pool
    Ho, Wo = (H + 4) // 2, (W + 4) // 2
    d = c_prev * Ho * Wo                        # 16 * 10 * 10 = 1600

    fcp = []
    dprev = d
    for fs in fcs:
        w = nrm((dprev, fs), 0.05)
        b = nrm((fs,))
        fcp.extend([w, b, *bn(fs)])
        dprev = fs
    fcp.extend([nrm((dprev, nofclasses), 0.1), nrm((nofclasses,))])
    params["fc"] = tuple(fcp)
    return params


if __name__ == "__main__":
    key = jax.random.PRNGKey(0)
    kx, kp = jax.random.split(key)
    # input_size = [4, 16, 16], batch = 2 (NCHW, like the PyTorch module)
    x = jax.random.normal(kx, (2, 4, 16, 16), jnp.float32)
    params = init_params(kp)
    prep = prepare_params(params)               # one-time weight/BN preparation

    fwd = jax.jit(lambda a: vgg_forward(a, prep))
    out = jax.block_until_ready(fwd(x))
    assert out.shape == (2, 10) and out.dtype == jnp.float32

    ref = jax.block_until_ready(reference_forward(x, params))
    # loose tolerance: bf16 storage + MXU bf16 passes (same rounding as the
    # default-precision f32 matmuls in the reference)
    assert bool(jnp.allclose(out, ref, rtol=5e-2, atol=5e-2)), \
        float(jnp.max(jnp.abs(out - ref)))

    print("KERNEL_OK")
</pallas_src>

<mosaic_0001>
module attributes {stable_mosaic.version = 11 : i64} {
  func.func @kernel(%arg0: memref<40x64xbf16, #tpu.memory_space<vmem>>, %arg1: memref<192x144xbf16, #tpu.memory_space<vmem>>, %arg2: memref<1x144xf32, #tpu.memory_space<vmem>>, %arg3: memref<1x144xf32, #tpu.memory_space<vmem>>, %arg4: memref<432x320xbf16, #tpu.memory_space<vmem>>, %arg5: memref<1x320xf32, #tpu.memory_space<vmem>>, %arg6: memref<1x320xf32, #tpu.memory_space<vmem>>, %arg7: memref<3040x32xbf16, #tpu.memory_space<vmem>>, %arg8: memref<1x32xf32, #tpu.memory_space<vmem>>, %arg9: memref<1x32xf32, #tpu.memory_space<vmem>>, %arg10: memref<32x32xf32, #tpu.memory_space<vmem>>, %arg11: memref<1x32xf32, #tpu.memory_space<vmem>>, %arg12: memref<1x32xf32, #tpu.memory_space<vmem>>, %arg13: memref<32x10xf32, #tpu.memory_space<vmem>>, %arg14: memref<1x10xf32, #tpu.memory_space<vmem>>, %arg15: memref<2x10xf32, #tpu.memory_space<vmem>>, %arg16: memref<48x144xbf16, #tpu.memory_space<vmem>>, %arg17: memref<2x3040xbf16, #tpu.memory_space<vmem>>) attributes {dimension_semantics = [], scalar_prefetch = 0 : i64, scratch_operands = 2 : i64, tpu.core_type = #tpu.core_type<tc>} {
    %cst = arith.constant 0.000000e+00 : bf16
    %0 = vector.broadcast %cst : bf16 to vector<48x144xbf16>
    %c0 = arith.constant 0 : index
    %c0_0 = arith.constant 0 : index
    %1 = vector.load %arg16[%c0, %c0_0] : memref<48x144xbf16, #tpu.memory_space<vmem>>, vector<48x144xbf16>
    tpu.vector_store %arg16[%c0, %c0_0], %0 {strides = array<i32>} : memref<48x144xbf16, #tpu.memory_space<vmem>>, vector<48x144xbf16>,
    %cst_1 = arith.constant 0.000000e+00 : f32
    %2 = vector.broadcast %cst_1 : f32 to vector<38x144xf32>
    %c0_2 = arith.constant 0 : index
    %c0_3 = arith.constant 0 : index
    %3 = vector.load %arg0[%c0_2, %c0_3] : memref<40x64xbf16, #tpu.memory_space<vmem>>, vector<38x64xbf16>
    %c0_4 = arith.constant 0 : index
    %c0_5 = arith.constant 0 : index
    %4 = vector.load %arg1[%c0_4, %c0_5] : memref<192x144xbf16, #tpu.memory_space<vmem>>, vector<64x144xbf16>
    %cst_6 = arith.constant dense<0.000000e+00> : vector<38x144xf32>
    %5 = tpu.matmul %3, %4, %cst_6 {dimension_numbers = #tpu.dot_dimension_numbers<[1], [0], [0], [1], [0, 0, 1, 1], [], []>} : vector<38x64xbf16>, vector<64x144xbf16>, vector<38x144xf32> -> vector<38x144xf32>
    %6 = arith.addf %2, %5 : vector<38x144xf32>
    %c1 = arith.constant 1 : index
    %c0_7 = arith.constant 0 : index
    %7 = vector.load %arg0[%c1, %c0_7] : memref<40x64xbf16, #tpu.memory_space<vmem>>, vector<38x64xbf16>
    %c64 = arith.constant 64 : index
    %c0_8 = arith.constant 0 : index
    %8 = vector.load %arg1[%c64, %c0_8] : memref<192x144xbf16, #tpu.memory_space<vmem>>, vector<64x144xbf16>
    %cst_9 = arith.constant dense<0.000000e+00> : vector<38x144xf32>
    %9 = tpu.matmul %7, %8, %cst_9 {dimension_numbers = #tpu.dot_dimension_numbers<[1], [0], [0], [1], [0, 0, 1, 1], [], []>} : vector<38x64xbf16>, vector<64x144xbf16>, vector<38x144xf32> -> vector<38x144xf32>
    %10 = arith.addf %6, %9 : vector<38x144xf32>
    %c2 = arith.constant 2 : index
    %c0_10 = arith.constant 0 : index
    %11 = vector.load %arg0[%c2, %c0_10] : memref<40x64xbf16, #tpu.memory_space<vmem>>, vector<38x64xbf16>
    %c128 = arith.constant 128 : index
    %c0_11 = arith.constant 0 : index
    %12 = vector.load %arg1[%c128, %c0_11] : memref<192x144xbf16, #tpu.memory_space<vmem>>, vector<64x144xbf16>
    %cst_12 = arith.constant dense<0.000000e+00> : vector<38x144xf32>
    %13 = tpu.matmul %11, %12, %cst_12 {dimension_numbers = #tpu.dot_dimension_numbers<[1], [0], [0], [1], [0, 0, 1, 1], [], []>} : vector<38x64xbf16>, vector<64x144xbf16>, vector<38x144xf32> -> vector<38x144xf32>
    %14 = arith.addf %10, %13 : vector<38x144xf32>
    %c0_13 = arith.constant 0 : index
    %c0_14 = arith.constant 0 : index
    %15 = vector.load %arg2[%c0_13, %c0_14] : memref<1x144xf32, #tpu.memory_space<vmem>>, vector<1x144xf32>
    %16 = vector.broadcast %15 : vector<1x144xf32> to vector<38x144xf32>
    %17 = arith.mulf %14, %16 : vector<38x144xf32>
    %c0_15 = arith.constant 0 : index
    %c0_16 = arith.constant 0 : index
    %18 = vector.load %arg3[%c0_15, %c0_16] : memref<1x144xf32, #tpu.memory_space<vmem>>, vector<1x144xf32>
    %19 = vector.broadcast %18 : vector<1x144xf32> to vector<38x144xf32>
    %20 = arith.addf %17, %19 : vector<38x144xf32>
    %cst_17 = arith.constant 0.000000e+00 : f32
    %21 = vector.broadcast %cst_17 : f32 to vector<38x144xf32>
    %22 = arith.maximumf %20, %21 : vector<38x144xf32>
    %23 = vector.extract_strided_slice %22 {offsets = [0, 0], sizes = [18, 144], strides = [1, 1]} : vector<38x144xf32> to vector<18x144xf32>
    %24 = arith.truncf %23 : vector<18x144xf32> to vector<18x144xbf16>
    %c2_18 = arith.constant 2 : index
    %c0_19 = arith.constant 0 : index
    %25 = vector.load %arg16[%c2_18, %c0_19] : memref<48x144xbf16, #tpu.memory_space<vmem>>, vector<18x144xbf16>
    tpu.vector_store %arg16[%c2_18, %c0_19], %24 {strides = array<i32>} : memref<48x144xbf16, #tpu.memory_space<vmem>>, vector<18x144xbf16>,
    %26 = vector.extract_strided_slice %22 {offsets = [20, 0], sizes = [18, 144], strides = [1, 1]} : vector<38x144xf32> to vector<18x144xf32>
    %27 = arith.truncf %26 : vector<18x144xf32> to vector<18x144xbf16>
    %c26 = arith.constant 26 : index
    %c0_20 = arith.constant 0 : index
    %28 = vector.load %arg16[%c26, %c0_20] : memref<48x144xbf16, #tpu.memory_space<vmem>>, vector<18x144xbf16>
    tpu.vector_store %arg16[%c26, %c0_20], %27 {strides = array<i32>} : memref<48x144xbf16, #tpu.memory_space<vmem>>, vector<18x144xbf16>,
    %cst_21 = arith.constant 0.000000e+00 : f32
    %29 = vector.broadcast %cst_21 : f32 to vector<46x320xf32>
    %c0_22 = arith.constant 0 : index
    %c0_23 = arith.constant 0 : index
    %30 = vector.load %arg16[%c0_22, %c0_23] : memref<48x144xbf16, #tpu.memory_space<vmem>>, vector<46x144xbf16>
    %c0_24 = arith.constant 0 : index
    %c0_25 = arith.constant 0 : index
    %31 = vector.load %arg4[%c0_24, %c0_25] : memref<432x320xbf16, #tpu.memory_space<vmem>>, vector<144x320xbf16>
    %cst_26 = arith.constant dense<0.000000e+00> : vector<46x320xf32>
    %32 = tpu.matmul %30, %31, %cst_26 {dimension_numbers = #tpu.dot_dimension_numbers<[1], [0], [0], [1], [0, 0, 1, 1], [], []>} : vector<46x144xbf16>, vector<144x320xbf16>, vector<46x320xf32> -> vector<46x320xf32>
    %33 = arith.addf %29, %32 : vector<46x320xf32>
    %c1_27 = arith.constant 1 : index
    %c0_28 = arith.constant 0 : index
    %34 = vector.load %arg16[%c1_27, %c0_28] : memref<48x144xbf16, #tpu.memory_space<vmem>>, vector<46x144xbf16>
    %c144 = arith.constant 144 : index
    %c0_29 = arith.constant 0 : index
    %35 = vector.load %arg4[%c144, %c0_29] : memref<432x320xbf16, #tpu.memory_space<vmem>>, vector<144x320xbf16>
    %cst_30 = arith.constant dense<0.000000e+00> : vector<46x320xf32>
    %36 = tpu.matmul %34, %35, %cst_30 {dimension_numbers = #tpu.dot_dimension_numbers<[1], [0], [0], [1], [0, 0, 1, 1], [], []>} : vector<46x144xbf16>, vector<144x320xbf16>, vector<46x320xf32> -> vector<46x320xf32>
    %37 = arith.addf %33, %36 : vector<46x320xf32>
    %c2_31 = arith.constant 2 : index
    %c0_32 = arith.constant 0 : index
    %38 = vector.load %arg16[%c2_31, %c0_32] : memref<48x144xbf16, #tpu.memory_space<vmem>>, vector<46x144xbf16>
    %c288 = arith.constant 288 : index
    %c0_33 = arith.constant 0 : index
    %39 = vector.load %arg4[%c288, %c0_33] : memref<432x320xbf16, #tpu.memory_space<vmem>>, vector<144x320xbf16>
    %cst_34 = arith.constant dense<0.000000e+00> : vector<46x320xf32>
    %40 = tpu.matmul %38, %39, %cst_34 {dimension_numbers = #tpu.dot_dimension_numbers<[1], [0], [0], [1], [0, 0, 1, 1], [], []>} : vector<46x144xbf16>, vector<144x320xbf16>, vector<46x320xf32> -> vector<46x320xf32>
    %41 = arith.addf %37, %40 : vector<46x320xf32>
    %c0_35 = arith.constant 0 : index
    %c0_36 = arith.constant 0 : index
    %42 = vector.load %arg5[%c0_35, %c0_36] : memref<1x320xf32, #tpu.memory_space<vmem>>, vector<1x320xf32>
    %43 = vector.broadcast %42 : vector<1x320xf32> to vector<46x320xf32>
    %44 = arith.mulf %41, %43 : vector<46x320xf32>
    %c0_37 = arith.constant 0 : index
    %c0_38 = arith.constant 0 : index
    %45 = vector.load %arg6[%c0_37, %c0_38] : memref<1x320xf32, #tpu.memory_space<vmem>>, vector<1x320xf32>
    %46 = vector.broadcast %45 : vector<1x320xf32> to vector<46x320xf32>
    %47 = arith.addf %44, %46 : vector<46x320xf32>
    %cst_39 = arith.constant 0.000000e+00 : f32
    %48 = vector.broadcast %cst_39 : f32 to vector<46x320xf32>
    %49 = arith.maximumf %47, %48 : vector<46x320xf32>
    %50 = vector.extract_strided_slice %49 {offsets = [0, 0], sizes = [45, 320], strides = [1, 1]} : vector<46x320xf32> to vector<45x320xf32>
    %51 = vector.extract_strided_slice %49 {offsets = [1, 0], sizes = [45, 320], strides = [1, 1]} : vector<46x320xf32> to vector<45x320xf32>
    %52 = arith.maximumf %50, %51 : vector<45x320xf32>
    %53 = vector.extract_strided_slice %52 {offsets = [0, 0], sizes = [45, 304], strides = [1, 1]} : vector<45x320xf32> to vector<45x304xf32>
    %54 = vector.extract_strided_slice %52 {offsets = [0, 16], sizes = [45, 304], strides = [1, 1]} : vector<45x320xf32> to vector<45x304xf32>
    %55 = arith.maximumf %53, %54 : vector<45x304xf32>
    %56 = vector.extract_strided_slice %55 {offsets = [0, 0], sizes = [1, 304], strides = [1, 1]} : vector<45x304xf32> to vector<1x304xf32>
    %57 = arith.truncf %56 : vector<1x304xf32> to vector<1x304xbf16>
    %c0_40 = arith.constant 0 : index
    %c0_41 = arith.constant 0 : index
    %58 = vector.load %arg17[%c0_40, %c0_41] : memref<2x3040xbf16, #tpu.memory_space<vmem>>, vector<1x304xbf16>
    tpu.vector_store %arg17[%c0_40, %c0_41], %57 {strides = array<i32>} : memref<2x3040xbf16, #tpu.memory_space<vmem>>, vector<1x304xbf16>,
    %59 = vector.extract_strided_slice %55 {offsets = [2, 0], sizes = [1, 304], strides = [1, 1]} : vector<45x304xf32> to vector<1x304xf32>
    %60 = arith.truncf %59 : vector<1x304xf32> to vector<1x304xbf16>
    %c0_42 = arith.constant 0 : index
    %c304 = arith.constant 304 : index
    %61 = vector.load %arg17[%c0_42, %c304] : memref<2x3040xbf16, #tpu.memory_space<vmem>>, vector<1x304xbf16>
    tpu.vector_store %arg17[%c0_42, %c304], %60 {strides = array<i32>} : memref<2x3040xbf16, #tpu.memory_space<vmem>>, vector<1x304xbf16>,
    %62 = vector.extract_strided_slice %55 {offsets = [4, 0], sizes = [1, 304], strides = [1, 1]} : vector<45x304xf32> to vector<1x304xf32>
    %63 = arith.truncf %62 : vector<1x304xf32> to vector<1x304xbf16>
    %c0_43 = arith.constant 0 : index
    %c608 = arith.constant 608 : index
    %64 = vector.load %arg17[%c0_43, %c608] : memref<2x3040xbf16, #tpu.memory_space<vmem>>, vector<1x304xbf16>
    tpu.vector_store %arg17[%c0_43, %c608], %63 {strides = array<i32>} : memref<2x3040xbf16, #tpu.memory_space<vmem>>, vector<1x304xbf16>,
    %65 = vector.extract_strided_slice %55 {offsets = [6, 0], sizes = [1, 304], strides = [1, 1]} : vector<45x304xf32> to vector<1x304xf32>
    %66 = arith.truncf %65 : vector<1x304xf32> to vector<1x304xbf16>
    %c0_44 = arith.constant 0 : index
    %c912 = arith.constant 912 : index
    %67 = vector.load %arg17[%c0_44, %c912] : memref<2x3040xbf16, #tpu.memory_space<vmem>>, vector<1x304xbf16>
    tpu.vector_store %arg17[%c0_44, %c912], %66 {strides = array<i32>} : memref<2x3040xbf16, #tpu.memory_space<vmem>>, vector<1x304xbf16>,
    %68 = vector.extract_strided_slice %55 {offsets = [8, 0], sizes = [1, 304], strides = [1, 1]} : vector<45x304xf32> to vector<1x304xf32>
    %69 = arith.truncf %68 : vector<1x304xf32> to vector<1x304xbf16>
    %c0_45 = arith.constant 0 : index
    %c1216 = arith.constant 1216 : index
    %70 = vector.load %arg17[%c0_45, %c1216] : memref<2x3040xbf16, #tpu.memory_space<vmem>>, vector<1x304xbf16>
    tpu.vector_store %arg17[%c0_45, %c1216], %69 {strides = array<i32>} : memref<2x3040xbf16, #tpu.memory_space<vmem>>, vector<1x304xbf16>,
    %71 = vector.extract_strided_slice %55 {offsets = [10, 0], sizes = [1, 304], strides = [1, 1]} : vector<45x304xf32> to vector<1x304xf32>
    %72 = arith.truncf %71 : vector<1x304xf32> to vector<1x304xbf16>
    %c0_46 = arith.constant 0 : index
    %c1520 = arith.constant 1520 : index
    %73 = vector.load %arg17[%c0_46, %c1520] : memref<2x3040xbf16, #tpu.memory_space<vmem>>, vector<1x304xbf16>
    tpu.vector_store %arg17[%c0_46, %c1520], %72 {strides = array<i32>} : memref<2x3040xbf16, #tpu.memory_space<vmem>>, vector<1x304xbf16>,
    %74 = vector.extract_strided_slice %55 {offsets = [12, 0], sizes = [1, 304], strides = [1, 1]} : vector<45x304xf32> to vector<1x304xf32>
    %75 = arith.truncf %74 : vector<1x304xf32> to vector<1x304xbf16>
    %c0_47 = arith.constant 0 : index
    %c1824 = arith.constant 1824 : index
    %76 = vector.load %arg17[%c0_47, %c1824] : memref<2x3040xbf16, #tpu.memory_space<vmem>>, vector<1x304xbf16>
    tpu.vector_store %arg17[%c0_47, %c1824], %75 {strides = array<i32>} : memref<2x3040xbf16, #tpu.memory_space<vmem>>, vector<1x304xbf16>,
    %77 = vector.extract_strided_slice %55 {offsets = [14, 0], sizes = [1, 304], strides = [1, 1]} : vector<45x304xf32> to vector<1x304xf32>
    %78 = arith.truncf %77 : vector<1x304xf32> to vector<1x304xbf16>
    %c0_48 = arith.constant 0 : index
    %c2128 = arith.constant 2128 : index
    %79 = vector.load %arg17[%c0_48, %c2128] : memref<2x3040xbf16, #tpu.memory_space<vmem>>, vector<1x304xbf16>
    tpu.vector_store %arg17[%c0_48, %c2128], %78 {strides = array<i32>} : memref<2x3040xbf16, #tpu.memory_space<vmem>>, vector<1x304xbf16>,
    %80 = vector.extract_strided_slice %55 {offsets = [16, 0], sizes = [1, 304], strides = [1, 1]} : vector<45x304xf32> to vector<1x304xf32>
    %81 = arith.truncf %80 : vector<1x304xf32> to vector<1x304xbf16>
    %c0_49 = arith.constant 0 : index
    %c2432 = arith.constant 2432 : index
    %82 = vector.load %arg17[%c0_49, %c2432] : memref<2x3040xbf16, #tpu.memory_space<vmem>>, vector<1x304xbf16>
    tpu.vector_store %arg17[%c0_49, %c2432], %81 {strides = array<i32>} : memref<2x3040xbf16, #tpu.memory_space<vmem>>, vector<1x304xbf16>,
    %83 = vector.extract_strided_slice %55 {offsets = [18, 0], sizes = [1, 304], strides = [1, 1]} : vector<45x304xf32> to vector<1x304xf32>
    %84 = arith.truncf %83 : vector<1x304xf32> to vector<1x304xbf16>
    %c0_50 = arith.constant 0 : index
    %c2736 = arith.constant 2736 : index
    %85 = vector.load %arg17[%c0_50, %c2736] : memref<2x3040xbf16, #tpu.memory_space<vmem>>, vector<1x304xbf16>
    tpu.vector_store %arg17[%c0_50, %c2736], %84 {strides = array<i32>} : memref<2x3040xbf16, #tpu.memory_space<vmem>>, vector<1x304xbf16>,
    %86 = vector.extract_strided_slice %55 {offsets = [24, 0], sizes = [1, 304], strides = [1, 1]} : vector<45x304xf32> to vector<1x304xf32>
    %87 = arith.truncf %86 : vector<1x304xf32> to vector<1x304xbf16>
    %c1_51 = arith.constant 1 : index
    %c0_52 = arith.constant 0 : index
    %88 = vector.load %arg17[%c1_51, %c0_52] : memref<2x3040xbf16, #tpu.memory_space<vmem>>, vector<1x304xbf16>
    tpu.vector_store %arg17[%c1_51, %c0_52], %87 {strides = array<i32>} : memref<2x3040xbf16, #tpu.memory_space<vmem>>, vector<1x304xbf16>,
    %89 = vector.extract_strided_slice %55 {offsets = [26, 0], sizes = [1, 304], strides = [1, 1]} : vector<45x304xf32> to vector<1x304xf32>
    %90 = arith.truncf %89 : vector<1x304xf32> to vector<1x304xbf16>
    %c1_53 = arith.constant 1 : index
    %c304_54 = arith.constant 304 : index
    %91 = vector.load %arg17[%c1_53, %c304_54] : memref<2x3040xbf16, #tpu.memory_space<vmem>>, vector<1x304xbf16>
    tpu.vector_store %arg17[%c1_53, %c304_54], %90 {strides = array<i32>} : memref<2x3040xbf16, #tpu.memory_space<vmem>>, vector<1x304xbf16>,
    %92 = vector.extract_strided_slice %55 {offsets = [28, 0], sizes = [1, 304], strides = [1, 1]} : vector<45x304xf32> to vector<1x304xf32>
    %93 = arith.truncf %92 : vector<1x304xf32> to vector<1x304xbf16>
    %c1_55 = arith.constant 1 : index
    %c608_56 = arith.constant 608 : index
    %94 = vector.load %arg17[%c1_55, %c608_56] : memref<2x3040xbf16, #tpu.memory_space<vmem>>, vector<1x304xbf16>
    tpu.vector_store %arg17[%c1_55, %c608_56], %93 {strides = array<i32>} : memref<2x3040xbf16, #tpu.memory_space<vmem>>, vector<1x304xbf16>,
    %95 = vector.extract_strided_slice %55 {offsets = [30, 0], sizes = [1, 304], strides = [1, 1]} : vector<45x304xf32> to vector<1x304xf32>
    %96 = arith.truncf %95 : vector<1x304xf32> to vector<1x304xbf16>
    %c1_57 = arith.constant 1 : index
    %c912_58 = arith.constant 912 : index
    %97 = vector.load %arg17[%c1_57, %c912_58] : memref<2x3040xbf16, #tpu.memory_space<vmem>>, vector<1x304xbf16>
    tpu.vector_store %arg17[%c1_57, %c912_58], %96 {strides = array<i32>} : memref<2x3040xbf16, #tpu.memory_space<vmem>>, vector<1x304xbf16>,
    %98 = vector.extract_strided_slice %55 {offsets = [32, 0], sizes = [1, 304], strides = [1, 1]} : vector<45x304xf32> to vector<1x304xf32>
    %99 = arith.truncf %98 : vector<1x304xf32> to vector<1x304xbf16>
    %c1_59 = arith.constant 1 : index
    %c1216_60 = arith.constant 1216 : index
    %100 = vector.load %arg17[%c1_59, %c1216_60] : memref<2x3040xbf16, #tpu.memory_space<vmem>>, vector<1x304xbf16>
    tpu.vector_store %arg17[%c1_59, %c1216_60], %99 {strides = array<i32>} : memref<2x3040xbf16, #tpu.memory_space<vmem>>, vector<1x304xbf16>,
    %101 = vector.extract_strided_slice %55 {offsets = [34, 0], sizes = [1, 304], strides = [1, 1]} : vector<45x304xf32> to vector<1x304xf32>
    %102 = arith.truncf %101 : vector<1x304xf32> to vector<1x304xbf16>
    %c1_61 = arith.constant 1 : index
    %c1520_62 = arith.constant 1520 : index
    %103 = vector.load %arg17[%c1_61, %c1520_62] : memref<2x3040xbf16, #tpu.memory_space<vmem>>, vector<1x304xbf16>
    tpu.vector_store %arg17[%c1_61, %c1520_62], %102 {strides = array<i32>} : memref<2x3040xbf16, #tpu.memory_space<vmem>>, vector<1x304xbf16>,
    %104 = vector.extract_strided_slice %55 {offsets = [36, 0], sizes = [1, 304], strides = [1, 1]} : vector<45x304xf32> to vector<1x304xf32>
    %105 = arith.truncf %104 : vector<1x304xf32> to vector<1x304xbf16>
    %c1_63 = arith.constant 1 : index
    %c1824_64 = arith.constant 1824 : index
    %106 = vector.load %arg17[%c1_63, %c1824_64] : memref<2x3040xbf16, #tpu.memory_space<vmem>>, vector<1x304xbf16>
    tpu.vector_store %arg17[%c1_63, %c1824_64], %105 {strides = array<i32>} : memref<2x3040xbf16, #tpu.memory_space<vmem>>, vector<1x304xbf16>,
    %107 = vector.extract_strided_slice %55 {offsets = [38, 0], sizes = [1, 304], strides = [1, 1]} : vector<45x304xf32> to vector<1x304xf32>
    %108 = arith.truncf %107 : vector<1x304xf32> to vector<1x304xbf16>
    %c1_65 = arith.constant 1 : index
    %c2128_66 = arith.constant 2128 : index
    %109 = vector.load %arg17[%c1_65, %c2128_66] : memref<2x3040xbf16, #tpu.memory_space<vmem>>, vector<1x304xbf16>
    tpu.vector_store %arg17[%c1_65, %c2128_66], %108 {strides = array<i32>} : memref<2x3040xbf16, #tpu.memory_space<vmem>>, vector<1x304xbf16>,
    %110 = vector.extract_strided_slice %55 {offsets = [40, 0], sizes = [1, 304], strides = [1, 1]} : vector<45x304xf32> to vector<1x304xf32>
    %111 = arith.truncf %110 : vector<1x304xf32> to vector<1x304xbf16>
    %c1_67 = arith.constant 1 : index
    %c2432_68 = arith.constant 2432 : index
    %112 = vector.load %arg17[%c1_67, %c2432_68] : memref<2x3040xbf16, #tpu.memory_space<vmem>>, vector<1x304xbf16>
    tpu.vector_store %arg17[%c1_67, %c2432_68], %111 {strides = array<i32>} : memref<2x3040xbf16, #tpu.memory_space<vmem>>, vector<1x304xbf16>,
    %113 = vector.extract_strided_slice %55 {offsets = [42, 0], sizes = [1, 304], strides = [1, 1]} : vector<45x304xf32> to vector<1x304xf32>
    %114 = arith.truncf %113 : vector<1x304xf32> to vector<1x304xbf16>
    %c1_69 = arith.constant 1 : index
    %c2736_70 = arith.constant 2736 : index
    %115 = vector.load %arg17[%c1_69, %c2736_70] : memref<2x3040xbf16, #tpu.memory_space<vmem>>, vector<1x304xbf16>
    tpu.vector_store %arg17[%c1_69, %c2736_70], %114 {strides = array<i32>} : memref<2x3040xbf16, #tpu.memory_space<vmem>>, vector<1x304xbf16>,
    %c0_71 = arith.constant 0 : index
    %c0_72 = arith.constant 0 : index
    %116 = vector.load %arg17[%c0_71, %c0_72] : memref<2x3040xbf16, #tpu.memory_space<vmem>>, vector<2x3040xbf16>
    %c0_73 = arith.constant 0 : index
    %c0_74 = arith.constant 0 : index
    %117 = vector.load %arg7[%c0_73, %c0_74] : memref<3040x32xbf16, #tpu.memory_space<vmem>>, vector<3040x32xbf16>
    %cst_75 = arith.constant dense<0.000000e+00> : vector<2x32xf32>
    %118 = tpu.matmul %116, %117, %cst_75 {dimension_numbers = #tpu.dot_dimension_numbers<[1], [0], [0], [1], [0, 0, 1, 1], [], []>} : vector<2x3040xbf16>, vector<3040x32xbf16>, vector<2x32xf32> -> vector<2x32xf32>
    %c0_76 = arith.constant 0 : index
    %c0_77 = arith.constant 0 : index
    %119 = vector.load %arg8[%c0_76, %c0_77] : memref<1x32xf32, #tpu.memory_space<vmem>>, vector<1x32xf32>
    %120 = vector.broadcast %119 : vector<1x32xf32> to vector<2x32xf32>
    %121 = arith.mulf %118, %120 : vector<2x32xf32>
    %c0_78 = arith.constant 0 : index
    %c0_79 = arith.constant 0 : index
    %122 = vector.load %arg9[%c0_78, %c0_79] : memref<1x32xf32, #tpu.memory_space<vmem>>, vector<1x32xf32>
    %123 = vector.broadcast %122 : vector<1x32xf32> to vector<2x32xf32>
    %124 = arith.addf %121, %123 : vector<2x32xf32>
    %cst_80 = arith.constant 0.000000e+00 : f32
    %125 = vector.broadcast %cst_80 : f32 to vector<2x32xf32>
    %126 = arith.maximumf %124, %125 : vector<2x32xf32>
    %c0_81 = arith.constant 0 : index
    %c0_82 = arith.constant 0 : index
    %127 = vector.load %arg10[%c0_81, %c0_82] : memref<32x32xf32, #tpu.memory_space<vmem>>, vector<32x32xf32>
    %cst_83 = arith.constant dense<0.000000e+00> : vector<2x32xf32>
    %128 = tpu.matmul %126, %127, %cst_83 {dimension_numbers = #tpu.dot_dimension_numbers<[1], [0], [0], [1], [0, 0, 1, 1], [], []>} : vector<2x32xf32>, vector<32x32xf32>, vector<2x32xf32> -> vector<2x32xf32>
    %c0_84 = arith.constant 0 : index
    %c0_85 = arith.constant 0 : index
    %129 = vector.load %arg11[%c0_84, %c0_85] : memref<1x32xf32, #tpu.memory_space<vmem>>, vector<1x32xf32>
    %130 = vector.broadcast %129 : vector<1x32xf32> to vector<2x32xf32>
    %131 = arith.mulf %128, %130 : vector<2x32xf32>
    %c0_86 = arith.constant 0 : index
    %c0_87 = arith.constant 0 : index
    %132 = vector.load %arg12[%c0_86, %c0_87] : memref<1x32xf32, #tpu.memory_space<vmem>>, vector<1x32xf32>
    %133 = vector.broadcast %132 : vector<1x32xf32> to vector<2x32xf32>
    %134 = arith.addf %131, %133 : vector<2x32xf32>
    %cst_88 = arith.constant 0.000000e+00 : f32
    %135 = vector.broadcast %cst_88 : f32 to vector<2x32xf32>
    %136 = arith.maximumf %134, %135 : vector<2x32xf32>
    %c0_89 = arith.constant 0 : index
    %c0_90 = arith.constant 0 : index
    %137 = vector.load %arg13[%c0_89, %c0_90] : memref<32x10xf32, #tpu.memory_space<vmem>>, vector<32x10xf32>
    %cst_91 = arith.constant dense<0.000000e+00> : vector<2x10xf32>
    %138 = tpu.matmul %136, %137, %cst_91 {dimension_numbers = #tpu.dot_dimension_numbers<[1], [0], [0], [1], [0, 0, 1, 1], [], []>} : vector<2x32xf32>, vector<32x10xf32>, vector<2x10xf32> -> vector<2x10xf32>
    %c0_92 = arith.constant 0 : index
    %c0_93 = arith.constant 0 : index
    %139 = vector.load %arg14[%c0_92, %c0_93] : memref<1x10xf32, #tpu.memory_space<vmem>>, vector<1x10xf32>
    %140 = vector.broadcast %139 : vector<1x10xf32> to vector<2x10xf32>
    %141 = arith.addf %138, %140 : vector<2x10xf32>
    %c0_94 = arith.constant 0 : index
    %c0_95 = arith.constant 0 : index
    %142 = vector.load %arg15[%c0_94, %c0_95] : memref<2x10xf32, #tpu.memory_space<vmem>>, vector<2x10xf32>
    tpu.vector_store %arg15[%c0_94, %c0_95], %141 {strides = array<i32>} : memref<2x10xf32, #tpu.memory_space<vmem>>, vector<2x10xf32>,
    return
  }
}

</mosaic_0001>

<bundles_post_ra>
// kernel: _lambda_.1
= control target key start
LH: loop header
LB: loop body
LE: loop exit
PB: predicated region body
PF: predicated region fallthrough
CT: control target
= control target key end

     0   :  { %v5886_v2 = vmov 0   ;;  %vm7752_vm0 = vcmask 523264   ;;  %vm94_vm1 = vsmask.f32 7424  ;;  %vm352_vm2 = vcmask 1046528   ;;  %s7736_s0 = inlined_call_operand.vmem [shape: bf16[40,64], index: 0, kind: input, shape index: {}]   ;;  %s7737_s1 = inlined_call_operand.vmem [shape: bf16[192,144], index: 1, kind: input, shape index: {}]   ;;  %s7738_s2 = inlined_call_operand.vmem [shape: f32[1,144], index: 2, kind: input, shape index: {}]   ;;  %s7739_s3 = inlined_call_operand.vmem [shape: f32[1,144], index: 3, kind: input, shape index: {}]   ;;  %s7740_s4 = inlined_call_operand.vmem [shape: bf16[432,320], index: 4, kind: input, shape index: {}]   ;;  %s7741_s5 = inlined_call_operand.vmem [shape: f32[1,320], index: 5, kind: input, shape index: {}]   ;;  %s7742_s6 = inlined_call_operand.vmem [shape: f32[1,320], index: 6, kind: input, shape index: {}]   ;;  %s7743_s7 = inlined_call_operand.vmem [shape: bf16[3040,32], index: 7, kind: input, shape index: {}]   ;;  %s7744_s8 = inlined_call_operand.vmem [shape: f32[1,32], index: 8, kind: input, shape index: {}]   ;;  %s7745_s9 = inlined_call_operand.vmem [shape: f32[1,32], index: 9, kind: input, shape index: {}]   ;;  %s7746_s10 = inlined_call_operand.vmem [shape: f32[32,32], index: 10, kind: input, shape index: {}]   ;;  %s7747_s11 = inlined_call_operand.vmem [shape: f32[1,32], index: 11, kind: input, shape index: {}]   ;;  %s7748_s12 = inlined_call_operand.vmem [shape: f32[1,32], index: 12, kind: input, shape index: {}]   ;;  %s7749_s13 = inlined_call_operand.vmem [shape: f32[32,10], index: 13, kind: input, shape index: {}]   ;;  %s7750_s14 = inlined_call_operand.vmem [shape: f32[1,10], index: 14, kind: input, shape index: {}]   ;;  %s7751_s15 = inlined_call_operand.hbm [shape: f32[2,10], index: 15, kind: output, shape index: {}]  }
   0x1   :  { %v5519_v0 = vld [vmem:[%s7737_s1 + $0x4] ss:$8 sps:$4 sm:$0xff]   ;;  %v5521_v1 = vld [vmem:[%s7737_s1] ss:$8 sps:$4 sm:$0xff]   ;;  %311 = vmatprep.mubr.bf16.mxu0 %v5886_v2  ;;  %52 = vst [vmem:[#allocation2] sm:$0xff] %v5886_v2  ;;  %55 = vst [vmem:[#allocation2 + $0x10] sm:$0xff] %v5886_v2  ;;  %200 = vmatprep.mubr.bf16.mxu1 %v5886_v2 }
   0x2   :  { %57 = vst [vmem:[#allocation2 + $0x20] sm:$0xff] %v5886_v2  ;;  %279 = vmatprep.subr.bf16.mxu0 %v5519_v0  ;;  %v5522_v3 = vld [vmem:[%s7737_s1 + $0x14] ss:$8 sps:$4 sm:$0xff]   ;;  %v5524_v4 = vld [vmem:[%s7737_s1 + $0x10] ss:$8 sps:$4 sm:$0xff]   ;;  %v5542_v20 = vld [vmem:[%s7736_s0 + $0x8] sm:$0xff]  }
   0x3   :  { %280 = vmatpush1.bf16.msra.mxu0 %v5521_v1  ;;  %v5525_v5 = vld [vmem:[%s7737_s1 + $0x24] ss:$8 sps:$4 sm:$0xff]   ;;  %v5527_v6 = vld [vmem:[%s7737_s1 + $0x20] ss:$8 sps:$4 sm:$0xff]   ;;  %v5528_v7 = vld [vmem:[%s7737_s1 + $0x34] ss:$8 sps:$4 sm:$0xff]  }
   0x4   :  { %281 = vmatprep.subr.bf16.mxu0 %v5522_v3  ;;  %v59_v8 = vld [vmem:[%s7736_s0] sm:$0xf]  ;;  %v6011_v9 = vld [vmem:[%s7736_s0 + $0x4] sm:$0xf]  ;;  %v5530_v11 = vld [vmem:[%s7737_s1 + $0x30] ss:$8 sps:$4 sm:$0xff]  }
   0x5   :  { %v5536_v10 = vld [vmem:[%s7737_s1 + $0x44] ss:$8 sps:$4 sm:$0xff]   ;;  %v5541_v12 = vld [vmem:[%s7737_s1 + $0x40] ss:$8 sps:$4 sm:$0xff]   ;;  %v4779_v13 = vcombine.low %v59_v8, %v6011_v9  ;;  %v5543_v15 = vld [vmem:[%s7737_s1 + $0x54] ss:$8 sps:$4 sm:$0xff]  }
   0x6   :  { %168 = vmatprep.subr.bf16.mxu1 %v5536_v10  ;;  %v5535_v14 = vld [vmem:[%s7737_s1 + $0x84] ss:$8 sps:$4 sm:$0xff]   ;;  %v5545_v16 = vld [vmem:[%s7737_s1 + $0x50] ss:$8 sps:$4 sm:$0xff]   ;;  %v5533_v17 = vld [vmem:[%s7737_s1 + $0x80] ss:$8 sps:$4 sm:$0xff]  }
   0x7   :  { %282 = vmatpush1.bf16.msra.mxu0 %v5524_v4  ;;  %169 = vmatpush1.bf16.msra.mxu1 %v5541_v12  ;;  %v98_v18 = vshll.u32 %v4779_v13, 16  ;;  %v5549_v19 = vld [vmem:[%s7737_s1 + $0x64] ss:$8 sps:$4 sm:$0xff]   ;;  %v5540_v21 = vld [vmem:[%s7737_s1 + $0x94] ss:$8 sps:$4 sm:$0xff]   ;;  %v96_v23 = vshrl.u32 %v4779_v13, 16 }
   0x8   :  { %283 = vmatprep.subr.bf16.mxu0 %v5525_v5  ;;  %170 = vmatprep.subr.bf16.mxu1 %v5543_v15  ;;  %v5551_v22 = vld [vmem:[%s7737_s1 + $0x60] ss:$8 sps:$4 sm:$0xff]   ;;  %v5538_v24 = vld [vmem:[%s7737_s1 + $0x90] ss:$8 sps:$4 sm:$0xff]   ;;  %v5553_v25 = vld [vmem:[%s7737_s1 + $0x74] ss:$8 sps:$4 sm:$0xff]  }
   0x9   :  { %v100_v26 = vrot.slane %v98_v18, 1  ;;  %v103_v27 = vshll.u32 %v5542_v20, 16  ;;  %v5548_v28 = vld [vmem:[%s7737_s1 + $0xa4] ss:$8 sps:$4 sm:$0xff]   ;;  %v5558_v29 = vld [vmem:[%s7737_s1 + $0x70] ss:$8 sps:$4 sm:$0xff]  }
   0xa   :  { %v5559_v30 = vld [vmem:[%s7736_s0 + $0x10] ss:$0 sps:$4 sm:$0xff]   ;;  %v5546_v31 = vld [vmem:[%s7737_s1 + $0xa0] ss:$8 sps:$4 sm:$0xff]   ;;  %v5557_v35 = vld [vmem:[%s7737_s1 + $0xb4] ss:$8 sps:$4 sm:$0xff]  }
   0xb   :  { %284 = vmatpush1.bf16.msra.mxu0 %v5527_v6  ;;  %171 = vmatpush1.bf16.msra.mxu1 %v5545_v16  ;;  %v101_v32 = vor.u32 %v100_v26, %v96_v23  ;;  %v105_v33 = vrot.slane %v103_v27, 1  ;;  %v111_v34 = vshll.u32 %v5559_v30, 16  ;;  %v107_v36 = vshrl.u32 %v5542_v20, 16  ;;  %v5555_v37 = vld [vmem:[%s7737_s1 + $0xb0] ss:$8 sps:$4 sm:$0xff]   ;;  %v6158_v6 = vld [vmem:[#allocation2] sm:$0xff] }
   0xc   :  { %285 = vmatprep.subr.bf16.mxu0 %v5528_v7  ;;  %172 = vmatprep.subr.bf16.mxu1 %v5549_v19  ;;  %v340_v40 = vld [vmem:[%s7736_s0] sm:$0xe]  ;;  %v5552_v41 = vld [vmem:[%s7736_s0 + $0x10] ss:$0 sps:$4 sm:$0x77]   ;;  %v354_v46 = vrot.slane %v5542_v20, 1 }
   0xd   :  { %v106_v38 = vsel %vm94_vm1, %v101_v32, %v105_v33  ;;  %v113_v39 = vrot.slane %v111_v34, 1  ;;  %v109_v42 = vor.u32 %v107_v36, %v105_v33  ;;  %v4805_v43 = vcombine.low %v340_v40, %v6011_v9  ;;  %v5562_v52 = vld [vmem:[%s7740_s4 + $0xdc] ss:$12 sps:$4 sm:$0xff]   ;;  %v5560_v53 = vld [vmem:[%s7740_s4 + $0xd8] ss:$12 sps:$4 sm:$0xff]  }
   0xe   :  { %v115_v47 = vshrl.u32 %v5559_v30, 16  ;;  %v356_v50 = vrot.slane %v5559_v30, 1  ;;  %v5565_v54 = vld [vmem:[%s7740_s4 + $0xf4] ss:$12 sps:$4 sm:$0xff]   ;;  %v5563_v55 = vld [vmem:[%s7740_s4 + $0xf0] ss:$12 sps:$4 sm:$0xff]  }
   0xf   :  { %286 = vmatpush1.bf16.msra.mxu0 %v5530_v11  ;;  %173 = vmatpush1.bf16.msra.mxu1 %v5551_v22  ;;  %v114_v44 = vsel %vm94_vm1, %v109_v42, %v113_v39  ;;  %v353_v45 = vrot.slane %v4805_v43, 1  ;;  %v5568_v56 = vld [vmem:[%s7740_s4 + $0x10c] ss:$12 sps:$4 sm:$0xff]   ;;  %v5566_v57 = vld [vmem:[%s7740_s4 + $0x108] ss:$12 sps:$4 sm:$0xff]   ;;  %vm7756_vm3 = vcmask 130048  }
  0x10   :  { %407 = vmatprep.subr.bf16.mxu0 %v5535_v14  ;;  %174 = vmatprep.subr.bf16.mxu1 %v5553_v25  ;;  %v117_v49 = vor.u32 %v115_v47, %v113_v39  ;;  %v357_v51 = vsel %vm352_vm2, %v354_v46, %v356_v50  ;;  %v5571_v58 = vld [vmem:[%s7740_s4 + $0x124] ss:$12 sps:$4 sm:$0xff]   ;;  %v5569_v59 = vld [vmem:[%s7740_s4 + $0x120] ss:$12 sps:$4 sm:$0xff]   ;;  %54 = vst.msk [vmem:[#allocation2 + $0x8] sm:$0xff] %vm7756_vm3, %v5886_v2  ;;  %56 = vst.msk [vmem:[#allocation2 + $0x18] sm:$0xff] %vm7756_vm3, %v5886_v2 }
  0x11   :  { %v355_v48 = vsel %vm352_vm2, %v353_v45, %v354_v46  ;;  %58 = vst.msk [vmem:[#allocation2 + $0x28] sm:$0xff] %vm7756_vm3, %v5886_v2  ;;  %v5574_v60 = vld [vmem:[%s7740_s4 + $0x13c] ss:$12 sps:$4 sm:$0xff]   ;;  %v5572_v61 = vld [vmem:[%s7740_s4 + $0x138] ss:$12 sps:$4 sm:$0xff]  }
  0x12   :  { %4802 = vmatmul.mubr.msk.bf16.vlgmr.msra.gmra.mrb[0].mxu0 %vm7752_vm0, %v4779_v13  ;;  %v5577_v62 = vld [vmem:[%s7740_s4 + $0x154] ss:$12 sps:$4 sm:$0xff]   ;;  %v5575_v63 = vld [vmem:[%s7740_s4 + $0x150] ss:$12 sps:$4 sm:$0xff]   ;;  %v5580_v0 = vld [vmem:[%s7740_s4 + $0x16c] ss:$12 sps:$4 sm:$0xff]  }
  0x13   :  { %408 = vmatpush1.bf16.msra.mxu0 %v5533_v17  ;;  %321 = vmatprep.mubr.bf16.mxu0 %v5886_v2  ;;  %v5578_v1 = vld [vmem:[%s7740_s4 + $0x168] ss:$12 sps:$4 sm:$0xff]   ;;  %v5581_v3 = vld [vmem:[%s7740_s4 + $0x180] ss:$12 sps:$4 sm:$0xff]   ;;  %v5584_v4 = vld [vmem:[%s7740_s4 + $0x198] ss:$12 sps:$4 sm:$0xff]  }
  0x14   :  { %409 = vmatprep.subr.bf16.mxu0 %v5540_v21  ;;  %175 = vmatpush1.bf16.msra.mxu1 %v5558_v29  ;;  %v5586_v5 = vld [vmem:[%s7740_s4 + $0x19c] ss:$12 sps:$4 sm:$0xff]  }
  0x15   :  { %864 = vmatprep.subr.bf16.mxu1 %v5562_v52 }
  0x17   :  { %410 = vmatpush1.bf16.msra.mxu0 %v5538_v24  ;;  %4790 = vmatmul.mubr.msk.bf16.vlgmr.msra.gmra.mrb[0].mxu1 %vm7752_vm0, %v106_v38 }
  0x18   :  { %411 = vmatprep.subr.bf16.mxu0 %v5548_v28  ;;  %210 = vmatprep.mubr.bf16.mxu1 %v5886_v2 }
  0x19   :  { %865 = vmatpush1.bf16.msra.mxu1 %v5560_v53 }
  0x1a   :  { %4803 = vmatmul.mubr.msk.bf16.gmra.mrb[4].mxu0 %vm7752_vm0, %v5542_v20  ;;  %866 = vmatprep.subr.bf16.mxu1 %v5565_v54 }
  0x1b   :  { %412 = vmatpush1.bf16.msra.mxu0 %v5546_v31  ;;  %331 = vmatprep.mubr.bf16.mxu0 %v5886_v2 }
  0x1c   :  { %413 = vmatprep.subr.bf16.mxu0 %v5557_v35 }
  0x1d   :  { %867 = vmatpush1.bf16.msra.mxu1 %v5563_v55 }
  0x1e   :  { %868 = vmatprep.subr.bf16.mxu1 %v5568_v56 }
  0x1f   :  { %414 = vmatpush1.bf16.msra.mxu0 %v5555_v37  ;;  %4791 = vmatmul.mubr.msk.bf16.gmra.mrb[4].mxu1 %vm7752_vm0, %v114_v44 }
  0x20   :  { %220 = vmatprep.mubr.bf16.mxu1 %v5886_v2 }
  0x21   :  { %869 = vmatpush1.bf16.msra.mxu1 %v5566_v57 }
  0x22   :  { %4804 = vmatmul.mubr.msk.bf16.gmra.mrb[8].mxu0 %vm7752_vm0, %v5552_v41  ;;  %870 = vmatprep.subr.bf16.mxu1 %v5571_v58 }
  0x23   :  { %439 = vmatprep.mubr.bf16.mxu0 %v5886_v2 }
  0x25   :  { %871 = vmatpush1.bf16.msra.mxu1 %v5569_v59 }
  0x26   :  { %872 = vmatprep.subr.bf16.mxu1 %v5574_v60 }
  0x27   :  { %4792 = vmatmul.mubr.msk.bf16.gmra.mrb[8].mxu1 %vm7752_vm0, %v117_v49 }
  0x29   :  { %873 = vmatpush1.bf16.msra.mxu1 %v5572_v61 }
  0x2a   :  { %4814 = vmatmul.mubr.msk.bf16.vlgmr.msra.gmra.mrb[0].mxu0 %vm7752_vm0, %v355_v48  ;;  %874 = vmatprep.subr.bf16.mxu1 %v5577_v62 }
  0x2b   :  { %449 = vmatprep.mubr.bf16.mxu0 %v5886_v2 }
  0x2d   :  { %875 = vmatpush1.bf16.msra.mxu1 %v5575_v63 }
  0x2e   :  { %876 = vmatprep.subr.bf16.mxu1 %v5580_v0 }
  0x31   :  { %877 = vmatpush1.bf16.msra.mxu1 %v5578_v1 }
  0x32   :  { %4815 = vmatmul.mubr.msk.bf16.gmra.mrb[4].mxu0 %vm7752_vm0, %v357_v51 }
  0x33   :  { %459 = vmatprep.mubr.bf16.mxu0 %v5886_v2  ;;  %v5583_v2 = vld [vmem:[%s7740_s4 + $0x184] ss:$12 sps:$4 sm:$0xff]  }
  0x34   :  { %878 = vmatprep.subr.bf16.mxu1 %v5583_v2 }
  0x35   :  { %879 = vmatpush1.bf16.msra.mxu1 %v5581_v3 }
  0x36   :  { %880 = vmatprep.subr.bf16.mxu1 %v5586_v5 }
  0x39   :  { %881 = vmatpush1.bf16.msra.mxu1 %v5584_v4 }
  0x3a   :  { %4816 = vmatmul.mubr.msk.bf16.gmra.mrb[8].mxu0 %vm7752_vm0, %v356_v50  ;;  %927 = vmatprep.subr.bf16.mxu1 %v6158_v6 }
  0x3b   :  { %20 = vsyncpa [#allocation5], 0  ;;  %v480_v9 = vlaneseq  ;;  %v478_v16 = vld [vmem:[%s7738_s2] sm:$0x3]  ;;  %vm552_vm4 = vcmask 130049   ;;  %vm540_vm5 = vcmask 1040384  }
  0x3c   :  { %v500_v20 = vld [vmem:[%s7739_s3] sm:$0x3]  ;;  %vm555_vm6 = vcmask 123904   ;;  %vm577_vm7 = vcmask 130053   ;;  %vm565_vm8 = vcmask 1042432   ;;  %vm580_vm9 = vcmask 128000  }
  0x3d   :  { %v6161_v12 = vshrl.u32 %v480_v9, 7  ;;  %vm7753_vm10 = vcmask 916480   ;;  %vm7763_vm11 = vsmask.f32 256  ;;  %vm1914_vm12 = vcmask 1041409   ;;  %s5891_s19 = smov 16  }
  0x3e   :  { %vm1915_vm13 = vsmask.f32 1280  ;;  %vm6598_vm14 = vmand %vm540_vm5, %vm7763_vm11  ;;  %s5892_s30 = smov 64   ;;  %s5893_s23 = smov 32   ;;  %vm7754_vm0 = vcmask 649218  }
  0x3f   :  { %v6164_v14 = vsub.s32 0, %v6161_v12  ;;  %v6170_v17 = vsub.s32 1, %v6161_v12  ;;  %vm6605_vm15 = vmand %vm1914_vm12, %vm1915_vm13  ;;  %s5894_s0 = smov 80  }
  0x41   :  { %v6176_v21 = vrot.slane %v478_v16, %v6164_v14  ;;  %v6179_v23 = vrot.slane %v478_v16, %v6170_v17  ;;  %v6182_v25 = vrot.slane %v500_v20, %v6164_v14  ;;  %v6185_v28 = vrot.slane %v500_v20, %v6170_v17 }
  0xea   :  { %v202_v7 = vpop.f32.mrb[0].mxu1 }
  0xeb   :  { %v204_v8 = vpop.f32.mrb[1].mxu1 }
  0xec   :  { %v206_v10 = vpop.f32.mrb[2].mxu1 }
  0xed   :  { %v208_v11 = vpop.f32.mrb[3].mxu1 }
  0xf2   :  { %v212_v13 = vpop.f32.mrb[4].mxu1 }
  0xf3   :  { %v214_v15 = vpop.f32.mrb[5].mxu1 }
  0xf4   :  { %v216_v18 = vpop.f32.mrb[6].mxu1 }
  0xf5   :  { %v218_v19 = vpop.f32.mrb[7].mxu1 }
  0xfa   :  { %v222_v30 = vpop.f32.mrb[8].mxu1 }
  0xfb   :  { %v224_v34 = vpop.f32.mrb[9].mxu1 }
  0xfc   :  { %v226_v37 = vpop.f32.mrb[10].mxu1 }
  0xfd   :  { %v441_v22 = vpop.f32.mrb[0].mxu0  ;;  %v227_v40 = vpop.f32.mrb[11].mxu1 }
  0xfe   :  { %v5406_v24 = vadd.f32 %v441_v22, %v202_v7  ;;  %v443_v26 = vpop.f32.mrb[1].mxu0 }
  0xff   :  { %v5407_v27 = vadd.f32 %v443_v26, %v204_v8  ;;  %v445_v29 = vpop.f32.mrb[2].mxu0 }
 0x100   :  { %v490_v31 = vmul.f32 %v5406_v24, %v6176_v21  ;;  %v5408_v32 = vadd.f32 %v445_v29, %v206_v10  ;;  %v447_v33 = vpop.f32.mrb[3].mxu0 }
 0x101   :  { %v491_v35 = vmul.f32 %v5407_v27, %v6179_v23  ;;  %v5409_v36 = vadd.f32 %v447_v33, %v208_v11 }
 0x102   :  { %v512_v38 = vadd.f32 %v6182_v25, %v490_v31  ;;  %v492_v39 = vmul.f32 %v5408_v32, %v6176_v21 }
 0x103   :  { %v513_v41 = vadd.f32 %v6185_v28, %v491_v35  ;;  %v493_v42 = vmul.f32 %v5409_v36, %v6179_v23 }
 0x104   :  { %v514_v43 = vadd.f32 %v6182_v25, %v492_v39  ;;  %v522_v46 = vmax.f32 %v512_v38, 0.0 }
 0x105   :  { %v515_v44 = vadd.f32 %v6185_v28, %v493_v42  ;;  %v451_v45 = vpop.f32.mrb[4].mxu0  ;;  %v523_v50 = vmax.f32 %v513_v41, 0.0 }
 0x106   :  { %v524_v47 = vmax.f32 %v514_v43, 0.0  ;;  %v5410_v48 = vadd.f32 %v451_v45, %v212_v13  ;;  %v453_v49 = vpop.f32.mrb[5].mxu0 }
 0x107   :  { %v525_v51 = vmax.f32 %v515_v44, 0.0  ;;  %v5411_v52 = vadd.f32 %v453_v49, %v214_v15  ;;  %v455_v53 = vpop.f32.mrb[6].mxu0 }
 0x108   :  { %v532_v54 = vpack.c.bf16 %v524_v47, %v522_v46  ;;  %v494_v55 = vmul.f32 %v5410_v48, %v6176_v21  ;;  %v5412_v56 = vadd.f32 %v455_v53, %v216_v18  ;;  %v457_v57 = vpop.f32.mrb[7].mxu0 }
 0x109   :  { %v533_v58 = vpack.c.bf16 %v525_v51, %v523_v50  ;;  %v495_v59 = vmul.f32 %v5411_v52, %v6179_v23  ;;  %v5413_v60 = vadd.f32 %v457_v57, %v218_v19  ;;  %v5587_v57 = vld [vmem:[%s7740_s4 + $0xe0] ss:$12 sps:$4 sm:$0xff]  }
 0x10a   :  { %v541_v61 = vrot.slane %v532_v54, 7  ;;  %v516_v62 = vadd.f32 %v6182_v25, %v494_v55  ;;  %v496_v63 = vmul.f32 %v5412_v56, %v6176_v21 }
 0x10b   :  { %v542_v0 = vrot.slane %v533_v58, 7  ;;  %v517_v1 = vadd.f32 %v6185_v28, %v495_v59  ;;  %v497_v2 = vmul.f32 %v5413_v60, %v6179_v23 }
 0x10c   :  { %551 = vst [vmem:[#allocation2] sm:$0xfe] %v541_v61  ;;  %v526_v3 = vmax.f32 %v516_v62, 0.0  ;;  %v518_v4 = vadd.f32 %v6182_v25, %v496_v63  ;;  %v5588_v63 = vld [vmem:[%s7740_s4 + $0xf8] ss:$12 sps:$4 sm:$0xff]  }
 0x10d   :  { %553 = vst.msk [vmem:[#allocation2 + $0x8] sm:$0xfe] %vm552_vm4, %v542_v0  ;;  %v527_v5 = vmax.f32 %v517_v1, 0.0  ;;  %v519_v7 = vadd.f32 %v6185_v28, %v497_v2  ;;  %v461_v8 = vpop.f32.mrb[8].mxu0  ;;  %vm1917_vm4 = vmor %vm6605_vm15, %vm6598_vm14  ;;  %vm7755_vm14 = vcmask 1040640  }
 0x10e   :  { %v534_v9 = vpack.c.bf16 %v526_v3, %v526_v3  ;;  %v528_v10 = vmax.f32 %v518_v4, 0.0  ;;  %v5414_v11 = vadd.f32 %v461_v8, %v222_v30  ;;  %v463_v13 = vpop.f32.mrb[9].mxu0 }
 0x10f   :  { %v535_v15 = vpack.c.bf16 %v527_v5, %v527_v5  ;;  %v529_v16 = vmax.f32 %v519_v7, 0.0  ;;  %v5415_v18 = vadd.f32 %v463_v13, %v224_v34  ;;  %v465_v19 = vpop.f32.mrb[10].mxu0 }
 0x110   :  { %v543_v20 = vrot.slane %v534_v9, 7  ;;  %v557_v22 = vpack.c.bf16 %v528_v10, %v526_v3  ;;  %v498_v24 = vmul.f32 %v5414_v11, %v6176_v21  ;;  %v466_v26 = vpop.f32.mrb[11].mxu0  ;;  %v5589_v9 = vld [vmem:[%s7740_s4 + $0x110] ss:$12 sps:$4 sm:$0xff]  }
 0x111   :  { %v545_v27 = vrot.slane %v535_v15, 7  ;;  %v558_v29 = vpack.c.bf16 %v529_v16, %v527_v5  ;;  %v499_v31 = vmul.f32 %v5415_v18, %v6179_v23  ;;  %v5590_v15 = vld [vmem:[%s7740_s4 + $0x128] ss:$12 sps:$4 sm:$0xff]   ;;  %v5591_v18 = vld [vmem:[%s7740_s4 + $0x140] ss:$12 sps:$4 sm:$0xff]  }
 0x112   :  { %v544_v32 = vsel %vm540_vm5, %v541_v61, %v543_v20  ;;  %v566_v33 = vrot.slane %v557_v22, 5  ;;  %v520_v30 = vadd.f32 %v6182_v25, %v498_v24  ;;  %v5592_v20 = vld [vmem:[%s7740_s4 + $0x158] ss:$12 sps:$4 sm:$0xff]   ;;  %v5593_v22 = vld [vmem:[%s7740_s4 + $0x170] ss:$12 sps:$4 sm:$0xff]  }
 0x113   :  { %554 = vst [vmem:[#allocation2 + $0x10] sm:$0x3] %v544_v32  ;;  %v546_v34 = vsel %vm540_vm5, %v542_v0, %v545_v27  ;;  %v567_v35 = vrot.slane %v558_v29, 5  ;;  %v521_v36 = vadd.f32 %v6185_v28, %v499_v31  ;;  %v6211_v23 = vld [vmem:[#allocation2] sm:$0xff]  ;;  %v5594_v24 = vld [vmem:[%s7740_s4 + $0x188] ss:$12 sps:$4 sm:$0xff]  }
 0x114   :  { %556 = vst.msk [vmem:[#allocation2 + $0x18] sm:$0x3] %vm555_vm6, %v546_v34  ;;  %576 = vst [vmem:[#allocation2 + $0x10] sm:$0xe0] %v566_v33  ;;  %v530_v21 = vmax.f32 %v520_v30, 0.0  ;;  %v6209_v37 = vld [vmem:[#allocation2 + $0x8] sm:$0xff] }
 0x115   :  { %578 = vst.msk [vmem:[#allocation2 + $0x18] sm:$0xe0] %vm577_vm7, %v567_v35  ;;  %v531_v38 = vmax.f32 %v521_v36, 0.0  ;;  %v677_v25 = vshll.u32 %v6209_v37, 16  ;;  %v665_v42 = vshll.u32 %v6211_v23, 16  ;;  %v675_v50 = vshrl.u32 %v6209_v37, 16 }
 0x116   :  { %v559_v39 = vpack.c.bf16 %v530_v21, %v530_v21  ;;  %v663_v52 = vshrl.u32 %v6211_v23, 16  ;;  %v5595_v26 = vld [vmem:[%s7740_s4 + $0x1a0] ss:$12 sps:$4 sm:$0xff]   ;;  %v5598_v27 = vld [vmem:[%s7740_s4 + $0x4] ss:$12 sps:$4 sm:$0xff]  }
 0x117   :  { %v560_v40 = vpack.c.bf16 %v531_v38, %v531_v38  ;;  %v679_v45 = vrot.slane %v677_v25, 1  ;;  %v667_v48 = vrot.slane %v665_v42, 1  ;;  %v5596_v29 = vld [vmem:[%s7740_s4] ss:$12 sps:$4 sm:$0xff]   ;;  %v5601_v31 = vld [vmem:[%s7740_s4 + $0x1c] ss:$12 sps:$4 sm:$0xff]  }
 0x118   :  { %v568_v41 = vrot.slane %v559_v39, 5  ;;  %v5599_v32 = vld [vmem:[%s7740_s4 + $0x18] ss:$12 sps:$4 sm:$0xff]   ;;  %v5602_v30 = vld [vmem:[%s7740_s4 + $0x30] ss:$12 sps:$4 sm:$0xff]  }
 0x119   :  { %v570_v43 = vrot.slane %v560_v40, 5  ;;  %v680_v54 = vor.u32 %v679_v45, %v675_v50  ;;  %v668_v56 = vor.u32 %v667_v48, %v663_v52  ;;  %v5607_v34 = vld [vmem:[%s7740_s4 + $0x4c] ss:$12 sps:$4 sm:$0xff]   ;;  %v5610_v36 = vld [vmem:[%s7740_s4 + $0x64] ss:$12 sps:$4 sm:$0xff]  }
 0x11a   :  { %v569_v28 = vsel %vm565_vm8, %v566_v33, %v568_v41  ;;  %v5604_v33 = vld [vmem:[%s7740_s4 + $0x34] ss:$12 sps:$4 sm:$0xff]   ;;  %v5613_v38 = vld [vmem:[%s7740_s4 + $0x7c] ss:$12 sps:$4 sm:$0xff]   ;;  %v5611_v39 = vld [vmem:[%s7740_s4 + $0x78] ss:$12 sps:$4 sm:$0xff]  }
 0x11b   :  { %579 = vst [vmem:[#allocation2 + $0x20] sm:$0x3f] %v569_v28  ;;  %v571_v44 = vsel %vm565_vm8, %v567_v35, %v570_v43  ;;  %v6215_v46 = vld [vmem:[#allocation2 + $0x10] sm:$0xff]  ;;  %v5608_v21 = vld [vmem:[%s7740_s4 + $0x60] ss:$12 sps:$4 sm:$0xff]  }
 0x11c   :  { %581 = vst.msk [vmem:[#allocation2 + $0x28] sm:$0x3f] %vm580_vm9, %v571_v44  ;;  %v6217_v47 = vld [vmem:[#allocation2 + $0x18] sm:$0xff]  ;;  %v670_v49 = vshll.u32 %v6215_v46, 16  ;;  %v686_v4 = vshrl.u32 %v6215_v46, 16 }
 0x11d   :  { %v682_v51 = vshll.u32 %v6217_v47, 16  ;;  %v694_v0 = vshrl.u32 %v6217_v47, 16  ;;  %v5605_v35 = vld [vmem:[%s7740_s4 + $0x48] ss:$12 sps:$4 sm:$0xff]   ;;  %v5614_v25 = vld [vmem:[%s7740_s4 + $0x90] ss:$12 sps:$4 sm:$0xff]  }
 0x11e   :  { %v672_v53 = vrot.slane %v670_v49, 1  ;;  %v5616_v40 = vld [vmem:[%s7740_s4 + $0x94] ss:$12 sps:$4 sm:$0xff]   ;;  %v5619_v41 = vld [vmem:[%s7740_s4 + $0xac] ss:$12 sps:$4 sm:$0xff]  }
 0x11f   :  { %v684_v55 = vrot.slane %v682_v51, 1  ;;  %v5617_v42 = vld [vmem:[%s7740_s4 + $0xa8] ss:$12 sps:$4 sm:$0xff]   ;;  %v5622_v43 = vld [vmem:[%s7740_s4 + $0xc4] ss:$12 sps:$4 sm:$0xff]  }
 0x120   :  { %v673_v59 = vsel %vm94_vm1, %v668_v56, %v672_v53  ;;  %v688_v8 = vor.u32 %v686_v4, %v672_v53  ;;  %v5620_v28 = vld [vmem:[%s7740_s4 + $0xc0] ss:$12 sps:$4 sm:$0xff]   ;;  %v5623_v44 = vld [vmem:[%s7740_s4 + $0x8] ss:$12 sps:$4 sm:$0xff]   ;;  %v5625_v48 = vld [vmem:[%s7740_s4 + $0x38] ss:$12 sps:$4 sm:$0xff]  }
 0x121   :  { %v685_v58 = vsel %vm94_vm1, %v680_v54, %v684_v55  ;;  %v696_v2 = vor.u32 %v694_v0, %v684_v55  ;;  %v5624_v45 = vld [vmem:[%s7740_s4 + $0x20] ss:$12 sps:$4 sm:$0xff]   ;;  %v5626_v50 = vld [vmem:[%s7740_s4 + $0x50] ss:$12 sps:$4 sm:$0xff]   ;;  %v5627_v51 = vld [vmem:[%s7740_s4 + $0x68] ss:$12 sps:$4 sm:$0xff]  }
 0x122   :  { %4844 = vmatprep.mubr.msk.bf16.mxu1 %vm7756_vm3, %v685_v58  ;;  %v6229_v60 = vld [vmem:[#allocation2 + $0x20] sm:$0xff]  ;;  %v5630_v55 = vld [vmem:[%s7740_s4 + $0xb0] ss:$12 sps:$4 sm:$0xff]   ;;  %vm2166_vm8 = vsmask.f32 7942 }
 0x123   :  { %897 = vmatmul.mubr.bf16.vlgmr.msra.gmra.mrb[12].mxu1 %v673_v59  ;;  %v6231_v61 = vld [vmem:[#allocation2 + $0x28] sm:$0xff]  ;;  %v690_v62 = vshll.u32 %v6229_v60, 16  ;;  %v702_v16 = vshrl.u32 %v6229_v60, 16  ;;  %v586_v52 = vld [vmem:[#allocation2 + $0x20] sm:$0x7f]  ;;  %vm6702_vm13 = vmand %vm1914_vm12, %vm2166_vm8 }
 0x124   :  { %928 = vmatpush1.bf16.msra.mxu1 %v5587_v57  ;;  %v698_v1 = vshll.u32 %v6231_v61, 16  ;;  %v705_v10 = vshrl.u32 %v6231_v61, 16  ;;  %v587_v49 = vld [vmem:[#allocation2 + $0x28] sm:$0x7f]  ;;  %v5629_v54 = vld [vmem:[%s7740_s4 + $0x98] ss:$12 sps:$4 sm:$0xff]  }
 0x125   :  { %929 = vmatprep.subr.bf16.mxu1 %v6158_v6  ;;  %v692_v5 = vrot.slane %v690_v62, 1  ;;  %v5628_v53 = vld [vmem:[%s7740_s4 + $0x80] ss:$12 sps:$4 sm:$0xff]   ;;  %v5632_v57 = vld [vmem:[%s7740_s4 + $0x1b0] ss:$12 sps:$4 sm:$0xff]  }
 0x126   :  { %v700_v3 = vrot.slane %v698_v1, 1  ;;  %v5634_v56 = vld [vmem:[%s7740_s4 + $0x1b4] ss:$12 sps:$4 sm:$0xff]   ;;  %v5640_v62 = vld [vmem:[%s7740_s4 + $0x1e4] ss:$12 sps:$4 sm:$0xff]  }
 0x127   :  { %v693_v11 = vsel %vm94_vm1, %v688_v8, %v692_v5  ;;  %v704_v19 = vor.u32 %v702_v16, %v692_v5  ;;  %v5641_v0 = vld [vmem:[%s7740_s4 + $0x1f8] ss:$12 sps:$4 sm:$0xff]   ;;  %v5646_v1 = vld [vmem:[%s7740_s4 + $0x214] ss:$12 sps:$4 sm:$0xff]   ;;  %v5644_v4 = vld [vmem:[%s7740_s4 + $0x210] ss:$12 sps:$4 sm:$0xff]  }
 0x128   :  { %930 = vmatpush1.bf16.msra.mxu1 %v5588_v63  ;;  %v701_v7 = vsel %vm94_vm1, %v696_v2, %v700_v3  ;;  %v707_v13 = vor.u32 %v705_v10, %v700_v3  ;;  %v5638_v63 = vld [vmem:[%s7740_s4 + $0x1e0] ss:$12 sps:$4 sm:$0xff]   ;;  %v1303_v3 = vrot.slane %v6217_v47, 1  ;;  %v5656_v16 = vld [vmem:[%s7740_s4 + $0x270] ss:$12 sps:$4 sm:$0xff]   ;;  %vm7757_vm1 = vcmask 387074  }
 0x129   :  { %4845 = vmatprep.mubr.msk.bf16.mxu1 %vm7756_vm3, %v701_v7  ;;  %931 = vmatprep.subr.bf16.mxu1 %v6158_v6  ;;  %v1256_v2 = vld [vmem:[#allocation2 + $0x8] sm:$0xfe]  ;;  %vm7762_vm9 = vsmask.f32 7938 }
 0x12a   :  { %v1302_v5 = vrot.slane %v1256_v2, 1  ;;  %v5650_v10 = vld [vmem:[%s7740_s4 + $0x240] ss:$12 sps:$4 sm:$0xff]  }
 0x12b   :  { %907 = vmatmul.mubr.bf16.gmra.mrb[16].mxu1 %v693_v11 }
 0x12c   :  { %932 = vmatpush1.bf16.msra.mxu1 %v5589_v9  ;;  %4846 = vmatprep.mubr.msk.bf16.mxu1 %vm7756_vm3, %v707_v13  ;;  %v1304_v8 = vsel %vm352_vm2, %v1302_v5, %v1303_v3  ;;  %v5652_v9 = vld [vmem:[%s7740_s4 + $0x244] ss:$12 sps:$4 sm:$0xff]  }
 0x12d   :  { %933 = vmatprep.subr.bf16.mxu1 %v6158_v6 }
 0x130   :  { %934 = vmatpush1.bf16.msra.mxu1 %v5590_v15  ;;  %v5658_v15 = vld [vmem:[%s7740_s4 + $0x274] ss:$12 sps:$4 sm:$0xff]  }
 0x131   :  { %935 = vmatprep.subr.bf16.mxu1 %v6158_v6 }
 0x133   :  { %917 = vmatmul.mubr.bf16.gmra.mrb[20].mxu1 %v704_v19 }
 0x134   :  { %936 = vmatpush1.bf16.msra.mxu1 %v5591_v18  ;;  %4847 = vmatprep.mubr.msk.bf16.mxu1 %vm7756_vm3, %v685_v58  ;;  %v5637_v58 = vld [vmem:[%s7740_s4 + $0x1cc] ss:$12 sps:$4 sm:$0xff]   ;;  %v1255_v18 = vld [vmem:[#allocation2] sm:$0xfe] }
 0x135   :  { %937 = vmatprep.subr.bf16.mxu1 %v6158_v6 }
 0x138   :  { %938 = vmatpush1.bf16.msra.mxu1 %v5592_v20  ;;  %v1307_v20 = vrot.slane %v6231_v61, 1  ;;  %v1305_v61 = vrot.slane %v6229_v60, 1  ;;  %v5663_v60 = vld [vmem:[%s7740_s4 + $0x218] ss:$12 sps:$4 sm:$0xff]  }
 0x139   :  { %939 = vmatprep.subr.bf16.mxu1 %v6158_v6 }
 0x13c   :  { %940 = vmatpush1.bf16.msra.mxu1 %v5593_v22  ;;  %v1299_v22 = vrot.slane %v1255_v18, 1 }
 0x13d   :  { %941 = vmatprep.subr.bf16.mxu1 %v6158_v6 }
 0x140   :  { %942 = vmatpush1.bf16.msra.mxu1 %v5594_v24  ;;  %v5659_v24 = vld [vmem:[%s7740_s4 + $0x1b8] ss:$12 sps:$4 sm:$0xff]  }
 0x141   :  { %943 = vmatprep.subr.bf16.mxu1 %v6158_v6 }
 0x144   :  { %944 = vmatpush1.bf16.msra.mxu1 %v5595_v26 }
 0x145   :  { %1135 = vmatprep.subr.bf16.mxu1 %v5598_v27  ;;  %v1308_v27 = vsel %vm352_vm2, %v1303_v3, %v1307_v20 }
 0x147   :  { %960 = vmatmul.mubr.bf16.vlgmr.msra.gmra.mrb[24].mxu1 %v673_v59  ;;  %v5635_v59 = vld [vmem:[%s7740_s4 + $0x1c8] ss:$12 sps:$4 sm:$0xff]  }
 0x148   :  { %4848 = vmatprep.mubr.msk.bf16.mxu1 %vm7756_vm3, %v701_v7  ;;  %1136 = vmatpush1.bf16.msra.mxu1 %v5596_v29  ;;  %v5649_v7 = vld [vmem:[%s7740_s4 + $0x22c] ss:$12 sps:$4 sm:$0xff]   ;;  %v5661_v29 = vld [vmem:[%s7740_s4 + $0x1e8] ss:$12 sps:$4 sm:$0xff]  }
 0x149   :  { %1137 = vmatprep.subr.bf16.mxu1 %v5601_v31 }
 0x14c   :  { %1138 = vmatpush1.bf16.msra.mxu1 %v5599_v32  ;;  %v5662_v32 = vld [vmem:[%s7740_s4 + $0x200] ss:$12 sps:$4 sm:$0xff]  }
 0x14d   :  { %1139 = vmatprep.subr.bf16.mxu1 %v5604_v33  ;;  %v5664_v33 = vld [vmem:[%s7740_s4 + $0x230] ss:$12 sps:$4 sm:$0xff]  }
 0x14f   :  { %968 = vmatmul.mubr.bf16.gmra.mrb[28].mxu1 %v693_v11  ;;  %v5655_v11 = vld [vmem:[%s7740_s4 + $0x25c] ss:$12 sps:$4 sm:$0xff]  }
 0x150   :  { %4849 = vmatprep.mubr.msk.bf16.mxu1 %vm7756_vm3, %v707_v13  ;;  %1140 = vmatpush1.bf16.msra.mxu1 %v5602_v30  ;;  %v5653_v13 = vld [vmem:[%s7740_s4 + $0x258] ss:$12 sps:$4 sm:$0xff]   ;;  %v5665_v30 = vld [vmem:[%s7740_s4 + $0x248] ss:$12 sps:$4 sm:$0xff]  }
 0x151   :  { %1141 = vmatprep.subr.bf16.mxu1 %v5607_v34  ;;  %v5666_v34 = vld [vmem:[%s7740_s4 + $0x260] ss:$12 sps:$4 sm:$0xff]  }
 0x154   :  { %1142 = vmatpush1.bf16.msra.mxu1 %v5605_v35  ;;  %v5667_v35 = vld [vmem:[%s7740_s4 + $0x278] ss:$12 sps:$4 sm:$0xff]  }
 0x155   :  { %1143 = vmatprep.subr.bf16.mxu1 %v5610_v36  ;;  %v6489_v36 = vld [vmem:[%s7741_s5] sm:$0x7]  ;;  %s5889_s5 = smov 48  }
 0x157   :  { %976 = vmatmul.mubr.bf16.gmra.mrb[32].mxu1 %v704_v19  ;;  %v1300_v19 = vrot.slane %v6215_v46, 1 }
 0x158   :  { %1144 = vmatpush1.bf16.msra.mxu1 %v5608_v21  ;;  %4877 = vmatprep.mubr.msk.bf16.mxu1 %vm7756_vm3, %v6209_v37  ;;  %v6494_v21 = vld [vmem:[%s7742_s6] sm:$0x7]  ;;  %s5890_s6 = smov 96  }
 0x159   :  { %1145 = vmatprep.subr.bf16.mxu1 %v5613_v38  ;;  %v1301_v26 = vsel %vm352_vm2, %v1299_v22, %v1300_v19  ;;  %v1306_v31 = vsel %vm352_vm2, %v1300_v19, %v1305_v61  ;;  %v1608_v38 = vrot.slane %v6489_v36, %v6164_v14 }
 0x15c   :  { %1146 = vmatpush1.bf16.msra.mxu1 %v5611_v39  ;;  %v6500_v39 = vrot.slane %v6489_v36, %v6170_v17 }
 0x15d   :  { %1147 = vmatprep.subr.bf16.mxu1 %v5616_v40  ;;  %v6504_v40 = vrot.slane %v6494_v21, %v6164_v14 }
 0x160   :  { %1148 = vmatpush1.bf16.msra.mxu1 %v5614_v25 }
 0x161   :  { %1149 = vmatprep.subr.bf16.mxu1 %v5619_v41  ;;  %v6508_v41 = vrot.slane %v6494_v21, %v6170_v17 }
 0x164   :  { %1150 = vmatpush1.bf16.msra.mxu1 %v5617_v42 }
 0x165   :  { %1151 = vmatprep.subr.bf16.mxu1 %v5622_v43 }
 0x168   :  { %1152 = vmatpush1.bf16.msra.mxu1 %v5620_v28 }
 0x169   :  { %1198 = vmatprep.subr.bf16.mxu1 %v6158_v6 }
 0x16b   :  { %1168 = vmatmul.mubr.bf16.vlgmr.msra.gmra.mrb[12].mxu1 %v6211_v23 }
 0x16c   :  { %4878 = vmatprep.mubr.msk.bf16.mxu1 %vm7756_vm3, %v6217_v47  ;;  %1199 = vmatpush1.bf16.msra.mxu1 %v5623_v44 }
 0x16d   :  { %1200 = vmatprep.subr.bf16.mxu1 %v6158_v6 }
 0x170   :  { %1201 = vmatpush1.bf16.msra.mxu1 %v5624_v45 }
 0x171   :  { %1202 = vmatprep.subr.bf16.mxu1 %v6158_v6 }
 0x173   :  { %1178 = vmatmul.mubr.bf16.gmra.mrb[16].mxu1 %v6215_v46 }
 0x174   :  { %4879 = vmatprep.mubr.msk.bf16.mxu1 %vm7756_vm3, %v587_v49  ;;  %1203 = vmatpush1.bf16.msra.mxu1 %v5625_v48 }
 0x175   :  { %1204 = vmatprep.subr.bf16.mxu1 %v6158_v6 }
 0x178   :  { %1205 = vmatpush1.bf16.msra.mxu1 %v5626_v50 }
 0x179   :  { %1206 = vmatprep.subr.bf16.mxu1 %v6158_v6 }
 0x17b   :  { %1188 = vmatmul.mubr.bf16.gmra.mrb[20].mxu1 %v586_v52 }
 0x17c   :  { %1207 = vmatpush1.bf16.msra.mxu1 %v5627_v51  ;;  %4880 = vmatprep.mubr.msk.bf16.mxu1 %vm7756_vm3, %v6209_v37  ;;  %v5631_v37 = vld [vmem:[%s7740_s4 + $0xc8] ss:$12 sps:$4 sm:$0xff]  }
 0x17d   :  { %1208 = vmatprep.subr.bf16.mxu1 %v6158_v6 }
 0x180   :  { %1209 = vmatpush1.bf16.msra.mxu1 %v5628_v53 }
 0x181   :  { %1210 = vmatprep.subr.bf16.mxu1 %v6158_v6 }
 0x184   :  { %1211 = vmatpush1.bf16.msra.mxu1 %v5629_v54 }
 0x185   :  { %1212 = vmatprep.subr.bf16.mxu1 %v6158_v6 }
 0x188   :  { %1213 = vmatpush1.bf16.msra.mxu1 %v5630_v55 }
 0x189   :  { %1214 = vmatprep.subr.bf16.mxu1 %v6158_v6 }
 0x18c   :  { %1215 = vmatpush1.bf16.msra.mxu1 %v5631_v37 }
 0x18d   :  { %1465 = vmatprep.subr.bf16.mxu1 %v5634_v56 }
 0x18f   :  { %1231 = vmatmul.mubr.bf16.vlgmr.msra.gmra.mrb[24].mxu1 %v6211_v23  ;;  %v5643_v23 = vld [vmem:[%s7740_s4 + $0x1fc] ss:$12 sps:$4 sm:$0xff]  }
 0x190   :  { %4881 = vmatprep.mubr.msk.bf16.mxu1 %vm7756_vm3, %v6217_v47  ;;  %1466 = vmatpush1.bf16.msra.mxu1 %v5632_v57  ;;  %v5647_v47 = vld [vmem:[%s7740_s4 + $0x228] ss:$12 sps:$4 sm:$0xff]  }
 0x191   :  { %1467 = vmatprep.subr.bf16.mxu1 %v5637_v58 }
 0x194   :  { %1468 = vmatpush1.bf16.msra.mxu1 %v5635_v59 }
 0x195   :  { %1469 = vmatprep.subr.bf16.mxu1 %v5640_v62 }
 0x197   :  { %1239 = vmatmul.mubr.bf16.gmra.mrb[28].mxu1 %v6215_v46  ;;  %v5660_v46 = vld [vmem:[%s7740_s4 + $0x1d0] ss:$12 sps:$4 sm:$0xff]   ;;  %s5887_s4 = smov 112  }
 0x198   :  { %4882 = vmatprep.mubr.msk.bf16.mxu1 %vm7756_vm3, %v587_v49  ;;  %1470 = vmatpush1.bf16.msra.mxu1 %v5638_v63 }
 0x199   :  { %1471 = vmatprep.subr.bf16.mxu1 %v5643_v23 }
 0x19c   :  { %1472 = vmatpush1.bf16.msra.mxu1 %v5641_v0 }
 0x19d   :  { %1473 = vmatprep.subr.bf16.mxu1 %v5646_v1 }
 0x19f   :  { %1247 = vmatmul.mubr.bf16.gmra.mrb[32].mxu1 %v586_v52 }
 0x1a0   :  { %1474 = vmatpush1.bf16.msra.mxu1 %v5644_v4  ;;  %4910 = vmatprep.mubr.msk.bf16.mxu1 %vm7756_vm3, %v1304_v8 }
 0x1a1   :  { %1475 = vmatprep.subr.bf16.mxu1 %v5649_v7 }
 0x1a4   :  { %1476 = vmatpush1.bf16.msra.mxu1 %v5647_v47 }
 0x1a5   :  { %1477 = vmatprep.subr.bf16.mxu1 %v5652_v9 }
 0x1a8   :  { %1478 = vmatpush1.bf16.msra.mxu1 %v5650_v10 }
 0x1a9   :  { %1479 = vmatprep.subr.bf16.mxu1 %v5655_v11 }
 0x1ac   :  { %1480 = vmatpush1.bf16.msra.mxu1 %v5653_v13 }
 0x1ad   :  { %1481 = vmatprep.subr.bf16.mxu1 %v5658_v15 }
 0x1b0   :  { %1482 = vmatpush1.bf16.msra.mxu1 %v5656_v16 }
 0x1b1   :  { %1528 = vmatprep.subr.bf16.mxu1 %v6158_v6 }
 0x1b3   :  { %1498 = vmatmul.mubr.bf16.vlgmr.msra.gmra.mrb[12].mxu1 %v1301_v26 }
 0x1b4   :  { %4911 = vmatprep.mubr.msk.bf16.mxu1 %vm7756_vm3, %v1308_v27  ;;  %1529 = vmatpush1.bf16.msra.mxu1 %v5659_v24 }
 0x1b5   :  { %1530 = vmatprep.subr.bf16.mxu1 %v6158_v6 }
 0x1b8   :  { %1531 = vmatpush1.bf16.msra.mxu1 %v5660_v46 }
 0x1b9   :  { %1532 = vmatprep.subr.bf16.mxu1 %v6158_v6 }
 0x1bb   :  { %1508 = vmatmul.mubr.bf16.gmra.mrb[16].mxu1 %v1306_v31 }
 0x1bc   :  { %4912 = vmatprep.mubr.msk.bf16.mxu1 %vm7756_vm3, %v1307_v20  ;;  %1533 = vmatpush1.bf16.msra.mxu1 %v5661_v29 }
 0x1bd   :  { %1534 = vmatprep.subr.bf16.mxu1 %v6158_v6 }
 0x1c0   :  { %1535 = vmatpush1.bf16.msra.mxu1 %v5662_v32 }
 0x1c1   :  { %1536 = vmatprep.subr.bf16.mxu1 %v6158_v6 }
 0x1c3   :  { %1518 = vmatmul.mubr.bf16.gmra.mrb[20].mxu1 %v1305_v61 }
 0x1c4   :  { %1537 = vmatpush1.bf16.msra.mxu1 %v5663_v60  ;;  %4913 = vmatprep.mubr.msk.bf16.mxu1 %vm7756_vm3, %v1304_v8 }
 0x1c5   :  { %1538 = vmatprep.subr.bf16.mxu1 %v6158_v6 }
 0x1c8   :  { %1539 = vmatpush1.bf16.msra.mxu1 %v5664_v33 }
 0x1c9   :  { %1540 = vmatprep.subr.bf16.mxu1 %v6158_v6 }
 0x1cc   :  { %1541 = vmatpush1.bf16.msra.mxu1 %v5665_v30 }
 0x1cd   :  { %1542 = vmatprep.subr.bf16.mxu1 %v6158_v6 }
 0x1d0   :  { %1543 = vmatpush1.bf16.msra.mxu1 %v5666_v34 }
 0x1d1   :  { %1544 = vmatprep.subr.bf16.mxu1 %v6158_v6 }
 0x1d4   :  { %1545 = vmatpush1.bf16.msra.mxu1 %v5667_v35 }
 0x1d7   :  { %1561 = vmatmul.mubr.bf16.vlgmr.msra.gmra.mrb[24].mxu1 %v1301_v26 }
 0x1d8   :  { %4914 = vmatprep.mubr.msk.bf16.mxu1 %vm7756_vm3, %v1308_v27 }
 0x1df   :  { %1569 = vmatmul.mubr.bf16.gmra.mrb[28].mxu1 %v1306_v31 }
 0x1e0   :  { %4915 = vmatprep.mubr.msk.bf16.mxu1 %vm7756_vm3, %v1307_v20 }
 0x1e7   :  { %1577 = vmatmul.mubr.bf16.gmra.mrb[32].mxu1 %v1305_v61 }
 0x286   :  { %v1499_v25 = vpop.f32.mrb[12].mxu1 }
 0x287   :  { %v1620_v42 = vmul.f32 %v1608_v38, %v1499_v25  ;;  %v1501_v43 = vpop.f32.mrb[13].mxu1 }
 0x288   :  { %v1621_v28 = vmul.f32 %v6500_v39, %v1501_v43  ;;  %v1503_v44 = vpop.f32.mrb[14].mxu1 }
 0x289   :  { %v1655_v45 = vadd.f32 %v6504_v40, %v1620_v42  ;;  %v1623_v48 = vmul.f32 %v1608_v38, %v1503_v44  ;;  %v1505_v49 = vpop.f32.mrb[15].mxu1 }
 0x28a   :  { %v1656_v50 = vadd.f32 %v6508_v41, %v1621_v28  ;;  %v1624_v51 = vmul.f32 %v6500_v39, %v1505_v49 }
 0x28b   :  { %v1673_v14 = vmax.f32 %v1655_v45, 0.0  ;;  %v1658_v52 = vadd.f32 %v6504_v40, %v1623_v48 }
 0x28c   :  { %v1674_v53 = vmax.f32 %v1656_v50, 0.0  ;;  %v1659_v17 = vadd.f32 %v6508_v41, %v1624_v51 }
 0x28d   :  { %v1676_v54 = vmax.f32 %v1658_v52, 0.0  ;;  %v1710_v56 = vrot.slane %v1673_v14, 1 }
 0x28e   :  { %v1677_v55 = vmax.f32 %v1659_v17, 0.0  ;;  %v1509_v37 = vpop.f32.mrb[16].mxu1  ;;  %v1713_v62 = vrot.slane %v1674_v53, 1 }
 0x28f   :  { %v1711_v57 = vrot.slane %v1676_v54, 1  ;;  %v1626_v58 = vmul.f32 %v1608_v38, %v1509_v37  ;;  %v1511_v59 = vpop.f32.mrb[17].mxu1 }
 0x290   :  { %v1714_v63 = vrot.slane %v1677_v55, 1  ;;  %v1627_v23 = vmul.f32 %v6500_v39, %v1511_v59  ;;  %v1513_v0 = vpop.f32.mrb[18].mxu1 }
 0x291   :  { %v1661_v1 = vadd.f32 %v6504_v40, %v1626_v58  ;;  %v1629_v2 = vmul.f32 %v1608_v38, %v1513_v0  ;;  %v1515_v3 = vpop.f32.mrb[19].mxu1  ;;  %v1712_v4 = vsel %vm352_vm2, %v1710_v56, %v1711_v57 }
 0x292   :  { %v1662_v5 = vadd.f32 %v6508_v41, %v1627_v23  ;;  %v1630_v7 = vmul.f32 %v6500_v39, %v1515_v3  ;;  %v1715_v8 = vsel %vm352_vm2, %v1713_v62, %v1714_v63  ;;  %v6522_v47 = vmax.f32 %v1673_v14, %v1712_v4 }
 0x293   :  { %v1679_v9 = vmax.f32 %v1661_v1, 0.0  ;;  %v1664_v10 = vadd.f32 %v6504_v40, %v1629_v2  ;;  %v6525_v11 = vmax.f32 %v1674_v53, %v1715_v8  ;;  %v1615_v23 = vsub.s32 2, %v6161_v12 }
 0x294   :  { %v1680_v13 = vmax.f32 %v1662_v5, 0.0  ;;  %v1665_v15 = vadd.f32 %v6508_v41, %v1630_v7 }
 0x295   :  { %v1719_v16 = vrot.slane %v1679_v9, 1  ;;  %v1682_v18 = vmax.f32 %v1664_v10, 0.0  ;;  %v5489_v19 = vpack.i.bf16 %v6525_v11, %v6522_v47  ;;  %v1616_v1 = vrot.slane %v6489_v36, %v1615_v23 }
 0x296   :  { %v1721_v20 = vrot.slane %v1680_v13, 1  ;;  %v1683_v22 = vmax.f32 %v1665_v15, 0.0  ;;  %v1519_v24 = vpop.f32.mrb[20].mxu1  ;;  %v1651_v2 = vrot.slane %v6494_v21, %v1615_v23 }
 0x297   :  { %v1725_v26 = vrot.slane %v1682_v18, 1  ;;  %v1632_v27 = vmul.f32 %v1608_v38, %v1519_v24  ;;  %5490 = vrot.lane.b32.xlu0 %v5489_v19, %s5887_s4  ;;  %v1521_v46 = vpop.f32.mrb[21].mxu1  ;;  %v1720_v61 = vsel %vm352_vm2, %v1711_v57, %v1719_v16 }
 0x298   :  { %v1727_v29 = vrot.slane %v1683_v22, 1  ;;  %v1633_v31 = vmul.f32 %v6500_v39, %v1521_v46  ;;  %v1523_v32 = vpop.f32.mrb[22].mxu1  ;;  %v1722_v60 = vsel %vm352_vm2, %v1714_v63, %v1721_v20  ;;  %v6534_v33 = vmax.f32 %v1676_v54, %v1720_v61 }
 0x299   :  { %v1667_v30 = vadd.f32 %v6504_v40, %v1632_v27  ;;  %v1635_v34 = vmul.f32 %v1608_v38, %v1523_v32  ;;  %v1525_v35 = vpop.f32.mrb[23].mxu1  ;;  %v6537_v25 = vmax.f32 %v1677_v55, %v1722_v60  ;;  %v1726_v42 = vsel %vm352_vm2, %v1719_v16, %v1725_v26 }
 0x29a   :  { %v1668_v43 = vadd.f32 %v6508_v41, %v1633_v31  ;;  %v1636_v28 = vmul.f32 %v6500_v39, %v1525_v35  ;;  %v1728_v44 = vsel %vm352_vm2, %v1721_v20, %v1727_v29  ;;  %v6543_v45 = vmax.f32 %v1679_v9, %v1726_v42 }
 0x29b   :  { %v1685_v48 = vmax.f32 %v1667_v30, 0.0  ;;  %v1670_v49 = vadd.f32 %v6504_v40, %v1635_v34  ;;  %v6546_v50 = vmax.f32 %v1680_v13, %v1728_v44  ;;  %v5499_v34 = vpack.i.bf16 %v6537_v25, %v6534_v33 }
 0x29c   :  { %v1686_v51 = vmax.f32 %v1668_v43, 0.0  ;;  %v1671_v38 = vadd.f32 %v6508_v41, %v1636_v28 }
 0x29d   :  { %v1731_v14 = vrot.slane %v1685_v48, 1  ;;  %v1688_v52 = vmax.f32 %v1670_v49, 0.0 }
 0x29e   :  { %v1733_v53 = vrot.slane %v1686_v51, 1  ;;  %v1689_v17 = vmax.f32 %v1671_v38, 0.0 }
 0x29f   :  { %v1737_v54 = vrot.slane %v1688_v52, 1  ;;  %v1732_v55 = vsel %vm352_vm2, %v1725_v26, %v1731_v14 }
 0x2a0   :  { %v1739_v39 = vrot.slane %v1689_v17, 1  ;;  %v1734_v37 = vsel %vm352_vm2, %v1727_v29, %v1733_v53  ;;  %v6551_v56 = vmax.f32 %v1682_v18, %v1732_v55 }
 0x2a1   :  { %v6553_v57 = vmax.f32 %v1688_v52, %v1737_v54  ;;  %v6555_v40 = vmax.f32 %v1683_v22, %v1734_v37  ;;  %v1738_v58 = vsel %vm352_vm2, %v1731_v14, %v1737_v54 }
 0x2a2   :  { %v6558_v59 = vmax.f32 %v1689_v17, %v1739_v39  ;;  %v1740_v41 = vsel %vm352_vm2, %v1733_v53, %v1739_v39  ;;  %v6561_v62 = vmax.f32 %v1685_v48, %v1738_v58 }
 0x2a3   :  { %v5494_v63 = vpack.i.bf16 %v6555_v40, %v6551_v56  ;;  %v6566_v0 = vmax.f32 %v1686_v51, %v1740_v41 }
 0x2a5   :  { %5495 = vrot.lane.b32.xlu1 %v5494_v63, %s5887_s4 }
 0x2aa   :  { %v1562_v3 = vpop.f32.mrb[24].mxu1 }
 0x2ab   :  { %v1622_v4 = vmul.f32 %v1616_v1, %v1562_v3  ;;  %v1564_v5 = vpop.f32.mrb[25].mxu1  ;;  %v5888_v3 = vmov 1966171168  }
 0x2ac   :  { %v1565_v7 = vpop.f32.mrb[26].mxu1 }
 0x2ad   :  { %v1657_v8 = vadd.f32 %v1651_v2, %v1622_v4  ;;  %v1625_v9 = vmul.f32 %v1616_v1, %v1565_v7  ;;  %v1567_v10 = vpop.f32.mrb[27].mxu1 }
 0x2af   :  { %v1675_v13 = vmax.f32 %v1657_v8, 0.0  ;;  %v1660_v15 = vadd.f32 %v1651_v2, %v1625_v9 }
 0x2b1   :  { %v1678_v16 = vmax.f32 %v1660_v15, 0.0  ;;  %v1716_v19 = vrot.slane %v1675_v13, 1 }
 0x2b2   :  { %v1570_v18 = vpop.f32.mrb[28].mxu1 }
 0x2b3   :  { %v1717_v20 = vrot.slane %v1678_v16, 1  ;;  %v1628_v22 = vmul.f32 %v1616_v1, %v1570_v18  ;;  %v1572_v24 = vpop.f32.mrb[29].mxu1 }
 0x2b4   :  { %v1573_v26 = vpop.f32.mrb[30].mxu1 }
 0x2b5   :  { %v1663_v27 = vadd.f32 %v1651_v2, %v1628_v22  ;;  %v1631_v36 = vmul.f32 %v1616_v1, %v1573_v26  ;;  %v1575_v46 = vpop.f32.mrb[31].mxu1  ;;  %v1718_v21 = vsel %vm352_vm2, %v1716_v19, %v1717_v20 }
 0x2b6   :  { %v1763_v61 = vmax.f32 %v1675_v13, %v1718_v21  ;;  %v7783_v21 = vmov 0 }
 0x2b7   :  { %v1681_v29 = vmax.f32 %v1663_v27, 0.0  ;;  %v1666_v31 = vadd.f32 %v1651_v2, %v1631_v36 }
 0x2b8   :  { %1801 = vrot.lane.b32.xlu0 %v1763_v61, %s5887_s4 }
 0x2b9   :  { %v1723_v32 = vrot.slane %v1681_v29, 1  ;;  %v1684_v60 = vmax.f32 %v1666_v31, 0.0 }
 0x2ba   :  { %v1578_v30 = vpop.f32.mrb[32].mxu1 }
 0x2bb   :  { %v1729_v35 = vrot.slane %v1684_v60, 1  ;;  %v1634_v42 = vmul.f32 %v1616_v1, %v1578_v30  ;;  %v1580_v43 = vpop.f32.mrb[33].mxu1  ;;  %v1724_v28 = vsel %vm352_vm2, %v1717_v20, %v1723_v32  ;;  %v5686_v20 = vld [vmem:[%s7743_s7 + $0xc8] sm:$0xff]  }
 0x2bc   :  { %5500 = vrot.lane.b32.xlu0 %v5499_v34, %s5887_s4  ;;  %v1581_v44 = vpop.f32.mrb[34].mxu1  ;;  %v6577_v48 = vmax.f32 %v1678_v16, %v1724_v28 }
 0x2bd   :  { %v1669_v49 = vadd.f32 %v1651_v2, %v1634_v42  ;;  %v1637_v51 = vmul.f32 %v1616_v1, %v1581_v44  ;;  %v1583_v38 = vpop.f32.mrb[35].mxu1  ;;  %v1730_v14 = vsel %vm352_vm2, %v1723_v32, %v1729_v35 }
 0x2be   :  { %v6580_v52 = vmax.f32 %v1681_v29, %v1730_v14 }
 0x2bf   :  { %v1687_v53 = vmax.f32 %v1669_v49, 0.0  ;;  %v1672_v17 = vadd.f32 %v1651_v2, %v1637_v51  ;;  %v1890_v2 = vunpack.c.l.s4 %v5888_v3  ;;  %v5669_v3 = vld [vmem:[%s7743_s7] sm:$0xff]  }
 0x2c1   :  { %v1735_v54 = vrot.slane %v1687_v53, 1  ;;  %v1690_v55 = vmax.f32 %v1672_v17, 0.0  ;;  %v1891_v7 = vunpack.c.0.s8 %v1890_v2 }
 0x2c3   :  { %v1741_v39 = vrot.slane %v1690_v55, 1  ;;  %v1736_v37 = vsel %vm352_vm2, %v1729_v35, %v1735_v54  ;;  %v6593_v10 = vsub.s32 %v1891_v7, %v6161_v12 }
 0x2c4   :  { %v1772_v58 = vmax.f32 %v1684_v60, %v1736_v37 }
 0x2c5   :  { %v1742_v41 = vsel %vm352_vm2, %v1735_v54, %v1741_v39  ;;  %v6584_v63 = vmax.f32 %v1690_v55, %v1741_v39  ;;  %vm7768_vm2 = vsmask.f32 2304 }
 0x2c6   :  { %1819 = vrot.lane.b32.xlu1 %v1772_v58, %s5887_s4  ;;  %v6587_v23 = vmax.f32 %v1687_v53, %v1742_v41  ;;  %vm1920_vm6 = vmand %vm7757_vm1, %vm7768_vm2  ;;  %v5668_v41 = vld [vmem:[%s7743_s7 + $0x40] sm:$0xff]  }
 0x2c7   :  { %vm6617_vm7 = vmor %vm1920_vm6, %vm1917_vm4  ;;  %5120 = vmatprep.subr.bf16.mxu0 %v5668_v41  ;;  %vm7758_vm6 = vsmask.f32 7946 }
 0x2c8   :  { %v7784_v21 = vsel %vm6617_vm7, 4294967295, %v7783_v21  ;;  %5121 = vmatpush3.bf16.msra.mxu0 %v5669_v3  ;;  %vm2310_vm4 = vmand %vm7755_vm14, %vm7762_vm9 }
 0x2c9   :  { %vm2312_vm12 = vmand %vm7754_vm0, %vm7758_vm6  ;;  %vm7760_vm0 = vcmask 1041152  }
 0x2ca   :  { %1807 = vrot.lane.b32.xlu1 %v6577_v48, %s5887_s4  ;;  %vm6738_vm1 = vmand %vm7760_vm0, %vm7763_vm11 }
 0x2cb   :  { %vm6744_vm6 = vmand %vm540_vm5, %vm7762_vm9  ;;  %vm7767_vm5 = vcmask 125955   ;;  %vm7797_vm9 = vsmask.f32 7946 }
 0x2cc   :  { %vm1957_vm0 = vmor %vm6605_vm15, %vm6738_vm1 }
 0x309   :  { %v5491_v1 = vpop.permute.xlu0 %5490 }
 0x30a   :  { %v5493_v4 = vunpack.i.h.bf16 %v5491_v1  ;;  %v5492_v5 = vunpack.i.l.bf16 %v5491_v1 }
 0x30c   :  { %v1834_v8 = vsel %vm7753_vm10, %v5492_v5, %v5493_v4 }
 0x30d   :  { %v1864_v18 = vmax.f32 %v6522_v47, %v1834_v8  ;;  %v5670_v8 = vld [vmem:[%s7743_s7 + $0x48] sm:$0xff]  }
 0x30e   :  { %5122 = vmatprep.subr.bf16.mxu0 %v5670_v8 }
 0x317   :  { %v5496_v26 = vpop.permute.xlu1 %5495 }
 0x318   :  { %v5498_v36 = vunpack.i.h.bf16 %v5496_v26  ;;  %v5497_v46 = vunpack.i.l.bf16 %v5496_v26 }
 0x31a   :  { %v1840_v34 = vsel %vm7753_vm10, %v5497_v46, %v5498_v36  ;;  %v5676_v46 = vld [vmem:[%s7743_s7 + $0x60] sm:$0xff]  }
 0x31b   :  { %v1873_v51 = vmax.f32 %v6551_v56, %v1840_v34  ;;  %v5680_v34 = vld [vmem:[%s7743_s7 + $0x70] sm:$0xff]  }
 0x32a   :  { %v1802_v9 = vpop.permute.xlu0 %1801 }
 0x32b   :  { %v1835_v13 = vsel %vm7753_vm10, %v5493_v4, %v1802_v9  ;;  %v1866_v15 = vmax.f32 %v1763_v61, %v1802_v9  ;;  %v1922_v61 = vld [vmem:[#allocation3] sm:$0x7]  ;;  %v5671_v9 = vld [vmem:[%s7743_s7 + $0x8] sm:$0xff]  }
 0x32c   :  { %v1865_v19 = vmax.f32 %v6525_v11, %v1835_v13  ;;  %5123 = vmatpush3.bf16.msra.mxu0 %v5671_v9 }
 0x32d   :  { %v1884_v12 = vpack.c.bf16 %v1866_v15, %v1866_v15 }
 0x32e   :  { %v4916_v22 = vpack.c.bf16 %v1865_v19, %v1864_v18  ;;  %v5501_v29 = vpop.permute.xlu0 %5500 }
 0x32f   :  { %v1902_v24 = vrot.slane %v1884_v12, %v6593_v10  ;;  %v5503_v35 = vunpack.i.h.bf16 %v5501_v29  ;;  %v5502_v42 = vunpack.i.l.bf16 %v5501_v29  ;;  %v5672_v12 = vld [vmem:[%s7743_s7 + $0x50] sm:$0xff]  }
 0x330   :  { %v1895_v47 = vrot.slane %v4916_v22, %v6593_v10  ;;  %v5673_v22 = vld [vmem:[%s7743_s7 + $0x10] sm:$0xff]   ;;  %5124 = vmatprep.subr.bf16.mxu0 %v5672_v12 }
 0x331   :  { %v1836_v14 = vsel %vm7753_vm10, %v5502_v42, %v5503_v35  ;;  %5125 = vmatpush3.bf16.msra.mxu0 %v5673_v22  ;;  %v5681_v42 = vld [vmem:[%s7743_s7 + $0x30] sm:$0xff]  }
 0x332   :  { %v1903_v11 = vcombine.low %v1895_v47, %v1902_v24  ;;  %v1925_v27 = vcombine.high %v1895_v47, %v1902_v24  ;;  %v1867_v56 = vmax.f32 %v6534_v33, %v1836_v14  ;;  %v5674_v47 = vld [vmem:[%s7743_s7 + $0x58] sm:$0xff]  }
 0x333   :  { %5126 = vmatprep.subr.bf16.mxu0 %v5674_v47 }
 0x334   :  { %v1932_v31 = vrot.slane %v1925_v27, %v6593_v10  ;;  %v1910_v32 = vrot.slane %v1903_v11, %v6593_v10  ;;  %v5675_v11 = vld [vmem:[%s7743_s7 + $0x18] sm:$0xff]   ;;  %v5504_v27 = vpack.i.bf16 %v6566_v0, %v6561_v62 }
 0x335   :  { %5127 = vmatpush3.bf16.msra.mxu0 %v5675_v11 }
 0x336   :  { %1933 = vrot.lane.b32.xlu0 %v1932_v31, %s5889_s5  ;;  %v1923_v60 = vsel %vm6617_vm7, %v1910_v32, %v1922_v61  ;;  %v1948_v30 = vcombine.high %v1910_v32, %v1910_v32  ;;  %v1968_v28 = vcombine.high %v1932_v31, %v1932_v31  ;;  %v5677_v61 = vld [vmem:[%s7743_s7 + $0x20] sm:$0xff]   ;;  %5128 = vmatprep.subr.bf16.mxu0 %v5676_v46  ;;  %v5678_v32 = vld [vmem:[%s7743_s7 + $0x68] sm:$0xff]   ;;  %vm7799_vm7 = vcmask 392192  }
 0x337   :  { %1924 = vst [vmem:[#allocation3] sm:$0x7] %v1923_v60  ;;  %v5679_v60 = vld [vmem:[%s7743_s7 + $0x28] sm:$0xff]  }
 0x338   :  { %1949 = vrot.lane.b32.xlu1 %v1948_v30, %s5890_s6  ;;  %v1820_v43 = vpop.permute.xlu1 %1819  ;;  %v5509_v30 = vpack.i.bf16 %v6546_v50, %v6543_v45 }
 0x339   :  { %v1841_v44 = vsel %vm7753_vm10, %v5498_v36, %v1820_v43  ;;  %v1875_v49 = vmax.f32 %v1772_v58, %v1820_v43  ;;  %5129 = vmatpush3.bf16.msra.mxu0 %v5677_v61 }
 0x33a   :  { %v1874_v38 = vmax.f32 %v6555_v40, %v1841_v44  ;;  %1969 = vrot.lane.b32.xlu0 %v1968_v28, %s5891_s19  ;;  %5130 = vmatprep.subr.bf16.mxu0 %v5678_v32  ;;  %v5682_v28 = vld [vmem:[%s7743_s7 + $0x78] sm:$0xff]   ;;  %v7787_v44 = vmov 0 }
 0x33b   :  { %v2133_v53 = vpack.c.bf16 %v1875_v49, %v1875_v49  ;;  %v5683_v49 = vld [vmem:[%s7743_s7 + $0x38] sm:$0xff]  }
 0x33c   :  { %v4919_v17 = vpack.c.bf16 %v1874_v38, %v1873_v51  ;;  %v1808_v54 = vpop.permute.xlu1 %1807  ;;  %v5684_v51 = vld [vmem:[%s7743_s7 + $0xc0] sm:$0xff]  }
 0x33d   :  { %v2151_v55 = vrot.slane %v2133_v53, %v6593_v10  ;;  %v1837_v39 = vsel %vm7753_vm10, %v5503_v35, %v1808_v54  ;;  %v1869_v37 = vmax.f32 %v6577_v48, %v1808_v54  ;;  %5131 = vmatpush3.bf16.msra.mxu0 %v5679_v60  ;;  %vm2311_vm10 = vmor %vm6702_vm13, %vm2310_vm4  ;;  %vm7759_vm4 = vcmask 1040768  }
 0x33e   :  { %v2144_v58 = vrot.slane %v4919_v17, %v6593_v10  ;;  %v1868_v40 = vmax.f32 %v6537_v25, %v1837_v39  ;;  %5132 = vmatprep.subr.bf16.mxu0 %v5680_v34  ;;  %vm6719_vm8 = vmor %vm2312_vm12, %vm2311_vm10  ;;  %vm7761_vm12 = vcmask 780290   ;;  %v7793_v53 = vmov 0  ;;  %v1945_v39 = vld [vmem:[#allocation3 + $0x2] sm:$0x7]  ;;  %v5742_v34 = vld [vmem:[%s7743_s7 + $0x388] sm:$0xff]  }
 0x33f   :  { %v1986_v1 = vpack.c.bf16 %v1869_v37, %v1869_v37  ;;  %v7788_v44 = vsel %vm6719_vm8, 4294967295, %v7787_v44  ;;  %vm1940_vm10 = vmand %vm7759_vm4, %vm7763_vm11  ;;  %vm7765_vm4 = vcmask 1042434   ;;  %vm7798_vm11 = vcmask 387074  }
 0x340   :  { %v2152_v2 = vcombine.low %v2144_v58, %v2151_v55  ;;  %v2175_v4 = vcombine.high %v2144_v58, %v2151_v55  ;;  %v4917_v5 = vpack.c.bf16 %v1868_v40, %v1867_v56  ;;  %vm1941_vm14 = vmor %vm6605_vm15, %vm1940_vm10  ;;  %v7795_v55 = vmov 0 }
 0x341   :  { %v2004_v48 = vrot.slane %v1986_v1, %v6593_v10  ;;  %5133 = vmatpush3.bf16.msra.mxu0 %v5681_v42  ;;  %vm1943_vm3 = vmand %vm7761_vm12, %vm7768_vm2  ;;  %v7804_v1 = vmov 0 }
 0x342   :  { %v1997_v33 = vrot.slane %v4917_v5, %v6593_v10  ;;  %v2182_v25 = vrot.slane %v2175_v4, %v6593_v10  ;;  %v6649_v7 = vrot.slane %v2152_v2, %v6593_v10  ;;  %5134 = vmatprep.subr.bf16.mxu0 %v5682_v28  ;;  %vm6748_vm8 = vmor %vm1943_vm3, %vm1941_vm14  ;;  %vm7766_vm14 = vsmask.f32 3328 }
 0x343   :  { %v7794_v53 = vsel %vm6748_vm8, 4294967295, %v7793_v53  ;;  %vm6758_vm12 = vmand %vm7765_vm4, %vm7768_vm2  ;;  %vm7770_vm4 = vcmask 1040512   ;;  %vm7809_vm2 = vsmask.f32 7938 }
 0x344   :  { %v2184_v13 = vshll.u32 %v2182_v25, 16  ;;  %v2005_v15 = vcombine.low %v1997_v33, %v2004_v48  ;;  %v2198_v16 = vcombine.high %v6649_v7, %v6649_v7  ;;  %v2217_v19 = vcombine.high %v2182_v25, %v2182_v25  ;;  %vm2168_vm3 = vmor %vm6702_vm13, %vm6744_vm6 }
 0x345   :  { %v2028_v36 = vcombine.high %v1997_v33, %v2004_v48  ;;  %5135 = vmatpush3.bf16.msra.mxu0 %v5683_v49  ;;  %v7796_v55 = vsel %vm6758_vm12, 4294967295, %v7795_v55  ;;  %vm2170_vm10 = vmand %vm7798_vm11, %vm7797_vm9  ;;  %v2161_v5 = vshll.u32 %v6649_v7, 16 }
 0x346   :  { %2186 = vrot.lane.b32.xlu1 %v2184_v13, %s5889_s5  ;;  %v2012_v18 = vrot.slane %v2005_v15, %v6593_v10  ;;  %v2200_v24 = vshll.u32 %v2198_v16, 16  ;;  %v2219_v26 = vshll.u32 %v2217_v19, 16  ;;  %5142 = vmatprep.subr.bf16.mxu0 %v5684_v51  ;;  %vm6773_vm1 = vmor %vm6758_vm12, %vm1957_vm0 }
 0x347   :  { %v2035_v29 = vrot.slane %v2028_v36, %v6593_v10  ;;  %vm6779_vm6 = vmand %vm7767_vm5, %vm7766_vm14  ;;  %vm7771_vm14 = vcmask 518146   ;;  %vm7772_vm5 = vcmask 785408  }
 0x348   :  { %2013 = vrot.lane.b32.xlu0 %v2012_v18, %s5892_s30  ;;  %v2052_v31 = vcombine.high %v2012_v18, %v2012_v18  ;;  %vm6783_vm11 = vmor %vm2170_vm10, %vm2168_vm3 }
 0x349   :  { %v2068_v43 = vcombine.high %v2035_v29, %v2035_v29  ;;  %v7805_v1 = vsel %vm6783_vm11, 4294967295, %v7804_v1  ;;  %vm1964_vm0 = vmor %vm6779_vm6, %vm6773_vm1  ;;  %vm7815_vm1 = vcmask 780290  }
 0x34a   :  { %2202 = vrot.lane.b32.xlu1 %v2200_v24, %s5890_s6 }
 0x34c   :  { %2221 = vrot.lane.b32.xlu0 %v2219_v26, %s5891_s19  ;;  %v5765_v26 = vld [vmem:[%s7743_s7 + $0x280] sm:$0xff]  }
 0x34e   :  { %5505 = vrot.lane.b32.xlu1 %v5504_v27, %s5887_s4 }
 0x350   :  { %1825 = vrot.lane.b32.xlu0 %v6587_v23, %s5887_s4 }
 0x352   :  { %2036 = vrot.lane.b32.xlu1 %v2035_v29, %s5887_s4 }
 0x354   :  { %2053 = vrot.lane.b32.xlu0 %v2052_v31, %s5893_s23 }
 0x358   :  { %5510 = vrot.lane.b32.xlu0 %v5509_v30, %s5887_s4 }
 0x35c   :  { %2069 = vrot.lane.b32.xlu0 %v2068_v43, %s5894_s0 }
 0x3a8   :  { %v1934_v17 = vpop.permute.xlu0 %1933 }
 0x3a9   :  { %v1935_v54 = vrot.slane %v1934_v17, 7 }
 0x3aa   :  { %v1950_v41 = vpop.permute.xlu1 %1949 }
 0x3ab   :  { %v1937_v37 = vsel %vm7799_vm7, %v1935_v54, %v1934_v17  ;;  %vm7806_vm7 = vsmask.f32 256  ;;  %v1951_v2 = vrot.slane %v1950_v41, 7 }
 0x3ac   :  { %v1946_v58 = vsel %vm6748_vm8, %v1937_v37, %v1945_v39  ;;  %vm6789_vm9 = vmand %vm7770_vm4, %vm7806_vm7  ;;  %vm7810_vm8 = vcmask 1040768   ;;  %vm7813_vm7 = vsmask.f32 2304  ;;  %v1970_v13 = vpop.permute.xlu0 %1969 }
 0x3ad   :  { %1947 = vst [vmem:[#allocation3 + $0x2] sm:$0x7] %v1946_v58  ;;  %vm6799_vm10 = vmand %vm7810_vm8, %vm7809_vm2  ;;  %v1953_v25 = vsel %vm7772_vm5, %v1951_v2, %v1950_v41  ;;  %vm7814_vm8 = vsmask.f32 7946  ;;  %vm7819_vm5 = vcmask 1041152   ;;  %v1971_v19 = vrot.slane %v1970_v13, 7 }
 0x3ae   :  { %vm1977_vm3 = vmor %vm6605_vm15, %vm6789_vm9 }
 0x3af   :  { %vm1979_vm4 = vmand %vm7771_vm14, %vm7813_vm7  ;;  %vm7775_vm7 = vcmask 1040896   ;;  %vm7818_vm14 = vsmask.f32 7938 }
 0x3b0   :  { %vm2192_vm2 = vmor %vm6702_vm13, %vm6799_vm10 }
 0x3b1   :  { %vm2193_vm6 = vmand %vm7815_vm1, %vm7814_vm8 }
 0x3b2   :  { %vm6819_vm9 = vmor %vm1979_vm4, %vm1977_vm3  ;;  %vm7778_vm3 = vcmask 911362  }
 0x3b3   :  { %vm6825_vm12 = vmand %vm7819_vm5, %vm7818_vm14 }
 0x3b4   :  { %v2172_v48 = vld [vmem:[#allocation3] sm:$0x7]  ;;  %v1965_v33 = vld [vmem:[#allocation3 + $0x4] sm:$0xf]  ;;  %vm6829_vm10 = vmor %vm2193_vm6, %vm2192_vm2  ;;  %vm7828_vm2 = vcmask 1042434  }
 0x3b5   :  { %v2173_v8 = vsel %vm6783_vm11, %v2161_v5, %v2172_v48  ;;  %v1966_v9 = vsel %vm1964_vm0, %v1953_v25, %v1965_v33  ;;  %vm7824_vm0 = vsmask.f32 256  ;;  %vm2208_vm5 = vmor %vm6702_vm13, %vm6825_vm12  ;;  %vm7777_vm6 = vsmask.f32 7950  ;;  %v5685_v33 = vld [vmem:[%s7743_s7 + $0x80] sm:$0xff]  }
 0x3b6   :  { %2174 = vst [vmem:[#allocation3] sm:$0x7] %v2173_v8  ;;  %1967 = vst [vmem:[#allocation3 + $0x4] sm:$0xf] %v1966_v9  ;;  %vm7833_vm12 = vsmask.f32 2304 }
 0x3b7   :  { %vm6835_vm4 = vmand %vm7775_vm7, %vm7824_vm0  ;;  %vm7831_vm0 = vcmask 130048   ;;  %vm7832_vm7 = vcmask 392192   ;;  %v5719_v8 = vld [vmem:[%s7743_s7 + $0x1c8] sm:$0xff]  }
 0x3b8   :  { %v2187_v18 = vpop.permute.xlu1 %2186  ;;  %vm7827_vm14 = vmmov %vm7814_vm8  ;;  %v1973_v11 = vsel %vm7831_vm0, %v1971_v19, %v1970_v13  ;;  %v5737_v13 = vld [vmem:[%s7743_s7 + $0x3c0] sm:$0xff]  }
 0x3b9   :  { %v2188_v12 = vrot.slane %v2187_v18, 7  ;;  %vm6845_vm8 = vmand %vm7828_vm2, %vm7827_vm14  ;;  %5274 = vmatprep.subr.bf16.mxu1 %v5737_v13  ;;  %v5758_v13 = vld [vmem:[%s7743_s7 + $0x3a8] sm:$0xff]  }
 0x3ba   :  { %v2014_v24 = vpop.permute.xlu0 %2013  ;;  %vm2021_vm1 = vmor %vm6605_vm15, %vm6835_vm4 }
 0x3bb   :  { %v2189_v46 = vsel %vm7832_vm7, %v2188_v12, %v2187_v18  ;;  %vm2023_vm11 = vmand %vm7778_vm3, %vm7833_vm12  ;;  %vm7836_vm7 = vcmask 125955   ;;  %v2015_v28 = vrot.slane %v2014_v24, 7  ;;  %vm7841_vm12 = vcmask 916480   ;;  %v5738_v12 = vld [vmem:[%s7743_s7 + $0x380] sm:$0xff]  }
 0x3bc   :  { %v2203_v47 = vpop.permute.xlu1 %2202  ;;  %vm6863_vm14 = vmor %vm6845_vm8, %vm2208_vm5  ;;  %5275 = vmatpush3.bf16.msra.mxu1 %v5738_v12  ;;  %v5688_v12 = vld [vmem:[%s7743_s7 + $0xd0] sm:$0xff]  }
 0x3bd   :  { %v1981_v27 = vld [vmem:[#allocation3 + $0x7] sm:$0x7]  ;;  %v2195_v36 = vld [vmem:[#allocation3 + $0x2] sm:$0x7]  ;;  %vm6869_vm2 = vmand %vm7836_vm7, %vm7777_vm6  ;;  %v2204_v49 = vrot.slane %v2203_v47, 7  ;;  %vm7847_vm6 = vcmask 1040512  }
 0x3be   :  { %v1982_v61 = vsel %vm6819_vm9, %v1973_v11, %v1981_v27  ;;  %v2196_v29 = vsel %vm6829_vm10, %v2189_v46, %v2195_v36  ;;  %v2222_v32 = vpop.permute.xlu0 %2221  ;;  %vm2042_vm9 = vcmask 1041280   ;;  %vm6878_vm5 = vmor %vm2023_vm11, %vm2021_vm1  ;;  %vm7843_vm11 = vsmask.f32 256 }
 0x3bf   :  { %1983 = vst [vmem:[#allocation3 + $0x7] sm:$0x7] %v1982_v61  ;;  %2197 = vst [vmem:[#allocation3 + $0x2] sm:$0x7] %v2196_v29  ;;  %vm7846_vm1 = vsmask.f32 7938 }
 0x3c0   :  { %v5506_v30 = vpop.permute.xlu1 %5505  ;;  %vm2213_vm0 = vmor %vm6869_vm2, %vm6863_vm14  ;;  %vm7857_vm2 = vsmask.f32 3328  ;;  %v2223_v9 = vrot.slane %v2222_v32, 7  ;;  %v5692_v61 = vld [vmem:[%s7743_s7 + $0xe0] sm:$0xff]  }
 0x3c1   :  { %v5508_v42 = vunpack.i.h.bf16 %v5506_v30  ;;  %v5507_v43 = vunpack.i.l.bf16 %v5506_v30  ;;  %vm7842_vm7 = vmmov %vm7841_vm12 }
 0x3c2   :  { %v1826_v51 = vpop.permute.xlu0 %1825  ;;  %vm6891_vm4 = vmand %vm2042_vm9, %vm7843_vm11 }
 0x3c3   :  { %v1842_v38 = vsel %vm7841_vm12, %v5507_v43, %v5508_v42  ;;  %v1843_v14 = vsel %vm7842_vm7, %v5508_v42, %v1826_v51  ;;  %v1878_v17 = vmax.f32 %v6587_v23, %v1826_v51  ;;  %vm6897_vm3 = vmand %vm7847_vm6, %vm7846_vm1  ;;  %vm7850_vm12 = vcmask 523264   ;;  %v5745_v42 = vld [vmem:[%s7743_s7 + $0x3d0] sm:$0xff]  }
 0x3c4   :  { %v1876_v37 = vmax.f32 %v6561_v62, %v1842_v38  ;;  %v1877_v58 = vmax.f32 %v6566_v0, %v1843_v14  ;;  %v2017_v40 = vsel %vm7850_vm12, %v2015_v28, %v2014_v24  ;;  %vm7851_vm7 = vcmask 785408   ;;  %vm2044_vm6 = vmor %vm6605_vm15, %vm6891_vm4  ;;  %v2037_v48 = vpop.permute.xlu1 %2036  ;;  %v5746_v51 = vld [vmem:[%s7743_s7 + $0x390] sm:$0xff]  }
 0x3c5   :  { %v2235_v56 = vpack.c.bf16 %v1878_v17, %v1878_v17  ;;  %v2205_v3 = vsel %vm7851_vm7, %v2204_v49, %v2203_v47  ;;  %vm2227_vm11 = vmor %vm6702_vm13, %vm6897_vm3  ;;  %vm2046_vm1 = vcmask 257027   ;;  %vm7852_vm4 = vsmask.f32 7946  ;;  %v5749_v17 = vld [vmem:[%s7743_s7 + $0x3d8] sm:$0xff]  }
 0x3c6   :  { %v2025_v23 = vld [vmem:[#allocation3 + $0x9] sm:$0x7]  ;;  %v2214_v41 = vld [vmem:[#allocation3 + $0x4] sm:$0xf]  ;;  %v4920_v2 = vpack.c.bf16 %v1877_v58, %v1876_v37  ;;  %vm7853_vm12 = vcmask 518146   ;;  %vm6932_vm3 = vmand %vm2046_vm1, %vm7857_vm2  ;;  %v2038_v7 = vrot.slane %v2037_v48, 7  ;;  %v2054_v22 = vpop.permute.xlu0 %2053 }
 0x3c7   :  { %v2026_v4 = vsel %vm6878_vm5, %v2017_v40, %v2025_v23  ;;  %v2215_v62 = vsel %vm2213_vm0, %v2205_v3, %v2214_v41  ;;  %v2253_v0 = vrot.slane %v2235_v56, %v6593_v10  ;;  %vm2228_vm7 = vmand %vm7853_vm12, %vm7852_vm4  ;;  %vm7854_vm5 = vnez %v7796_v55  ;;  %v5750_v41 = vld [vmem:[%s7743_s7 + $0x398] sm:$0xff]   ;;  %v5687_v55 = vld [vmem:[%s7743_s7 + $0x88] sm:$0xff]  }
 0x3c8   :  { %2027 = vst [vmem:[#allocation3 + $0x9] sm:$0x7] %v2026_v4  ;;  %2216 = vst [vmem:[#allocation3 + $0x4] sm:$0xf] %v2215_v62  ;;  %v2246_v5 = vrot.slane %v4920_v2, %v6593_v10  ;;  %vm7863_vm4 = vcmask 916480   ;;  %v2055_v43 = vrot.slane %v2054_v22, 7  ;;  %v5514_v2 = vpack.i.bf16 %v6558_v59, %v6553_v57 }
 0x3c9   :  { %vm6926_vm14 = vmor %vm7854_vm5, %vm2044_vm6  ;;  %v2040_v46 = vsel %vm7863_vm4, %v2038_v7, %v2037_v48  ;;  %vm7864_vm12 = vsmask.f32 256  ;;  %v5753_v62 = vld [vmem:[%s7743_s7 + $0x3e0] sm:$0xff]   ;;  %v5757_v7 = vld [vmem:[%s7743_s7 + $0x3e8] sm:$0xff]  }
 0x3ca   :  { %v2254_v25 = vcombine.low %v2246_v5, %v2253_v0  ;;  %vm6939_vm0 = vmor %vm2228_vm7, %vm2227_vm11  ;;  %v2277_v18 = vcombine.high %v2246_v5, %v2253_v0  ;;  %vm7862_vm11 = vcmask 130048   ;;  %vm7865_vm7 = vcmask 1040640   ;;  %v6979_v28 = vpop.permute.xlu0 %5510  ;;  %v5754_v0 = vld [vmem:[%s7743_s7 + $0x3a0] sm:$0xff]   ;;  %v5707_v40 = vld [vmem:[%s7743_s7 + $0x158] sm:$0xff]  }
 0x3cb   :  { %vm2048_vm6 = vmor %vm6932_vm3, %vm6926_vm14  ;;  %v2224_v11 = vsel %vm7862_vm11, %v2223_v9, %v2222_v32  ;;  %v5741_v32 = vld [vmem:[%s7743_s7 + $0x3c8] sm:$0xff]   ;;  %vm7868_vm3 = vsmask.f32 2304  ;;  %vm2056_vm11 = vcmask 261120  }
 0x3cc   :  { %v2261_v19 = vrot.slane %v2254_v25, %v6593_v10  ;;  %vm6955_vm2 = vmand %vm7865_vm7, %vm7864_vm12  ;;  %v2284_v30 = vrot.slane %v2277_v18, %v6593_v10  ;;  %5276 = vmatprep.subr.bf16.mxu1 %v5741_v32  ;;  %vm2075_vm12 = vcmask 1041024   ;;  %v2057_v39 = vsel %vm2056_vm11, %v2055_v43, %v2054_v22  ;;  %v5761_v22 = vld [vmem:[%s7743_s7 + $0x3f0] sm:$0xff]  }
 0x3cd   :  { %vm2061_vm14 = vmor %vm6605_vm15, %vm6955_vm2  ;;  %5277 = vmatpush3.bf16.msra.mxu1 %v5742_v34  ;;  %vm7872_vm7 = vsmask.f32 256  ;;  %v5697_v34 = vld [vmem:[%s7743_s7 + $0xb0] sm:$0xff]  }
 0x3ce   :  { %v2263_v24 = vshll.u32 %v2261_v19, 16  ;;  %v2301_v47 = vcombine.high %v2261_v19, %v2261_v19  ;;  %v2317_v49 = vcombine.high %v2284_v30, %v2284_v30  ;;  %5278 = vmatprep.subr.bf16.mxu1 %v5745_v42  ;;  %v2286_v14 = vshll.u32 %v2284_v30, 16  ;;  %vm7003_vm2 = vmand %vm2075_vm12, %vm7872_vm7  ;;  %v2070_v3 = vpop.permute.xlu0 %2069  ;;  %v5696_v30 = vld [vmem:[%s7743_s7 + $0xf0] sm:$0xff]   ;;  %v5698_v42 = vld [vmem:[%s7743_s7 + $0xf8] sm:$0xff]  }
 0x3cf   :  { %v2230_v27 = vld [vmem:[#allocation3 + $0x7] sm:$0x7]  ;;  %v2049_v36 = vld [vmem:[#allocation3 + $0xb] sm:$0xf]  ;;  %v2071_v5 = vrot.slane %v2070_v3, 7 }
 0x3d0   :  { %v2231_v29 = vsel %vm6939_vm0, %v2224_v11, %v2230_v27  ;;  %v2050_v31 = vsel %vm2048_vm6, %v2040_v46, %v2049_v36  ;;  %2265 = vrot.lane.b32.xlu1 %v2263_v24, %s5892_s30  ;;  %v2303_v60 = vshll.u32 %v2301_v47, 16  ;;  %vm7869_vm0 = vcmask 649218   ;;  %v5762_v24 = vld [vmem:[%s7743_s7 + $0x3b0] sm:$0xff]   ;;  %v5690_v11 = vld [vmem:[%s7743_s7 + $0xd8] sm:$0xff]  }
 0x3d1   :  { %2232 = vst [vmem:[#allocation3 + $0x7] sm:$0x7] %v2231_v29  ;;  %2051 = vst [vmem:[#allocation3 + $0xb] sm:$0xf] %v2050_v31  ;;  %5279 = vmatpush3.bf16.msra.mxu1 %v5746_v51  ;;  %v2319_v37 = vshll.u32 %v2317_v49, 16  ;;  %v5689_v47 = vld [vmem:[%s7743_s7 + $0x90] sm:$0xff]  }
 0x3d2   :  { %2305 = vrot.lane.b32.xlu0 %v2303_v60, %s5893_s23  ;;  %vm2063_vm6 = vmand %vm7869_vm0, %vm7868_vm3  ;;  %5280 = vmatprep.subr.bf16.mxu1 %v5749_v17  ;;  %vm2072_vm3 = vcmask 654336   ;;  %v5766_v27 = vld [vmem:[%s7743_s7 + $0x3f8] sm:$0xff]   ;;  %v5693_v29 = vld [vmem:[%s7743_s7 + $0xa0] sm:$0xff]   ;;  %vm7878_vm0 = vcmask 1040896   ;;  %vm7881_vm7 = vsmask.f32 7946 }
 0x3d3   :  { %vm6986_vm4 = vmor %vm2063_vm6, %vm2061_vm14  ;;  %v2073_v18 = vsel %vm2072_vm3, %v2071_v5, %v2070_v3  ;;  %v5767_v36 = vld [vmem:[%s7743_s7 + $0x3b8] sm:$0xff]   ;;  %v5694_v31 = vld [vmem:[%s7743_s7 + $0xe8] sm:$0xff]  }
 0x3d4   :  { %1813 = vrot.lane.b32.xlu1 %v6580_v52, %s5887_s4  ;;  %vm2077_vm14 = vmor %vm6605_vm15, %vm7003_vm2  ;;  %v5691_v46 = vld [vmem:[%s7743_s7 + $0x98] sm:$0xff]   ;;  %v5695_v60 = vld [vmem:[%s7743_s7 + $0xa8] sm:$0xff]   ;;  %vm7882_vm2 = vcmask 911362  }
 0x3d5   :  { %5281 = vmatpush3.bf16.msra.mxu1 %v5750_v41  ;;  %vm7036_vm15 = vmor %vm7854_vm5, %vm2077_vm14  ;;  %v5699_v49 = vld [vmem:[%s7743_s7 + $0xb8] sm:$0xff]   ;;  %v5700_v51 = vld [vmem:[%s7743_s7 + $0x140] sm:$0xff]   ;;  %vm7877_vm5 = vsmask.f32 7938 }
 0x3d6   :  { %1831 = vrot.lane.b32.xlu0 %v6584_v63, %s5887_s4  ;;  %5282 = vmatprep.subr.bf16.mxu1 %v5753_v62  ;;  %v5709_v41 = vld [vmem:[%s7743_s7 + $0x160] sm:$0xff]   ;;  %v5713_v62 = vld [vmem:[%s7743_s7 + $0x170] sm:$0xff]   ;;  %v5715_v5 = vld [vmem:[%s7743_s7 + $0x178] sm:$0xff]  }
 0x3d7   :  { %v5710_v3 = vld [vmem:[%s7743_s7 + $0x120] sm:$0xff]   ;;  %vm7206_vm6 = vmand %vm7878_vm0, %vm7877_vm5 }
 0x3d8   :  { %v2065_v54 = vld [vmem:[#allocation3 + $0xe] sm:$0x7]  ;;  %2288 = vrot.lane.b32.xlu1 %v2286_v14, %s5887_s4  ;;  %v6997_v58 = vld [vmem:[#allocation3] sm:$0xff]  ;;  %vm2272_vm14 = vmand %vm7882_vm2, %vm7881_vm7  ;;  %vm7887_vm7 = vcmask 523264  }
 0x3d9   :  { %v2066_v56 = vsel %vm6986_vm4, %v2057_v39, %v2065_v54  ;;  %v2780_v23 = vrot.slane %v6997_v58, %v6593_v10  ;;  %5283 = vmatpush3.bf16.msra.mxu1 %v5754_v0  ;;  %v2773_v32 = vcombine.high %v6997_v58, %v6997_v58  ;;  %v5701_v14 = vld [vmem:[%s7743_s7 + $0x100] sm:$0xff]   ;;  %v5703_v54 = vld [vmem:[%s7743_s7 + $0x148] sm:$0xff]   ;;  %v5705_v58 = vld [vmem:[%s7743_s7 + $0x150] sm:$0xff]  }
 0x3da   :  { %2067 = vst [vmem:[#allocation3 + $0xe] sm:$0x7] %v2066_v56  ;;  %2321 = vrot.lane.b32.xlu0 %v2319_v37, %s5894_s0  ;;  %5284 = vmatprep.subr.bf16.mxu1 %v5757_v7  ;;  %v5704_v37 = vld [vmem:[%s7743_s7 + $0x108] sm:$0xff]   ;;  %v5706_v56 = vld [vmem:[%s7743_s7 + $0x110] sm:$0xff]   ;;  %vm2271_vm4 = vmor %vm6702_vm13, %vm7206_vm6  ;;  %vm7886_vm6 = vcmask 916480  }
 0x3db   :  { %v2788_v4 = vcombine.high %v2780_v23, %v2780_v23  ;;  %v2796_v25 = vrot.slane %v2780_v23, %v6593_v10  ;;  %v2787_v43 = vrot.slane %v2773_v32, %v6593_v10  ;;  %v5708_v23 = vld [vmem:[%s7743_s7 + $0x118] sm:$0xff]   ;;  %v5714_v0 = vld [vmem:[%s7743_s7 + $0x130] sm:$0xff]   ;;  %v5720_v7 = vld [vmem:[%s7743_s7 + $0x188] sm:$0xff]   ;;  %v5512_v32 = vunpack.i.l.bf16 %v6979_v28 }
 0x3dc   :  { %5515 = vrot.lane.b32.xlu1 %v5514_v2, %s5887_s4  ;;  %v5711_v2 = vld [vmem:[%s7743_s7 + $0x168] sm:$0xff]   ;;  %vm2273_vm0 = vmor %vm2272_vm14, %vm2271_vm4  ;;  %vm7891_vm14 = vsmask.f32 7950 }
 0x3dd   :  { %v2810_v48 = vrot.slane %v2788_v4, %v6593_v10  ;;  %5285 = vmatpush3.bf16.msra.mxu1 %v5758_v13  ;;  %v2789_v38 = vcombine.high %v2787_v43, %v2787_v43  ;;  %v2818_v17 = vcombine.high %v2796_v25, %v2796_v25  ;;  %v5712_v4 = vld [vmem:[%s7743_s7 + $0x128] sm:$0xff]   ;;  %v5721_v13 = vld [vmem:[%s7743_s7 + $0x1d0] sm:$0xff]   ;;  %vm7888_vm4 = vmmov %vm7886_vm6 }
 0x3de   :  { %5286 = vmatprep.subr.bf16.mxu1 %v5761_v22  ;;  %v5727_v22 = vld [vmem:[%s7743_s7 + $0x1e8] sm:$0xff]  }
 0x3df   :  { %4119 = vmatprep.mubr.bf16.mxu0 %v2810_v48  ;;  %v2820_v9 = vcombine.high %v2810_v48, %v2810_v48  ;;  %v2817_v39 = vrot.slane %v2789_v38, %v6593_v10  ;;  %v5716_v48 = vld [vmem:[%s7743_s7 + $0x138] sm:$0xff]  }
 0x3e0   :  { %4120 = vmatmul.mubr.bf16.vlgmr.msra.gmra.mrb[12].mxu0 %v2796_v25  ;;  %v5718_v25 = vld [vmem:[%s7743_s7 + $0x180] sm:$0xff]  }
 0x3e1   :  { %v2079_v15 = vld [vmem:[#allocation3 + $0x10] sm:$0x7]  ;;  %5143 = vmatpush3.bf16.msra.mxu0 %v5685_v33  ;;  %4159 = vmatprep.mubr.bf16.mxu0 %v2820_v9  ;;  %v2821_v9 = vcombine.high %v2817_v39, %v2817_v39 }
 0x3e2   :  { %v2080_v19 = vsel %vm7036_vm15, %v2073_v18, %v2079_v15  ;;  %5144 = vmatprep.subr.bf16.mxu0 %v5686_v20  ;;  %5287 = vmatpush3.bf16.msra.mxu1 %v5762_v24  ;;  %v5717_v33 = vld [vmem:[%s7743_s7 + $0x1c0] sm:$0xff]   ;;  %v2803_v20 = vrot.slane %v2787_v43, %v6593_v10  ;;  %v5722_v15 = vld [vmem:[%s7743_s7 + $0x190] sm:$0xff]   ;;  %v5723_v18 = vld [vmem:[%s7743_s7 + $0x1d8] sm:$0xff]  }
 0x3e3   :  { %2081 = vst [vmem:[#allocation3 + $0x10] sm:$0x7] %v2080_v19  ;;  %5288 = vmatprep.subr.bf16.mxu1 %v5766_v27  ;;  %v5725_v19 = vld [vmem:[%s7743_s7 + $0x1e0] sm:$0xff]   ;;  %v5728_v24 = vld [vmem:[%s7743_s7 + $0x1a8] sm:$0xff]   ;;  %v5731_v27 = vld [vmem:[%s7743_s7 + $0x1f8] sm:$0xff]  }
 0x3e4   :  { %vm7883_vm15 = vmmov %vm7877_vm5 }
 0x3e5   :  { %5145 = vmatpush3.bf16.msra.mxu0 %v5687_v55  ;;  %v5724_v55 = vld [vmem:[%s7743_s7 + $0x198] sm:$0xff]   ;;  %vm7229_vm5 = vmand %vm2042_vm9, %vm7883_vm15 }
 0x3e6   :  { %5146 = vmatprep.subr.bf16.mxu0 %v5688_v12  ;;  %5289 = vmatpush3.bf16.msra.mxu1 %v5767_v36  ;;  %v5726_v12 = vld [vmem:[%s7743_s7 + $0x1a0] sm:$0xff]   ;;  %v5732_v36 = vld [vmem:[%s7743_s7 + $0x1b8] sm:$0xff]   ;;  %vm2294_vm9 = vmor %vm6702_vm13, %vm7229_vm5 }
 0x3e7   :  { %vm7256_vm2 = vmor %vm6845_vm8, %vm2294_vm9  ;;  %vm7898_vm9 = vnez %v7788_v44  ;;  %v5760_v44 = vld [vmem:[%s7743_s7 + $0x238] sm:$0xff]  }
 0x3e8   :  { %vm7262_vm15 = vmand %vm2046_vm1, %vm7891_vm14 }
 0x3e9   :  { %5147 = vmatpush3.bf16.msra.mxu0 %v5689_v47  ;;  %v5729_v47 = vld [vmem:[%s7743_s7 + $0x1f0] sm:$0xff]   ;;  %vm2297_vm1 = vmor %vm7262_vm15, %vm7256_vm2 }
 0x3ea   :  { %5148 = vmatprep.subr.bf16.mxu0 %v5690_v11  ;;  %v5730_v11 = vld [vmem:[%s7743_s7 + $0x1b0] sm:$0xff]   ;;  %vm7894_vm5 = vmmov %vm7888_vm4 }
 0x3ed   :  { %5149 = vmatpush3.bf16.msra.mxu0 %v5691_v46  ;;  %v5733_v46 = vld [vmem:[%s7743_s7 + $0x240] sm:$0xff]  }
 0x3ee   :  { %5150 = vmatprep.subr.bf16.mxu0 %v5692_v61 }
 0x3f1   :  { %5151 = vmatpush3.bf16.msra.mxu0 %v5693_v29  ;;  %v5734_v29 = vld [vmem:[%s7743_s7 + $0x200] sm:$0xff]  }
 0x3f2   :  { %5152 = vmatprep.subr.bf16.mxu0 %v5694_v31  ;;  %v2819_v31 = vcombine.high %v2803_v20, %v2803_v20 }
 0x3f5   :  { %5153 = vmatpush3.bf16.msra.mxu0 %v5695_v60  ;;  %v5735_v60 = vld [vmem:[%s7743_s7 + $0x248] sm:$0xff]  }
 0x3f6   :  { %5154 = vmatprep.subr.bf16.mxu0 %v5696_v30  ;;  %v5513_v30 = vunpack.i.h.bf16 %v6979_v28 }
 0x3f8   :  { %v1838_v38 = vsel %vm7886_vm6, %v5512_v32, %v5513_v30 }
 0x3f9   :  { %5155 = vmatpush3.bf16.msra.mxu0 %v5697_v34  ;;  %v5736_v34 = vld [vmem:[%s7743_s7 + $0x208] sm:$0xff]  }
 0x3fa   :  { %5156 = vmatprep.subr.bf16.mxu0 %v5698_v42 }
 0x3fd   :  { %5157 = vmatpush3.bf16.msra.mxu0 %v5699_v49  ;;  %v5739_v49 = vld [vmem:[%s7743_s7 + $0x250] sm:$0xff]  }
 0x3fe   :  { %5164 = vmatprep.subr.bf16.mxu0 %v5700_v51 }
 0x400   :  { %4160 = vmatmul.mubr.bf16.vlgmr.msra.gmra.mrb[16].mxu0 %v2818_v17 }
 0x401   :  { %5165 = vmatpush3.bf16.msra.mxu0 %v5701_v14  ;;  %4199 = vmatprep.mubr.bf16.mxu0 %v2817_v39  ;;  %v2274_v14 = vld [vmem:[#allocation3 + $0x9] sm:$0x7] }
 0x402   :  { %5166 = vmatprep.subr.bf16.mxu0 %v5703_v54  ;;  %v5740_v54 = vld [vmem:[%s7743_s7 + $0x210] sm:$0xff]  }
 0x405   :  { %5167 = vmatpush3.bf16.msra.mxu0 %v5704_v37 }
 0x406   :  { %5168 = vmatprep.subr.bf16.mxu0 %v5705_v58  ;;  %v5743_v58 = vld [vmem:[%s7743_s7 + $0x258] sm:$0xff]  }
 0x409   :  { %5169 = vmatpush3.bf16.msra.mxu0 %v5706_v56 }
 0x40a   :  { %5170 = vmatprep.subr.bf16.mxu0 %v5707_v40 }
 0x40d   :  { %5171 = vmatpush3.bf16.msra.mxu0 %v5708_v23  ;;  %v1870_v23 = vmax.f32 %v6543_v45, %v1838_v38  ;;  %v5744_v45 = vld [vmem:[%s7743_s7 + $0x218] sm:$0xff]  }
 0x40e   :  { %5172 = vmatprep.subr.bf16.mxu0 %v5709_v41 }
 0x411   :  { %5173 = vmatpush3.bf16.msra.mxu0 %v5710_v3 }
 0x412   :  { %5174 = vmatprep.subr.bf16.mxu0 %v5711_v2 }
 0x415   :  { %5175 = vmatpush3.bf16.msra.mxu0 %v5712_v4 }
 0x416   :  { %5176 = vmatprep.subr.bf16.mxu0 %v5713_v62 }
 0x419   :  { %5177 = vmatpush3.bf16.msra.mxu0 %v5714_v0  ;;  %v5747_v0 = vld [vmem:[%s7743_s7 + $0x260] sm:$0xff]  }
 0x41a   :  { %5178 = vmatprep.subr.bf16.mxu0 %v5715_v5  ;;  %v5800_v5 = vld [vmem:[%s7743_s7 + $0x4c0] sm:$0xff]  }
 0x41b   :  { %5318 = vmatprep.subr.bf16.mxu1 %v5800_v5 }
 0x41d   :  { %5179 = vmatpush3.bf16.msra.mxu0 %v5716_v48 }
 0x41e   :  { %5186 = vmatprep.subr.bf16.mxu0 %v5717_v33 }
 0x420   :  { %4200 = vmatmul.mubr.bf16.vlgmr.msra.gmra.mrb[20].mxu0 %v2803_v20 }
 0x421   :  { %5187 = vmatpush3.bf16.msra.mxu0 %v5718_v25  ;;  %4239 = vmatprep.mubr.bf16.mxu0 %v2821_v9  ;;  %v5748_v9 = vld [vmem:[%s7743_s7 + $0x220] sm:$0xff]  }
 0x422   :  { %5188 = vmatprep.subr.bf16.mxu0 %v5719_v8 }
 0x425   :  { %5189 = vmatpush3.bf16.msra.mxu0 %v5720_v7 }
 0x426   :  { %5190 = vmatprep.subr.bf16.mxu0 %v5721_v13 }
 0x429   :  { %5191 = vmatpush3.bf16.msra.mxu0 %v5722_v15 }
 0x42a   :  { %5192 = vmatprep.subr.bf16.mxu0 %v5723_v18 }
 0x42d   :  { %5193 = vmatpush3.bf16.msra.mxu0 %v5724_v55  ;;  %v5751_v55 = vld [vmem:[%s7743_s7 + $0x268] sm:$0xff]  }
 0x42e   :  { %5194 = vmatprep.subr.bf16.mxu0 %v5725_v19  ;;  %v2112_v19 = vld [vmem:[#allocation3 + $0x13] sm:$0x7] }
 0x431   :  { %5195 = vmatpush3.bf16.msra.mxu0 %v5726_v12 }
 0x432   :  { %5196 = vmatprep.subr.bf16.mxu0 %v5727_v22 }
 0x435   :  { %5197 = vmatpush3.bf16.msra.mxu0 %v5728_v24 }
 0x436   :  { %5198 = vmatprep.subr.bf16.mxu0 %v5729_v47 }
 0x439   :  { %5199 = vmatpush3.bf16.msra.mxu0 %v5730_v11 }
 0x43a   :  { %5200 = vmatprep.subr.bf16.mxu0 %v5731_v27 }
 0x43d   :  { %5201 = vmatpush3.bf16.msra.mxu0 %v5732_v36 }
 0x43e   :  { %5208 = vmatprep.subr.bf16.mxu0 %v5733_v46  ;;  %v5752_v46 = vld [vmem:[%s7743_s7 + $0x228] sm:$0xff]  }
 0x440   :  { %4240 = vmatmul.mubr.bf16.vlgmr.msra.gmra.mrb[24].mxu0 %v2819_v31 }
 0x441   :  { %5209 = vmatpush3.bf16.msra.mxu0 %v5734_v29 }
 0x442   :  { %v2266_v42 = vpop.permute.xlu1 %2265  ;;  %5210 = vmatprep.subr.bf16.mxu0 %v5735_v60  ;;  %v5755_v60 = vld [vmem:[%s7743_s7 + $0x270] sm:$0xff]  }
 0x443   :  { %v2267_v51 = vrot.slane %v2266_v42, 7 }
 0x444   :  { %v7236_v28 = vpop.permute.xlu0 %2305 }
 0x445   :  { %v2268_v17 = vsel %vm7887_vm7, %v2267_v51, %v2266_v42  ;;  %5211 = vmatpush3.bf16.msra.mxu0 %v5736_v34  ;;  %vm7897_vm7 = vnez %v7784_v21  ;;  %v5756_v21 = vld [vmem:[%s7743_s7 + $0x230] sm:$0xff]   ;;  %v5759_v34 = vld [vmem:[%s7743_s7 + $0x278] sm:$0xff]   ;;  %v5784_v51 = vld [vmem:[%s7743_s7 + $0x348] sm:$0xff]  }
 0x446   :  { %v2275_v39 = vsel %vm2273_vm0, %v2268_v17, %v2274_v14  ;;  %v1814_v37 = vpop.permute.xlu1 %1813  ;;  %5212 = vmatprep.subr.bf16.mxu0 %v5739_v49  ;;  %vm7895_vm0 = vmmov %vm7888_vm4 }
 0x447   :  { %2276 = vst [vmem:[#allocation3 + $0x9] sm:$0x7] %v2275_v39  ;;  %v1839_v56 = vsel %vm7888_vm4, %v5513_v30, %v1814_v37  ;;  %v1872_v40 = vmax.f32 %v6580_v52, %v1814_v37  ;;  %vm7896_vm6 = vmmov %vm7895_vm0  ;;  %v2307_v30 = vrot.slane %v7236_v28, 7  ;;  %vm7899_vm4 = vsmask.f32 7938 }
 0x448   :  { %v1871_v41 = vmax.f32 %v6546_v50, %v1839_v56  ;;  %v1832_v50 = vpop.permute.xlu0 %1831  ;;  %vm7323_vm2 = vmand %vm2075_vm12, %vm7899_vm4 }
 0x449   :  { %v2084_v2 = vpack.c.bf16 %v1872_v40, %v1872_v40  ;;  %5213 = vmatpush3.bf16.msra.mxu0 %v5740_v54  ;;  %v1881_v20 = vmax.f32 %v6584_v63, %v1832_v50  ;;  %v2308_v42 = vsel %vm2056_vm11, %v2307_v30, %v7236_v28  ;;  %v5764_v54 = vld [vmem:[%s7743_s7 + $0x2c0] sm:$0xff]   ;;  %vm2327_vm12 = vmor %vm6702_vm13, %vm7323_vm2  ;;  %v5824_v30 = vld [vmem:[%s7743_s7 + $0x4f0] sm:$0xff]   ;;  %vm7902_vm13 = vcmask 392192  }
 0x44a   :  { %v4918_v52 = vpack.c.bf16 %v1871_v41, %v1870_v23  ;;  %v2289_v62 = vpop.permute.xlu1 %2288  ;;  %5214 = vmatprep.subr.bf16.mxu0 %v5743_v58  ;;  %vm2328_vm14 = vmor %vm6845_vm8, %vm2327_vm12  ;;  %vm7903_vm8 = vnez %v7794_v53 }
 0x44b   :  { %v2102_v48 = vrot.slane %v2084_v2, %v6593_v10  ;;  %v2290_v33 = vrot.slane %v2289_v62, 7  ;;  %v2334_v11 = vpack.c.bf16 %v1881_v20, %v1881_v20  ;;  %vm7905_vm15 = vmmov %vm7902_vm13 }
 0x44c   :  { %v2095_v25 = vrot.slane %v4918_v52, %v6593_v10  ;;  %v2322_v17 = vpop.permute.xlu0 %2321 }
 0x44d   :  { %v2291_v8 = vsel %vm7894_vm5, %v2290_v33, %v2289_v62  ;;  %5215 = vmatpush3.bf16.msra.mxu0 %v5744_v45  ;;  %v2323_v39 = vrot.slane %v2322_v17, 7  ;;  %v5769_v33 = vld [vmem:[%s7743_s7 + $0x288] sm:$0xff]   ;;  %vm4763_vm5 = vcmask 74752  }
 0x44e   :  { %v2103_v7 = vcombine.low %v2095_v25, %v2102_v48  ;;  %v2298_v13 = vld [vmem:[#allocation3 + $0xb] sm:$0xf]  ;;  %v5516_v15 = vpop.permute.xlu1 %5515  ;;  %v2115_v18 = vcombine.high %v2095_v25, %v2102_v48  ;;  %5216 = vmatprep.subr.bf16.mxu0 %v5747_v0  ;;  %v5801_v25 = vld [vmem:[%s7743_s7 + $0x480] sm:$0xff]  }
 0x44f   :  { %v2299_v12 = vsel %vm2297_vm1, %v2291_v8, %v2298_v13  ;;  %v5518_v22 = vunpack.i.h.bf16 %v5516_v15  ;;  %v5517_v63 = vunpack.i.l.bf16 %v5516_v15  ;;  %v2324_v56 = vsel %vm2072_vm3, %v2323_v39, %v2322_v17  ;;  %v5770_v8 = vld [vmem:[%s7743_s7 + $0x2d0] sm:$0xff]   ;;  %v5805_v13 = vld [vmem:[%s7743_s7 + $0x488] sm:$0xff]   ;;  %v5772_v15 = vld [vmem:[%s7743_s7 + $0x2d8] sm:$0xff]  }
 0x450   :  { %v2110_v24 = vrot.slane %v2103_v7, %v6593_v10  ;;  %2300 = vst [vmem:[#allocation3 + $0xb] sm:$0xf] %v2299_v12  ;;  %v2122_v47 = vrot.slane %v2115_v18, %v6593_v10  ;;  %v5771_v7 = vld [vmem:[%s7743_s7 + $0x290] sm:$0xff]   ;;  %v5774_v12 = vld [vmem:[%s7743_s7 + $0x2e0] sm:$0xff]   ;;  %v5785_v17 = vld [vmem:[%s7743_s7 + $0x308] sm:$0xff]   ;;  %vm7904_vm3 = vnez %v7805_v1  ;;  %vm5896_vm1 = vmmov 0  }
 0x451   :  { %v1844_v27 = vsel %vm7895_vm0, %v5517_v63, %v5518_v22  ;;  %v1845_v36 = vsel %vm7896_vm6, %v5518_v22, %v1832_v50  ;;  %5217 = vmatpush3.bf16.msra.mxu0 %v5748_v9  ;;  %v5768_v50 = vld [vmem:[%s7743_s7 + $0x2c8] sm:$0xff]   ;;  %v5808_v18 = vld [vmem:[%s7743_s7 + $0x4d0] sm:$0xff]   ;;  %v5812_v22 = vld [vmem:[%s7743_s7 + $0x4d8] sm:$0xff]  }
 0x452   :  { %v2113_v61 = vsel %vm7897_vm7, %v2110_v24, %v2112_v19  ;;  %v1879_v29 = vmax.f32 %v6553_v57, %v1844_v27  ;;  %v1880_v31 = vmax.f32 %v6558_v59, %v1845_v36  ;;  %2123 = vrot.lane.b32.xlu1 %v2122_v47, %s5889_s5  ;;  %5218 = vmatprep.subr.bf16.mxu0 %v5751_v55  ;;  %v5804_v9 = vld [vmem:[%s7743_s7 + $0x4c8] sm:$0xff]   ;;  %v5773_v55 = vld [vmem:[%s7743_s7 + $0x298] sm:$0xff]   ;;  %v5809_v19 = vld [vmem:[%s7743_s7 + $0x490] sm:$0xff]  }
 0x453   :  { %2114 = vst [vmem:[#allocation3 + $0x13] sm:$0x7] %v2113_v61  ;;  %v7309_v57 = vrot.slane %v2334_v11, %v6593_v10  ;;  %v5775_v63 = vld [vmem:[%s7743_s7 + $0x2a0] sm:$0xff]   ;;  %v5813_v24 = vld [vmem:[%s7743_s7 + $0x498] sm:$0xff]   ;;  %v5776_v47 = vld [vmem:[%s7743_s7 + $0x2e8] sm:$0xff]  }
 0x454   :  { %v4921_v32 = vpack.c.bf16 %v1880_v31, %v1879_v29  ;;  %v5816_v11 = vld [vmem:[%s7743_s7 + $0x4e0] sm:$0xff]   ;;  %v5777_v27 = vld [vmem:[%s7743_s7 + $0x2a8] sm:$0xff]   ;;  %v5779_v29 = vld [vmem:[%s7743_s7 + $0x2b0] sm:$0xff]  }
 0x455   :  { %5219 = vmatpush3.bf16.msra.mxu0 %v5752_v46  ;;  %v5817_v36 = vld [vmem:[%s7743_s7 + $0x4a0] sm:$0xff]   ;;  %v5778_v46 = vld [vmem:[%s7743_s7 + $0x2f0] sm:$0xff]   ;;  %v5820_v61 = vld [vmem:[%s7743_s7 + $0x4e8] sm:$0xff]  }
 0x456   :  { %v7312_v59 = vrot.slane %v4921_v32, %v6593_v10  ;;  %5220 = vmatprep.subr.bf16.mxu0 %v5755_v60  ;;  %v5821_v31 = vld [vmem:[%s7743_s7 + $0x4a8] sm:$0xff]   ;;  %v5780_v60 = vld [vmem:[%s7743_s7 + $0x2f8] sm:$0xff]  }
 0x457   :  { %v2314_v43 = vld [vmem:[#allocation3 + $0xe] sm:$0x7] }
 0x458   :  { %v2315_v49 = vsel %vm7898_vm9, %v2308_v42, %v2314_v43  ;;  %v2353_v38 = vcombine.low %v7312_v59, %v7309_v57  ;;  %v2368_v14 = vcombine.high %v7312_v59, %v7309_v57  ;;  %v5781_v32 = vld [vmem:[%s7743_s7 + $0x2b8] sm:$0xff]   ;;  %v5783_v43 = vld [vmem:[%s7743_s7 + $0x300] sm:$0xff]  }
 0x459   :  { %2316 = vst [vmem:[#allocation3 + $0xe] sm:$0x7] %v2315_v49  ;;  %5221 = vmatpush3.bf16.msra.mxu0 %v5756_v21  ;;  %v5825_v21 = vld [vmem:[%s7743_s7 + $0x4b0] sm:$0xff]   ;;  %v5828_v42 = vld [vmem:[%s7743_s7 + $0x4f8] sm:$0xff]  }
 0x45a   :  { %v2375_v28 = vrot.slane %v2368_v14, %v6593_v10  ;;  %5222 = vmatprep.subr.bf16.mxu0 %v5759_v34  ;;  %v5782_v34 = vld [vmem:[%s7743_s7 + $0x340] sm:$0xff]   ;;  %v5829_v14 = vld [vmem:[%s7743_s7 + $0x4b8] sm:$0xff]  }
 0x45b   :  { %v5789_v39 = vld [vmem:[%s7743_s7 + $0x318] sm:$0xff]  }
 0x45c   :  { %v2377_v37 = vshll.u32 %v2375_v28, 16  ;;  %v5787_v28 = vld [vmem:[%s7743_s7 + $0x310] sm:$0xff]  }
 0x45d   :  { %5223 = vmatpush3.bf16.msra.mxu0 %v5760_v44  ;;  %v5786_v44 = vld [vmem:[%s7743_s7 + $0x350] sm:$0xff]  }
 0x45e   :  { %2379 = vrot.lane.b32.xlu1 %v2377_v37, %s5889_s5  ;;  %5230 = vmatprep.subr.bf16.mxu0 %v5764_v54  ;;  %v5788_v54 = vld [vmem:[%s7743_s7 + $0x358] sm:$0xff]   ;;  %v5790_v37 = vld [vmem:[%s7743_s7 + $0x360] sm:$0xff]  }
 0x460   :  { %v2329_v58 = vld [vmem:[#allocation3 + $0x10] sm:$0x7]  ;;  %v2388_v40 = vld [vmem:[#allocation3 + $0x8] sm:$0xff] }
 0x461   :  { %v2330_v23 = vsel %vm2328_vm14, %v2324_v56, %v2329_v58  ;;  %v2822_v41 = vcombine.high %v2388_v40, %v2388_v40  ;;  %v2829_v3 = vrot.slane %v2388_v40, %v6593_v10  ;;  %v5791_v58 = vld [vmem:[%s7743_s7 + $0x320] sm:$0xff]   ;;  %v5792_v56 = vld [vmem:[%s7743_s7 + $0x368] sm:$0xff]  }
 0x462   :  { %2331 = vst [vmem:[#allocation3 + $0x10] sm:$0x7] %v2330_v23  ;;  %v5793_v40 = vld [vmem:[%s7743_s7 + $0x328] sm:$0xff]   ;;  %v5794_v23 = vld [vmem:[%s7743_s7 + $0x370] sm:$0xff]  }
 0x463   :  { %v2837_v35 = vcombine.high %v2829_v3, %v2829_v3  ;;  %v2836_v2 = vrot.slane %v2822_v41, %v6593_v10  ;;  %v7353_v52 = vrot.slane %v2829_v3, %v6593_v10  ;;  %v5795_v41 = vld [vmem:[%s7743_s7 + $0x330] sm:$0xff]   ;;  %v5796_v3 = vld [vmem:[%s7743_s7 + $0x378] sm:$0xff]  }
 0x465   :  { %v2859_v4 = vrot.slane %v2837_v35, %v6593_v10  ;;  %v2838_v45 = vcombine.high %v2836_v2, %v2836_v2  ;;  %v7359_v62 = vrot.slane %v2836_v2, %v6593_v10  ;;  %v2867_v49 = vcombine.high %v7353_v52, %v7353_v52  ;;  %v5797_v35 = vld [vmem:[%s7743_s7 + $0x338] sm:$0xff]   ;;  %v5798_v2 = vld [vmem:[%s7743_s7 + $0x440] sm:$0xff]  }
 0x467   :  { %4279 = vmatprep.mubr.bf16.mxu0 %v2859_v4  ;;  %v2869_v0 = vcombine.high %v2859_v4, %v2859_v4  ;;  %v7362_v5 = vrot.slane %v2838_v45, %v6593_v10  ;;  %v2868_v20 = vcombine.high %v7359_v62, %v7359_v62  ;;  %v5799_v4 = vld [vmem:[%s7743_s7 + $0x400] sm:$0xff]   ;;  %v5803_v45 = vld [vmem:[%s7743_s7 + $0x408] sm:$0xff]  }
 0x468   :  { %4280 = vmatmul.mubr.bf16.vlgmr.msra.gmra.mrb[28].mxu0 %v7353_v52  ;;  %v5806_v52 = vld [vmem:[%s7743_s7 + $0x450] sm:$0xff]  }
 0x469   :  { %5231 = vmatpush3.bf16.msra.mxu0 %v5765_v26  ;;  %4319 = vmatprep.mubr.bf16.mxu0 %v2869_v0  ;;  %v2870_v48 = vcombine.high %v7362_v5, %v7362_v5  ;;  %v5802_v26 = vld [vmem:[%s7743_s7 + $0x448] sm:$0xff]   ;;  %v5811_v0 = vld [vmem:[%s7743_s7 + $0x418] sm:$0xff]  }
 0x46a   :  { %5232 = vmatprep.subr.bf16.mxu0 %v5768_v50  ;;  %v5807_v50 = vld [vmem:[%s7743_s7 + $0x410] sm:$0xff]  }
 0x46b   :  { %4399 = vmatprep.mubr.bf16.mxu1 %v2870_v48 }
 0x46c   :  { %4400 = vmatmul.mubr.bf16.vlgmr.msra.gmra.mrb[36].mxu1 %v2868_v20 }
 0x46d   :  { %5233 = vmatpush3.bf16.msra.mxu0 %v5769_v33  ;;  %5319 = vmatpush3.bf16.msra.mxu1 %v5801_v25 }
 0x46e   :  { %5234 = vmatprep.subr.bf16.mxu0 %v5770_v8  ;;  %5320 = vmatprep.subr.bf16.mxu1 %v5804_v9  ;;  %v5815_v8 = vld [vmem:[%s7743_s7 + $0x420] sm:$0xff]  }
 0x471   :  { %5235 = vmatpush3.bf16.msra.mxu0 %v5771_v7  ;;  %5321 = vmatpush3.bf16.msra.mxu1 %v5805_v13  ;;  %v5818_v7 = vld [vmem:[%s7743_s7 + $0x468] sm:$0xff]  }
 0x472   :  { %5236 = vmatprep.subr.bf16.mxu0 %v5772_v15  ;;  %5322 = vmatprep.subr.bf16.mxu1 %v5808_v18  ;;  %v5819_v13 = vld [vmem:[%s7743_s7 + $0x428] sm:$0xff]   ;;  %v5822_v15 = vld [vmem:[%s7743_s7 + $0x470] sm:$0xff]  }
 0x473   :  { %v5823_v18 = vld [vmem:[%s7743_s7 + $0x430] sm:$0xff]  }
 0x475   :  { %5237 = vmatpush3.bf16.msra.mxu0 %v5773_v55  ;;  %5323 = vmatpush3.bf16.msra.mxu1 %v5809_v19  ;;  %v5826_v55 = vld [vmem:[%s7743_s7 + $0x478] sm:$0xff]  }
 0x476   :  { %5238 = vmatprep.subr.bf16.mxu0 %v5774_v12  ;;  %5324 = vmatprep.subr.bf16.mxu1 %v5812_v22  ;;  %v5827_v19 = vld [vmem:[%s7743_s7 + $0x438] sm:$0xff]   ;;  %v5830_v12 = vld [vmem:[%s7743_s7 + $0x540] sm:$0xff]  }
 0x479   :  { %5239 = vmatpush3.bf16.msra.mxu0 %v5775_v63  ;;  %5325 = vmatpush3.bf16.msra.mxu1 %v5813_v24 }
 0x47a   :  { %5240 = vmatprep.subr.bf16.mxu0 %v5776_v47  ;;  %5326 = vmatprep.subr.bf16.mxu1 %v5816_v11  ;;  %v2128_v47 = vld [vmem:[#allocation3 + $0x15] sm:$0x7] }
 0x47d   :  { %5241 = vmatpush3.bf16.msra.mxu0 %v5777_v27  ;;  %5327 = vmatpush3.bf16.msra.mxu1 %v5817_v36  ;;  %v2360_v27 = vrot.slane %v2353_v38, %v6593_v10 }
 0x47e   :  { %5242 = vmatprep.subr.bf16.mxu0 %v5778_v46  ;;  %5328 = vmatprep.subr.bf16.mxu1 %v5820_v61 }
 0x47f   :  { %v2362_v36 = vshll.u32 %v2360_v27, 16 }
 0x481   :  { %5243 = vmatpush3.bf16.msra.mxu0 %v5779_v29  ;;  %5329 = vmatpush3.bf16.msra.mxu1 %v5821_v31 }
 0x482   :  { %5244 = vmatprep.subr.bf16.mxu0 %v5780_v60  ;;  %5330 = vmatprep.subr.bf16.mxu1 %v5824_v30 }
 0x485   :  { %5245 = vmatpush3.bf16.msra.mxu0 %v5781_v32  ;;  %5331 = vmatpush3.bf16.msra.mxu1 %v5825_v21 }
 0x486   :  { %5252 = vmatprep.subr.bf16.mxu0 %v5782_v34  ;;  %5332 = vmatprep.subr.bf16.mxu1 %v5828_v42 }
 0x488   :  { %4320 = vmatmul.mubr.bf16.vlgmr.msra.gmra.mrb[32].mxu0 %v2867_v49 }
 0x489   :  { %5253 = vmatpush3.bf16.msra.mxu0 %v5783_v43  ;;  %4359 = vmatprep.mubr.bf16.mxu0 %v7362_v5  ;;  %v5814_v5 = vld [vmem:[%s7743_s7 + $0x460] sm:$0xff]  }
 0x48a   :  { %5254 = vmatprep.subr.bf16.mxu0 %v5784_v51  ;;  %5333 = vmatpush3.bf16.msra.mxu1 %v5829_v14 }
 0x48b   :  { %4527 = vmatprep.subr.bf16.mxu1 %v6158_v6 }
 0x48d   :  { %5255 = vmatpush3.bf16.msra.mxu0 %v5785_v17 }
 0x48e   :  { %5256 = vmatprep.subr.bf16.mxu0 %v5786_v44  ;;  %v5831_v44 = vld [vmem:[%s7743_s7 + $0x500] sm:$0xff]  }
 0x491   :  { %5257 = vmatpush3.bf16.msra.mxu0 %v5787_v28 }
 0x492   :  { %5258 = vmatprep.subr.bf16.mxu0 %v5788_v54 }
 0x495   :  { %5259 = vmatpush3.bf16.msra.mxu0 %v5789_v39  ;;  %v5833_v39 = vld [vmem:[%s7743_s7 + $0x580] sm:$0xff]  }
 0x496   :  { %5260 = vmatprep.subr.bf16.mxu0 %v5790_v37  ;;  %v5834_v37 = vld [vmem:[%s7743_s7 + $0x548] sm:$0xff]  }
 0x499   :  { %5261 = vmatpush3.bf16.msra.mxu0 %v5791_v58 }
 0x49a   :  { %5262 = vmatprep.subr.bf16.mxu0 %v5792_v56 }
 0x49d   :  { %5263 = vmatpush3.bf16.msra.mxu0 %v5793_v40  ;;  %v5835_v40 = vld [vmem:[%s7743_s7 + $0x508] sm:$0xff]  }
 0x49e   :  { %5264 = vmatprep.subr.bf16.mxu0 %v5794_v23  ;;  %v5837_v23 = vld [vmem:[%s7743_s7 + $0x550] sm:$0xff]  }
 0x4a1   :  { %5265 = vmatpush3.bf16.msra.mxu0 %v5795_v41  ;;  %v5836_v41 = vld [vmem:[%s7743_s7 + $0x588] sm:$0xff]  }
 0x4a2   :  { %5266 = vmatprep.subr.bf16.mxu0 %v5796_v3  ;;  %v5838_v3 = vld [vmem:[%s7743_s7 + $0x510] sm:$0xff]  }
 0x4a5   :  { %5267 = vmatpush3.bf16.msra.mxu0 %v5797_v35  ;;  %v5840_v35 = vld [vmem:[%s7743_s7 + $0x558] sm:$0xff]  }
 0x4a6   :  { %5296 = vmatprep.subr.bf16.mxu0 %v5798_v2  ;;  %v5839_v2 = vld [vmem:[%s7743_s7 + $0x590] sm:$0xff]  }
 0x4a8   :  { %4360 = vmatmul.mubr.bf16.vlgmr.msra.gmra.mrb[36].mxu0 %v7359_v62  ;;  %v5810_v62 = vld [vmem:[%s7743_s7 + $0x458] sm:$0xff]  }
 0x4a9   :  { %5297 = vmatpush3.bf16.msra.mxu0 %v5799_v4 }
 0x4aa   :  { %5298 = vmatprep.subr.bf16.mxu0 %v5802_v26  ;;  %v5841_v26 = vld [vmem:[%s7743_s7 + $0x518] sm:$0xff]  }
 0x4ad   :  { %5299 = vmatpush3.bf16.msra.mxu0 %v5803_v45 }
 0x4ae   :  { %5300 = vmatprep.subr.bf16.mxu0 %v5806_v52  ;;  %v5843_v52 = vld [vmem:[%s7743_s7 + $0x560] sm:$0xff]  }
 0x4b1   :  { %5301 = vmatpush3.bf16.msra.mxu0 %v5807_v50 }
 0x4b2   :  { %5302 = vmatprep.subr.bf16.mxu0 %v5810_v62 }
 0x4b3   :  { %v5136_v48 = vpop.f32.mrb[12].mxu0 }
 0x4b4   :  { %v5137_v33 = vpop.f32.mrb[13].mxu0 }
 0x4b5   :  { %v5138_v25 = vadd.f32 %v5137_v33, %v5136_v48  ;;  %v5139_v20 = vpop.f32.mrb[14].mxu0  ;;  %5303 = vmatpush3.bf16.msra.mxu0 %v5811_v0  ;;  %v5842_v0 = vld [vmem:[%s7743_s7 + $0x598] sm:$0xff]   ;;  %v5844_v33 = vld [vmem:[%s7743_s7 + $0x520] sm:$0xff]  }
 0x4b6   :  { %v5140_v9 = vpop.f32.mrb[15].mxu0  ;;  %5304 = vmatprep.subr.bf16.mxu0 %v5814_v5  ;;  %v5845_v20 = vld [vmem:[%s7743_s7 + $0x5a0] sm:$0xff]  }
 0x4b7   :  { %v5849_v9 = vld [vmem:[%s7743_s7 + $0x570] sm:$0xff]  }
 0x4b9   :  { %5305 = vmatpush3.bf16.msra.mxu0 %v5815_v8  ;;  %v5847_v8 = vld [vmem:[%s7743_s7 + $0x528] sm:$0xff]  }
 0x4ba   :  { %5306 = vmatprep.subr.bf16.mxu0 %v5818_v7  ;;  %v5848_v7 = vld [vmem:[%s7743_s7 + $0x5a8] sm:$0xff]  }
 0x4bd   :  { %5307 = vmatpush3.bf16.msra.mxu0 %v5819_v13  ;;  %v5850_v13 = vld [vmem:[%s7743_s7 + $0x530] sm:$0xff]  }
 0x4be   :  { %5308 = vmatprep.subr.bf16.mxu0 %v5822_v15  ;;  %v5852_v15 = vld [vmem:[%s7743_s7 + $0x578] sm:$0xff]  }
 0x4c1   :  { %5309 = vmatpush3.bf16.msra.mxu0 %v5823_v18  ;;  %v5851_v18 = vld [vmem:[%s7743_s7 + $0x5b0] sm:$0xff]  }
 0x4c2   :  { %5310 = vmatprep.subr.bf16.mxu0 %v5826_v55  ;;  %v5853_v55 = vld [vmem:[%s7743_s7 + $0x538] sm:$0xff]  }
 0x4c4   :  { %v2124_v22 = vpop.permute.xlu1 %2123 }
 0x4c5   :  { %v2125_v63 = vrot.slane %v2124_v22, 7  ;;  %5311 = vmatpush3.bf16.msra.mxu0 %v5827_v19  ;;  %v5854_v19 = vld [vmem:[%s7743_s7 + $0x5b8] sm:$0xff]  }
 0x4c6   :  { %5340 = vmatprep.subr.bf16.mxu0 %v5830_v12 }
 0x4c7   :  { %v2126_v24 = vsel %vm7902_vm13, %v2125_v63, %v2124_v22  ;;  %v5855_v22 = vld [vmem:[%s7743_s7 + $0x5c0] sm:$0xff]   ;;  %v5856_v63 = vld [vmem:[%s7743_s7 + $0x5c8] sm:$0xff]  }
 0x4c8   :  { %v2129_v11 = vsel %vm7903_vm8, %v2126_v24, %v2128_v47 }
 0x4c9   :  { %2130 = vst [vmem:[#allocation3 + $0x15] sm:$0x7] %v2129_v11 }
 0x4d0   :  { %v2365_v46 = vld [vmem:[#allocation3 + $0x13] sm:$0x7]  ;;  %v2380_v29 = vpop.permute.xlu1 %2379 }
 0x4d1   :  { %v2366_v61 = vsel %vm7904_vm3, %v2362_v36, %v2365_v46  ;;  %v2381_v30 = vrot.slane %v2380_v29, 7  ;;  %v5858_v36 = vld [vmem:[%s7743_s7 + $0x5d8] sm:$0xff]  }
 0x4d2   :  { %2367 = vst [vmem:[#allocation3 + $0x13] sm:$0x7] %v2366_v61 }
 0x4d3   :  { %v5158_v31 = vpop.f32.mrb[16].mxu0  ;;  %v2382_v42 = vsel %vm7905_vm15, %v2381_v30, %v2380_v29  ;;  %v5859_v29 = vld [vmem:[%s7743_s7 + $0x5e0] sm:$0xff]  }
 0x4d4   :  { %v5159_v60 = vpop.f32.mrb[17].mxu0 }
 0x4d5   :  { %v5160_v32 = vadd.f32 %v5159_v60, %v5158_v31  ;;  %v5161_v21 = vpop.f32.mrb[18].mxu0  ;;  %v5860_v31 = vld [vmem:[%s7743_s7 + $0x5e8] sm:$0xff]  }
 0x4d6   :  { %v5162_v53 = vpop.f32.mrb[19].mxu0 }
 0x4d7   :  { %v4162_v34 = vadd.f32 %v5160_v32, %v5138_v25  ;;  %v5846_v25 = vld [vmem:[%s7743_s7 + $0x568] sm:$0xff]  }
 0x4d9   :  { %v2384_v43 = vld [vmem:[#allocation3 + $0x15] sm:$0x7] }
 0x4da   :  { %v2385_v57 = vsel %vm6829_vm10, %v2382_v42, %v2384_v43  ;;  %vm7906_vm10 = vcmask 785408  }
 0x4db   :  { %2386 = vst [vmem:[#allocation3 + $0x15] sm:$0x7] %v2385_v57 }
 0x4e2   :  { %v2389_v59 = vld [vmem:[#allocation3 + $0x10] sm:$0xff] }
 0x4e3   :  { %v2878_v1 = vrot.slane %v2389_v59, %v6593_v10  ;;  %v2871_v38 = vcombine.high %v2389_v59, %v2389_v59 }
 0x4e5   :  { %v2886_v49 = vcombine.high %v2878_v1, %v2878_v1  ;;  %v7571_v51 = vrot.slane %v2871_v38, %v6593_v10  ;;  %v2894_v14 = vrot.slane %v2878_v1, %v6593_v10 }
 0x4e7   :  { %v2908_v17 = vrot.slane %v2886_v49, %v6593_v10  ;;  %v2887_v16 = vcombine.high %v7571_v51, %v7571_v51  ;;  %v2916_v58 = vcombine.high %v2894_v14, %v2894_v14  ;;  %v2901_v12 = vrot.slane %v7571_v51, %v6593_v10 }
 0x4e9   :  { %4439 = vmatprep.mubr.bf16.mxu0 %v2908_v17  ;;  %v2918_v28 = vcombine.high %v2908_v17, %v2908_v17  ;;  %v2915_v54 = vrot.slane %v2887_v16, %v6593_v10  ;;  %v5857_v10 = vld [vmem:[%s7743_s7 + $0x5d0] sm:$0xff]   ;;  %v2917_v60 = vcombine.high %v2901_v12, %v2901_v12  ;;  %v4584_v16 = vld [vmem:[%s7746_s10] sm:$0xff] }
 0x4ea   :  { %4440 = vmatmul.mubr.bf16.vlgmr.msra.gmra.mrb[40].mxu0 %v2894_v14 }
 0x4eb   :  { %5341 = vmatpush3.bf16.msra.mxu0 %v5831_v44  ;;  %4479 = vmatprep.mubr.bf16.mxu1 %v2918_v28  ;;  %v2919_v56 = vcombine.high %v2915_v54, %v2915_v54  ;;  %v4585_v28 = vld [vmem:[%s7746_s10 + $0x8] sm:$0xff] }
 0x4ec   :  { %4519 = vmatprep.mubr.bf16.mxu0 %v2915_v54  ;;  %4480 = vmatmul.mubr.bf16.vlgmr.msra.gmra.mrb[40].mxu1 %v2916_v58  ;;  %v5395_v54 = vpack.c.bf16 %v4585_v28, %v4584_v16  ;;  %v4587_v58 = vld [vmem:[%s7746_s10 + $0x18] sm:$0xff] }
 0x4ed   :  { %4528 = vmatpush1.bf16.msra.mxu1 %v5833_v39  ;;  %5342 = vmatprep.subr.bf16.mxu0 %v5834_v37  ;;  %v5895_v39 = vmov 0.0|0.0   ;;  %v4586_v37 = vld [vmem:[%s7746_s10 + $0x10] sm:$0xff] }
 0x4ee   :  { %5112 = vmatprep.mubr.msk.bf16.mxu1 %vm7906_vm10, %v2919_v56  ;;  %4529 = vmatprep.subr.bf16.mxu1 %v6158_v6 }
 0x4ef   :  { %5343 = vmatpush3.bf16.msra.mxu0 %v5835_v40  ;;  %v5398_v40 = vpack.c.bf16 %v4587_v58, %v4586_v37 }
 0x4f0   :  { %5344 = vmatprep.subr.bf16.mxu0 %v5837_v23 }
 0x4f1   :  { %4530 = vmatpush1.bf16.msra.mxu1 %v5836_v41 }
 0x4f2   :  { %4531 = vmatprep.subr.bf16.mxu1 %v6158_v6 }
 0x4f3   :  { %v5180_v4 = vpop.f32.mrb[20].mxu0  ;;  %5345 = vmatpush3.bf16.msra.mxu0 %v5838_v3 }
 0x4f4   :  { %v5181_v45 = vpop.f32.mrb[21].mxu0  ;;  %5346 = vmatprep.subr.bf16.mxu0 %v5840_v35 }
 0x4f5   :  { %v5182_v50 = vadd.f32 %v5181_v45, %v5180_v4  ;;  %v5183_v62 = vpop.f32.mrb[22].mxu0  ;;  %4532 = vmatpush1.bf16.msra.mxu1 %v5839_v2  ;;  %v5897_v4 = vmov 0.0  }
 0x4f6   :  { %v5184_v5 = vpop.f32.mrb[23].mxu0  ;;  %4533 = vmatprep.subr.bf16.mxu1 %v6158_v6 }
 0x4f7   :  { %v4202_v48 = vadd.f32 %v5182_v50, %v4162_v34  ;;  %5347 = vmatpush3.bf16.msra.mxu0 %v5841_v26 }
 0x4f8   :  { %5348 = vmatprep.subr.bf16.mxu0 %v5843_v52 }
 0x4f9   :  { %4534 = vmatpush1.bf16.msra.mxu1 %v5842_v0 }
 0x4fa   :  { %4535 = vmatprep.subr.bf16.mxu1 %v6158_v6 }
 0x4fb   :  { %5349 = vmatpush3.bf16.msra.mxu0 %v5844_v33 }
 0x4fc   :  { %5350 = vmatprep.subr.bf16.mxu0 %v5846_v25 }
 0x4fd   :  { %4536 = vmatpush1.bf16.msra.mxu1 %v5845_v20 }
 0x4fe   :  { %4537 = vmatprep.subr.bf16.mxu1 %v6158_v6 }
 0x4ff   :  { %5351 = vmatpush3.bf16.msra.mxu0 %v5847_v8 }
 0x500   :  { %5352 = vmatprep.subr.bf16.mxu0 %v5849_v9 }
 0x501   :  { %4538 = vmatpush1.bf16.msra.mxu1 %v5848_v7 }
 0x502   :  { %4539 = vmatprep.subr.bf16.mxu1 %v6158_v6 }
 0x503   :  { %5353 = vmatpush3.bf16.msra.mxu0 %v5850_v13 }
 0x504   :  { %5354 = vmatprep.subr.bf16.mxu0 %v5852_v15 }
 0x505   :  { %4540 = vmatpush1.bf16.msra.mxu1 %v5851_v18 }
 0x506   :  { %4541 = vmatprep.subr.bf16.mxu1 %v6158_v6 }
 0x507   :  { %5355 = vmatpush3.bf16.msra.mxu0 %v5853_v55 }
 0x508   :  { %5394 = vmatprep.subr.bf16.mxu0 %v5895_v39 }
 0x509   :  { %4542 = vmatpush1.bf16.msra.mxu1 %v5854_v19 }
 0x50a   :  { %4520 = vmatmul.mubr.bf16.vlgmr.msra.gmra.mrb[44].mxu0 %v2901_v12  ;;  %4543 = vmatprep.subr.bf16.mxu1 %v6158_v6 }
 0x50b   :  { %5396 = vmatpush3.bf16.msra.mxu0 %v5395_v54  ;;  %5380 = vmatprep.mubr.msk.f32.mxu0 %vm5896_vm1, %v5897_v4 }
 0x50c   :  { %5397 = vmatprep.subr.bf16.mxu0 %v5895_v39 }
 0x50d   :  { %4544 = vmatpush1.bf16.msra.mxu1 %v5855_v22  ;;  %v5113_v22 = vld [vmem:[%s7744_s8] ss:$0 sm:$0xff] }
 0x50e   :  { %4545 = vmatprep.subr.bf16.mxu1 %v6158_v6 }
 0x50f   :  { %5399 = vmatpush3.bf16.msra.mxu0 %v5398_v40 }
 0x510   :  { %5400 = vmatprep.subr.bf16.mxu0 %v5895_v39 }
 0x511   :  { %4546 = vmatpush1.bf16.msra.mxu1 %v5856_v63 }
 0x512   :  { %4547 = vmatprep.subr.bf16.mxu1 %v6158_v6 }
 0x513   :  { %v5202_v24 = vpop.f32.mrb[24].mxu0 }
 0x514   :  { %v5203_v47 = vpop.f32.mrb[25].mxu0 }
 0x515   :  { %v5204_v11 = vadd.f32 %v5203_v47, %v5202_v24  ;;  %v5205_v27 = vpop.f32.mrb[26].mxu0  ;;  %4548 = vmatpush1.bf16.msra.mxu1 %v5857_v10  ;;  %v5114_v24 = vld [vmem:[%s7745_s9] ss:$0 sm:$0xff] }
 0x516   :  { %v5206_v46 = vpop.f32.mrb[27].mxu0  ;;  %4549 = vmatprep.subr.bf16.mxu1 %v6158_v6 }
 0x517   :  { %v4242_v61 = vadd.f32 %v5204_v11, %v4202_v48 }
 0x519   :  { %4550 = vmatpush1.bf16.msra.mxu1 %v5858_v36 }
 0x51a   :  { %4551 = vmatprep.subr.bf16.mxu1 %v6158_v6 }
 0x51d   :  { %4552 = vmatpush1.bf16.msra.mxu1 %v5859_v29  ;;  %v4680_v29 = vld [vmem:[%s7749_s13 + $0x8] sm:$0xff] }
 0x51e   :  { %4553 = vmatprep.subr.bf16.mxu1 %v6158_v6 }
 0x521   :  { %4554 = vmatpush1.bf16.msra.mxu1 %v5860_v31 }
 0x524   :  { %4560 = vmatmul.mubr.bf16.vlgmr.msra.gmra.mrb[44].mxu1 %v2917_v60  ;;  %v4681_v60 = vld [vmem:[%s7749_s13 + $0x10] sm:$0xff] }
 0x53b   :  { %v5224_v30 = vpop.f32.mrb[28].mxu0 }
 0x53c   :  { %v5225_v32 = vpop.f32.mrb[29].mxu0 }
 0x53d   :  { %v5226_v21 = vadd.f32 %v5225_v32, %v5224_v30  ;;  %v5227_v53 = vpop.f32.mrb[30].mxu0  ;;  %v4682_v30 = vld [vmem:[%s7749_s13 + $0x18] sm:$0xff] }
 0x53e   :  { %v5228_v34 = vpop.f32.mrb[31].mxu0  ;;  %v5404_v32 = vpack.c.bf16 %v4682_v30, %v4681_v60 }
 0x53f   :  { %v4282_v42 = vadd.f32 %v5226_v21, %v4242_v61  ;;  %v5290_v43 = vpop.f32.mrb[36].mxu1  ;;  %v4679_v61 = vld [vmem:[%s7749_s13] sm:$0xff]  ;;  %s5898_s13 = smov [#allocation4]  }
 0x540   :  { %v5291_v57 = vpop.f32.mrb[37].mxu1  ;;  %v5401_v31 = vpack.c.bf16 %v4680_v29, %v4679_v61  ;;  %v5116_v21 = vld [vmem:[%s7747_s11] ss:$0 sm:$0xff]  ;;  %s4771_s7 = sshll.u32 %s5898_s13, 4  ;;  %s4772_s7 = int_to_ptr.vmem [resolvable:$true] %s4771_s7 }
 0x541   :  { %v5292_v59 = vadd.f32 %v5291_v57, %v5290_v43  ;;  %v5293_v1 = vpop.f32.mrb[38].mxu1  ;;  %v5117_v34 = vld [vmem:[%s7748_s12] ss:$0 sm:$0xff]  ;;  %s5862_s11 = scalar_lea.vmem %s4772_s7, 32  ;;  %p5867_p1 = scmp.lt.s32.totalorder %s4772_s7, %s4772_s7 }
 0x542   :  { %v5294_v38 = vpop.f32.mrb[39].mxu1  ;;  %v5118_v1 = vld [vmem:[%s7750_s14] ss:$0 sm:$0xff]  ;;  %p5863_p0 = scmp.ne.s32.totalorder %s4772_s7, %s5862_s11  ;;  %p5868_p2 = scmp.lt.s32.totalorder %s5862_s11, %s5862_s11 }
 0x544   :  { %p5869_p3 = por %p5868_p2, %p5867_p1 }
 0x546   :  { %p5870_p4 = pnand %p5869_p3, %p5863_p0 }
 0x55b   :  { %v5246_v49 = vpop.f32.mrb[32].mxu0 }
 0x55c   :  { %v5247_v51 = vpop.f32.mrb[33].mxu0 }
 0x55d   :  { %v5248_v14 = vadd.f32 %v5247_v51, %v5246_v49  ;;  %v5249_v17 = vpop.f32.mrb[34].mxu0 }
 0x55e   :  { %v5250_v44 = vpop.f32.mrb[35].mxu0 }
 0x55f   :  { %v4322_v6 = vadd.f32 %v5248_v14, %v4282_v42 }
 0x57b   :  { %v5268_v56 = vpop.f32.mrb[36].mxu0 }
 0x57c   :  { %v5269_v23 = vpop.f32.mrb[37].mxu0 }
 0x57d   :  { %v5270_v41 = vadd.f32 %v5269_v23, %v5268_v56  ;;  %v5271_v3 = vpop.f32.mrb[38].mxu0 }
 0x57e   :  { %v5272_v35 = vpop.f32.mrb[39].mxu0 }
 0x57f   :  { %v4362_v2 = vadd.f32 %v5270_v41, %v4322_v6 }
 0x581   :  { %v4402_v26 = vadd.f32 %v5292_v59, %v4362_v2 }
 0x5bd   :  { %v5312_v45 = vpop.f32.mrb[40].mxu0 }
 0x5be   :  { %v5313_v52 = vpop.f32.mrb[41].mxu0 }
 0x5bf   :  { %v5314_v50 = vadd.f32 %v5313_v52, %v5312_v45  ;;  %v5315_v62 = vpop.f32.mrb[42].mxu0  ;;  %v5334_v0 = vpop.f32.mrb[40].mxu1 }
 0x5c0   :  { %v5316_v5 = vpop.f32.mrb[43].mxu0  ;;  %v5335_v48 = vpop.f32.mrb[41].mxu1 }
 0x5c1   :  { %v4442_v33 = vadd.f32 %v5314_v50, %v4402_v26  ;;  %v5336_v25 = vadd.f32 %v5335_v48, %v5334_v0  ;;  %v5337_v20 = vpop.f32.mrb[42].mxu1 }
 0x5c2   :  { %v5338_v8 = vpop.f32.mrb[43].mxu1 }
 0x5c3   :  { %v4482_v9 = vadd.f32 %v5336_v25, %v4442_v33 }
 0x5dd   :  { %v5356_v7 = vpop.f32.mrb[44].mxu0 }
 0x5de   :  { %v5357_v13 = vpop.f32.mrb[45].mxu0 }
 0x5df   :  { %v5358_v15 = vadd.f32 %v5357_v13, %v5356_v7  ;;  %v5359_v18 = vpop.f32.mrb[46].mxu0 }
 0x5e0   :  { %v5360_v55 = vpop.f32.mrb[47].mxu0 }
 0x5e1   :  { %v4522_v19 = vadd.f32 %v5358_v15, %v4482_v9 }
 0x5f7   :  { %v4561_v12 = vpop.f32.mrb[44].mxu1 }
 0x5f8   :  { %v4562_v63 = vadd.f32 %v4561_v12, %v4522_v19  ;;  %v4563_v10 = vpop.f32.mrb[45].mxu1 }
 0x5f9   :  { %v4564_v47 = vpop.f32.mrb[46].mxu1 }
 0x5fa   :  { %v4574_v11 = vmul.f32 %v5113_v22, %v4562_v63  ;;  %v4565_v27 = vpop.f32.mrb[47].mxu1 }
 0x5fc   :  { %v4582_v36 = vadd.f32 %v5114_v24, %v4574_v11 }
 0x5fe   :  { %v4583_v46 = vmax.f32 %v4582_v36, 0.0 }
 0x600   :  { %5381 = vmatmul.mubr.msk.f32.vlgmr.msra.gmra.mrb[48].mxu0 %vm2056_vm11, %v4583_v46 }
 0x601   :  { %5391 = vmatprep.mubr.msk.f32.mxu0 %vm5896_vm1, %v5897_v4  ;;  %5402 = vmatpush3.bf16.msra.mxu0 %v5401_v31 }
 0x602   :  { %5403 = vmatprep.subr.bf16.mxu0 %v5895_v39 }
 0x605   :  { %5405 = vmatpush3.bf16.msra.mxu0 %v5404_v32 }
 0x6d3   :  { %v4658_v53 = vpop.f32.mrb[48].mxu0 }
 0x6d4   :  { %v4669_v42 = vmul.f32 %v5116_v21, %v4658_v53  ;;  %v5382_v43 = vpop.f32.mrb[49].mxu0 }
 0x6d6   :  { %v4677_v57 = vadd.f32 %v5117_v34, %v4669_v42 }
 0x6d8   :  { %v4678_v59 = vmax.f32 %v4677_v57, 0.0 }
 0x6da   :  { %5392 = vmatmul.mubr.msk.f32.vlgmr.msra.gmra.mrb[50].mxu0 %vm2056_vm11, %v4678_v59 }
 0x7ad   :  { %v4759_v38 = vpop.f32.mrb[50].mxu0 }
 0x7ae   :  { %v4760_v49 = vadd.f32 %v5118_v1, %v4759_v38  ;;  %v5393_v51 = vpop.f32.mrb[51].mxu0 }
 0x7b0   :  { %4764 = vst.msk [vmem:[#allocation4] sm:$0x3] %vm4763_vm5, %v4760_v49 }
 0x7b1   :  { %5873 = shalt.err (!%p5870_p4)
}
 0x7b2   :  { %s5874_s19 = scalar_lea.hbm %s7751_s15, 32 }
 0x7b3   :  { %p5875_p5 = scmp.ne.s32.totalorder %s7751_s15, %s5874_s19  ;;  %p5878_p6 = scmp.lt.u32.totalorder %s5874_s19, %s7751_s15 }
 0x7b5   :  { %p5880_p7 = pnand %p5878_p6, %p5875_p5 }
 0x7b7   :  { %5883 = shalt.err (!%p5880_p7)
}
 0x7b8   :  { %4774 = dma.vmem_to_hbm [thread:$0]  %s4772_s7, 32, %s7751_s15, [#allocation5]  }
 0x7b9   :  { %5884 = dma.done.wait [#allocation5], 32  }
 0x7ba   :  { %5885 = vsyncadd [#allocation5], 4294967264 }
 0x7bb   :  { %4778 = vsyncpa [#allocation5], 1 }

</bundles_post_ra>
